<compile_context>
chip_gen: v7x
topology: tpu7x:2x2x1
jax: 0.10.0
libtpu: 0.0.40
codegen_flags: <defaults>
</compile_context>

<pallas_src>
import math

import jax
import jax.numpy as jnp
from jax.experimental import pallas as pl
from jax.experimental.pallas import tpu as pltpu


# ----------------------------------------------------------------------------
# Fused FE kernel.  Conv-stage rows: r = h*(W*B) + w*B + b.
# LSTM-stage rows: s = t*B + b  (t = w = timestep).
# ----------------------------------------------------------------------------
def _make_fe_kernel(B, H, W, C1, C2, HID):
    NSEQ = W * B                 # lstm rows per conv h-block
    G4 = 4 * HID                 # one LSTM's fused gate width
    G8 = 8 * HID                 # both LSTMs' gates side by side

    def kernel(xcol_ref, w1_ref, b1_ref, msk_ref, w2_ref, b2_ref,
               wih1_ref, bzf_ref, wbig_ref, gfix_ref, out_ref):
        f32 = jnp.float32
        bf16 = jnp.bfloat16

        # ---- conv1 (+ReLU), evaluated at all 9 conv2 tap positions ----------
        # xcol: 5x5 im2col of the input (wrapper); w1big: conv1 weight expanded
        # per tap; mask zeroes taps whose centre falls outside the image
        # (= conv2's zero padding).
        s1 = jnp.dot(xcol_ref[...], w1_ref[...], preferred_element_type=f32)
        slab = jnp.maximum(s1 + b1_ref[...], 0.0) * msk_ref[...]   # (NROW, 9*C1)

        # ---- conv2 (+ReLU): one K = 9*C1 GEMM --------------------------------
        s2 = jnp.dot(slab.astype(bf16), w2_ref[...], preferred_element_type=f32)
        a2 = jnp.maximum(s2 + b2_ref[...], 0.0)                    # (NROW, C2)

        # ---- regroup rows (h, s) -> (s, h*C2) for the LSTM feature axis ------
        a2l = jnp.concatenate(
            [a2[h * NSEQ:(h + 1) * NSEQ, :] for h in range(H)], axis=1)

        # ---- LSTM1 input projection: single K = H*C2 GEMM, biases folded -----
        # wih1_ref has zero columns for the LSTM2 half, bzf = [bz1 | bz2], so
        # zfull[:, :4H] = x_t @ Wih1 + bz1 and zfull[:, 4H:] = bz2 (constant).
        zfull = jnp.dot(a2l.astype(bf16), wih1_ref[...],
                        preferred_element_type=f32) + bzf_ref[...]  # (NSEQ, G8)

        # ---- hoisted, recurrence-independent pieces --------------------------
        wbig = wbig_ref[...]                                        # (2H, G8)
        gscale = jnp.broadcast_to(gfix_ref[0:1, :], (B, G8))        # 2 on g lanes
        gofs = jnp.broadcast_to(gfix_ref[1:2, :], (B, G8))          # 1 on g lanes
        zsteps = [zfull[t * B:(t + 1) * B, :] for t in range(W)]
        zsteps.append(jnp.broadcast_to(bzf_ref[...], (B, G8)))      # tail step

        # ---- skewed, fused LSTM1+LSTM2 recurrence ----------------------------
        # Step t: LSTM1 at time t (t < W) and LSTM2 at time t-1 (t >= 1), both
        # fed by ONE (B, 2H) @ (2H, 8H) matmul on [h1_{t-1} | h2_{t-2}].
        h1 = jnp.zeros((B, HID), f32)
        c1 = jnp.zeros((B, HID), f32)
        h2 = jnp.zeros((B, HID), f32)
        c2 = jnp.zeros((B, HID), f32)
        for t in range(W + 1):
            if t == 0:
                pre = zsteps[0]                        # h1_{-1} = h2_{-2} = 0
            else:
                hcat = jnp.concatenate([h1, h2], axis=1).astype(bf16)
                big = jnp.dot(hcat, wbig, preferred_element_type=f32)
                pre = zsteps[t] + big                                # (B, G8)
            # one EUP pass for all gates: i/f/o = sigmoid, g = 2*sigmoid(2x)-1
            act = jax.nn.sigmoid(pre) * gscale - gofs
            if t < W:                                  # LSTM1, time t
                c1 = act[:, HID:2 * HID] * c1 \
                    + act[:, 0:HID] * act[:, 2 * HID:3 * HID]
                h1 = act[:, 3 * HID:G4] * jnp.tanh(c1)
            if t >= 1:                                 # LSTM2, time t-1
                c2 = act[:, G4 + HID:G4 + 2 * HID] * c2 \
                    + act[:, G4:G4 + HID] * act[:, G4 + 2 * HID:G4 + 3 * HID]
                h2 = act[:, G4 + 3 * HID:G8] * jnp.tanh(c2)

        out_ref[...] = h2                              # h_n of LSTM2: (B, HID)

    return kernel


# ----------------------------------------------------------------------------
# FE.forward wrapper: tiny XLA prep (im2col, masks, weight fusion) + 1 kernel.
# ----------------------------------------------------------------------------
def fe_forward(params, x):
    B, C, H, W = x.shape                   # C == 1
    C1, C2 = 10, 20
    HID = params["w_hh1"].shape[1]
    G4 = 4 * HID
    NSEQ = W * B
    NROW = H * NSEQ
    f32, bf16 = jnp.float32, jnp.bfloat16

    # g-gate pre-scaling vectors (tanh(x) = 2*sigmoid(2x) - 1 trick)
    lane = jnp.arange(G4)
    is_g = (lane >= 2 * HID) & (lane < 3 * HID)
    scale4 = jnp.where(is_g, 2.0, 1.0).astype(f32)
    ofs4 = jnp.where(is_g, 1.0, 0.0).astype(f32)
    gate_fix = jnp.stack([jnp.tile(scale4, 2), jnp.tile(ofs4, 2)])   # (2, 2*G4)

    # conv1 im2col over the conv2 receptive field (5x5 window, zero pad 2);
    # rows ordered (h, w, b)
    xpad = jnp.pad(x[:, 0], ((0, 0), (2, 2), (2, 2)))
    taps = [xpad[:, jy:jy + H, jx:jx + W] for jy in range(5) for jx in range(5)]
    xcol = jnp.stack(taps, axis=-1)                                   # (B,H,W,25)
    xcol = jnp.transpose(xcol, (1, 2, 0, 3)).reshape(NROW, 25).astype(bf16)

    # conv1 weight expanded to the 9 conv2 tap positions: (25, 9*C1)
    w1big = jnp.zeros((25, 9 * C1), f32)
    for dy in range(3):
        for dx in range(3):
            k = dy * 3 + dx
            for dyp in range(3):
                for dxp in range(3):
                    j = (dy + dyp) * 5 + (dx + dxp)
                    w1big = w1big.at[j, k * C1:(k + 1) * C1].set(
                        params["conv1_w"][:, 0, dyp, dxp])
    w1big = w1big.astype(bf16)
    b1_90 = jnp.tile(params["conv1_b"], 9)[None, :]                   # (1, 90)

    # conv2 zero-padding mask for the 9 taps: (NROW, 9*C1)
    hh = jnp.arange(H)[:, None, None]
    ww = jnp.arange(W)[None, :, None]
    mk = []
    for dy in range(3):
        for dx in range(3):
            v = ((hh + dy - 1 >= 0) & (hh + dy - 1 < H)
                 & (ww + dx - 1 >= 0) & (ww + dx - 1 < W))
            mk.append(jnp.broadcast_to(v, (H, W, B)))
    mask90 = jnp.stack(mk, axis=-1)[..., None]
    mask90 = jnp.broadcast_to(mask90, (H, W, B, 9, C1))
    mask90 = mask90.reshape(NROW, 9 * C1).astype(f32)

    # conv2 weight as (9*C1, C2), rows ordered (dy, dx, c1)
    w2col = jnp.transpose(params["conv2_w"], (2, 3, 1, 0)).reshape(9 * C1, C2)
    w2col = w2col.astype(bf16)
    b2row = params["conv2_b"][None, :]                                # (1, 20)

    # LSTM1 input projection: permute PyTorch feature f = c2*H + h to the
    # kernel's h*C2 + c2 order, scale g-gate columns, pad with zero columns
    # for the (constant-bias) LSTM2 half.
    wih1 = params["w_ih1"].T                                          # (C2*H, G4)
    wih1 = wih1.reshape(C2, H, G4).transpose(1, 0, 2).reshape(H * C2, G4)
    wih1 = wih1 * scale4[None, :]
    wih1f = jnp.concatenate([wih1, jnp.zeros_like(wih1)], axis=1).astype(bf16)
    bzf = jnp.concatenate(
        [(params["b_ih1"] + params["b_hh1"]) * scale4,
         (params["b_ih2"] + params["b_hh2"]) * scale4])[None, :]      # (1, 2*G4)

    # fused recurrent weight: [h1 | h2] @ [[Whh1, Wih2], [0, Whh2]]
    top = jnp.concatenate([params["w_hh1"].T * scale4[None, :],
                           params["w_ih2"].T * scale4[None, :]], axis=1)
    bot = jnp.concatenate([jnp.zeros((HID, G4), f32),
                           params["w_hh2"].T * scale4[None, :]], axis=1)
    wbig = jnp.concatenate([top, bot], axis=0).astype(bf16)           # (2H, 2*G4)

    kernel = _make_fe_kernel(B, H, W, C1, C2, HID)
    return pl.pallas_call(
        kernel,
        out_shape=jax.ShapeDtypeStruct((B, HID), f32),
        in_specs=[pl.BlockSpec(memory_space=pltpu.MemorySpace.VMEM)] * 10,
        out_specs=pl.BlockSpec(memory_space=pltpu.MemorySpace.VMEM),
    )(xcol, w1big, b1_90, mask90, w2col, b2row, wih1f, bzf, wbig, gate_fix)


# ----------------------------------------------------------------------------
# Deterministic parameter init (PyTorch-style uniform bounds), logical layouts.
# ----------------------------------------------------------------------------
def init_params(key, end_feat, in_h):
    HID = end_feat
    F1 = 20 * in_h
    ks = jax.random.split(key, 12)

    def u(k, shape, bound):
        return jax.random.uniform(k, shape, jnp.float32, -bound, bound)

    p = {}
    b = 1.0 / math.sqrt(1 * 3 * 3)
    p["conv1_w"] = u(ks[0], (10, 1, 3, 3), b)
    p["conv1_b"] = u(ks[1], (10,), b)
    b = 1.0 / math.sqrt(10 * 3 * 3)
    p["conv2_w"] = u(ks[2], (20, 10, 3, 3), b)
    p["conv2_b"] = u(ks[3], (20,), b)

    b = 1.0 / math.sqrt(HID)
    # LSTM1: input = 20*H, hidden = end_feat; gates ordered [i|f|g|o]
    p["w_ih1"] = u(ks[4], (4 * HID, F1), b)
    p["w_hh1"] = u(ks[5], (4 * HID, HID), b)
    p["b_ih1"] = u(ks[6], (4 * HID,), b)
    p["b_hh1"] = u(ks[7], (4 * HID,), b)
    # LSTM2: input = hidden = end_feat
    p["w_ih2"] = u(ks[8], (4 * HID, HID), b)
    p["w_hh2"] = u(ks[9], (4 * HID, HID), b)
    p["b_ih2"] = u(ks[10], (4 * HID,), b)
    p["b_hh2"] = u(ks[11], (4 * HID,), b)
    return p


if __name__ == "__main__":
    key = jax.random.PRNGKey(0)
    k_x, k_p = jax.random.split(key)

    B, C, H, W = 2, 1, 16, 16
    end_feat = 32
    x = jax.random.normal(k_x, (B, C, H, W), jnp.float32)
    params = init_params(k_p, end_feat=end_feat, in_h=H)

    fe = jax.jit(fe_forward)
    feature = fe(params, x)
    jax.block_until_ready(feature)

    assert feature.shape == (B, end_feat), feature.shape
    assert bool(jnp.all(jnp.isfinite(feature)))
    print("KERNEL_OK")
</pallas_src>

<mosaic_0001>
module attributes {stable_mosaic.version = 11 : i64} {
  func.func @kernel(%arg0: memref<512x25xbf16, #tpu.memory_space<vmem>>, %arg1: memref<25x90xbf16, #tpu.memory_space<vmem>>, %arg2: memref<1x90xf32, #tpu.memory_space<vmem>>, %arg3: memref<512x90xf32, #tpu.memory_space<vmem>>, %arg4: memref<90x20xbf16, #tpu.memory_space<vmem>>, %arg5: memref<1x20xf32, #tpu.memory_space<vmem>>, %arg6: memref<320x256xbf16, #tpu.memory_space<vmem>>, %arg7: memref<1x256xf32, #tpu.memory_space<vmem>>, %arg8: memref<64x256xbf16, #tpu.memory_space<vmem>>, %arg9: memref<2x256xf32, #tpu.memory_space<vmem>>, %arg10: memref<2x32xf32, #tpu.memory_space<vmem>>) attributes {dimension_semantics = [], scalar_prefetch = 0 : i64, scratch_operands = 0 : i64, tpu.core_type = #tpu.core_type<tc>} {
    %c0 = arith.constant 0 : index
    %c0_0 = arith.constant 0 : index
    %0 = vector.load %arg0[%c0, %c0_0] : memref<512x25xbf16, #tpu.memory_space<vmem>>, vector<512x25xbf16>
    %c0_1 = arith.constant 0 : index
    %c0_2 = arith.constant 0 : index
    %1 = vector.load %arg1[%c0_1, %c0_2] : memref<25x90xbf16, #tpu.memory_space<vmem>>, vector<25x90xbf16>
    %cst = arith.constant dense<0.000000e+00> : vector<512x90xf32>
    %2 = tpu.matmul %0, %1, %cst {dimension_numbers = #tpu.dot_dimension_numbers<[1], [0], [0], [1], [0, 0, 1, 1], [], []>} : vector<512x25xbf16>, vector<25x90xbf16>, vector<512x90xf32> -> vector<512x90xf32>
    %c0_3 = arith.constant 0 : index
    %c0_4 = arith.constant 0 : index
    %3 = vector.load %arg2[%c0_3, %c0_4] : memref<1x90xf32, #tpu.memory_space<vmem>>, vector<1x90xf32>
    %4 = vector.broadcast %3 : vector<1x90xf32> to vector<512x90xf32>
    %5 = arith.addf %2, %4 : vector<512x90xf32>
    %cst_5 = arith.constant 0.000000e+00 : f32
    %6 = vector.broadcast %cst_5 : f32 to vector<512x90xf32>
    %7 = arith.maximumf %5, %6 : vector<512x90xf32>
    %c0_6 = arith.constant 0 : index
    %c0_7 = arith.constant 0 : index
    %8 = vector.load %arg3[%c0_6, %c0_7] : memref<512x90xf32, #tpu.memory_space<vmem>>, vector<512x90xf32>
    %9 = arith.mulf %7, %8 : vector<512x90xf32>
    %10 = arith.truncf %9 : vector<512x90xf32> to vector<512x90xbf16>
    %c0_8 = arith.constant 0 : index
    %c0_9 = arith.constant 0 : index
    %11 = vector.load %arg4[%c0_8, %c0_9] : memref<90x20xbf16, #tpu.memory_space<vmem>>, vector<90x20xbf16>
    %cst_10 = arith.constant dense<0.000000e+00> : vector<512x20xf32>
    %12 = tpu.matmul %10, %11, %cst_10 {dimension_numbers = #tpu.dot_dimension_numbers<[1], [0], [0], [1], [0, 0, 1, 1], [], []>} : vector<512x90xbf16>, vector<90x20xbf16>, vector<512x20xf32> -> vector<512x20xf32>
    %c0_11 = arith.constant 0 : index
    %c0_12 = arith.constant 0 : index
    %13 = vector.load %arg5[%c0_11, %c0_12] : memref<1x20xf32, #tpu.memory_space<vmem>>, vector<1x20xf32>
    %14 = vector.broadcast %13 : vector<1x20xf32> to vector<512x20xf32>
    %15 = arith.addf %12, %14 : vector<512x20xf32>
    %cst_13 = arith.constant 0.000000e+00 : f32
    %16 = vector.broadcast %cst_13 : f32 to vector<512x20xf32>
    %17 = arith.maximumf %15, %16 : vector<512x20xf32>
    %18 = vector.extract_strided_slice %17 {offsets = [0, 0], sizes = [32, 20], strides = [1, 1]} : vector<512x20xf32> to vector<32x20xf32>
    %19 = vector.extract_strided_slice %17 {offsets = [32, 0], sizes = [32, 20], strides = [1, 1]} : vector<512x20xf32> to vector<32x20xf32>
    %20 = vector.extract_strided_slice %17 {offsets = [64, 0], sizes = [32, 20], strides = [1, 1]} : vector<512x20xf32> to vector<32x20xf32>
    %21 = vector.extract_strided_slice %17 {offsets = [96, 0], sizes = [32, 20], strides = [1, 1]} : vector<512x20xf32> to vector<32x20xf32>
    %22 = vector.extract_strided_slice %17 {offsets = [128, 0], sizes = [32, 20], strides = [1, 1]} : vector<512x20xf32> to vector<32x20xf32>
    %23 = vector.extract_strided_slice %17 {offsets = [160, 0], sizes = [32, 20], strides = [1, 1]} : vector<512x20xf32> to vector<32x20xf32>
    %24 = vector.extract_strided_slice %17 {offsets = [192, 0], sizes = [32, 20], strides = [1, 1]} : vector<512x20xf32> to vector<32x20xf32>
    %25 = vector.extract_strided_slice %17 {offsets = [224, 0], sizes = [32, 20], strides = [1, 1]} : vector<512x20xf32> to vector<32x20xf32>
    %26 = vector.extract_strided_slice %17 {offsets = [256, 0], sizes = [32, 20], strides = [1, 1]} : vector<512x20xf32> to vector<32x20xf32>
    %27 = vector.extract_strided_slice %17 {offsets = [288, 0], sizes = [32, 20], strides = [1, 1]} : vector<512x20xf32> to vector<32x20xf32>
    %28 = vector.extract_strided_slice %17 {offsets = [320, 0], sizes = [32, 20], strides = [1, 1]} : vector<512x20xf32> to vector<32x20xf32>
    %29 = vector.extract_strided_slice %17 {offsets = [352, 0], sizes = [32, 20], strides = [1, 1]} : vector<512x20xf32> to vector<32x20xf32>
    %30 = vector.extract_strided_slice %17 {offsets = [384, 0], sizes = [32, 20], strides = [1, 1]} : vector<512x20xf32> to vector<32x20xf32>
    %31 = vector.extract_strided_slice %17 {offsets = [416, 0], sizes = [32, 20], strides = [1, 1]} : vector<512x20xf32> to vector<32x20xf32>
    %32 = vector.extract_strided_slice %17 {offsets = [448, 0], sizes = [32, 20], strides = [1, 1]} : vector<512x20xf32> to vector<32x20xf32>
    %33 = vector.extract_strided_slice %17 {offsets = [480, 0], sizes = [32, 20], strides = [1, 1]} : vector<512x20xf32> to vector<32x20xf32>
    %34 = tpu.concatenate %18, %19, %20, %21, %22, %23, %24, %25, %26, %27, %28, %29, %30, %31, %32, %33 in 1 : vector<32x20xf32>, vector<32x20xf32>, vector<32x20xf32>, vector<32x20xf32>, vector<32x20xf32>, vector<32x20xf32>, vector<32x20xf32>, vector<32x20xf32>, vector<32x20xf32>, vector<32x20xf32>, vector<32x20xf32>, vector<32x20xf32>, vector<32x20xf32>, vector<32x20xf32>, vector<32x20xf32>, vector<32x20xf32> -> vector<32x320xf32>
    %35 = arith.truncf %34 : vector<32x320xf32> to vector<32x320xbf16>
    %c0_14 = arith.constant 0 : index
    %c0_15 = arith.constant 0 : index
    %36 = vector.load %arg6[%c0_14, %c0_15] : memref<320x256xbf16, #tpu.memory_space<vmem>>, vector<320x256xbf16>
    %cst_16 = arith.constant dense<0.000000e+00> : vector<32x256xf32>
    %37 = tpu.matmul %35, %36, %cst_16 {dimension_numbers = #tpu.dot_dimension_numbers<[1], [0], [0], [1], [0, 0, 1, 1], [], []>} : vector<32x320xbf16>, vector<320x256xbf16>, vector<32x256xf32> -> vector<32x256xf32>
    %c0_17 = arith.constant 0 : index
    %c0_18 = arith.constant 0 : index
    %38 = vector.load %arg7[%c0_17, %c0_18] : memref<1x256xf32, #tpu.memory_space<vmem>>, vector<1x256xf32>
    %39 = vector.broadcast %38 : vector<1x256xf32> to vector<32x256xf32>
    %40 = arith.addf %37, %39 : vector<32x256xf32>
    %c0_19 = arith.constant 0 : index
    %c0_20 = arith.constant 0 : index
    %41 = vector.load %arg8[%c0_19, %c0_20] : memref<64x256xbf16, #tpu.memory_space<vmem>>, vector<64x256xbf16>
    %c0_21 = arith.constant 0 : index
    %c0_22 = arith.constant 0 : index
    %42 = vector.load %arg9[%c0_21, %c0_22] : memref<2x256xf32, #tpu.memory_space<vmem>>, vector<1x256xf32>
    %43 = vector.shape_cast %42 : vector<1x256xf32> to vector<1x256xf32>
    %44 = vector.broadcast %43 : vector<1x256xf32> to vector<2x256xf32>
    %c1 = arith.constant 1 : index
    %c0_23 = arith.constant 0 : index
    %45 = vector.load %arg9[%c1, %c0_23] : memref<2x256xf32, #tpu.memory_space<vmem>>, vector<1x256xf32>
    %46 = vector.shape_cast %45 : vector<1x256xf32> to vector<1x256xf32>
    %47 = vector.broadcast %46 : vector<1x256xf32> to vector<2x256xf32>
    %48 = vector.extract_strided_slice %40 {offsets = [0, 0], sizes = [2, 256], strides = [1, 1]} : vector<32x256xf32> to vector<2x256xf32>
    %49 = vector.extract_strided_slice %40 {offsets = [2, 0], sizes = [2, 256], strides = [1, 1]} : vector<32x256xf32> to vector<2x256xf32>
    %50 = vector.extract_strided_slice %40 {offsets = [4, 0], sizes = [2, 256], strides = [1, 1]} : vector<32x256xf32> to vector<2x256xf32>
    %51 = vector.extract_strided_slice %40 {offsets = [6, 0], sizes = [2, 256], strides = [1, 1]} : vector<32x256xf32> to vector<2x256xf32>
    %52 = vector.extract_strided_slice %40 {offsets = [8, 0], sizes = [2, 256], strides = [1, 1]} : vector<32x256xf32> to vector<2x256xf32>
    %53 = vector.extract_strided_slice %40 {offsets = [10, 0], sizes = [2, 256], strides = [1, 1]} : vector<32x256xf32> to vector<2x256xf32>
    %54 = vector.extract_strided_slice %40 {offsets = [12, 0], sizes = [2, 256], strides = [1, 1]} : vector<32x256xf32> to vector<2x256xf32>
    %55 = vector.extract_strided_slice %40 {offsets = [14, 0], sizes = [2, 256], strides = [1, 1]} : vector<32x256xf32> to vector<2x256xf32>
    %56 = vector.extract_strided_slice %40 {offsets = [16, 0], sizes = [2, 256], strides = [1, 1]} : vector<32x256xf32> to vector<2x256xf32>
    %57 = vector.extract_strided_slice %40 {offsets = [18, 0], sizes = [2, 256], strides = [1, 1]} : vector<32x256xf32> to vector<2x256xf32>
    %58 = vector.extract_strided_slice %40 {offsets = [20, 0], sizes = [2, 256], strides = [1, 1]} : vector<32x256xf32> to vector<2x256xf32>
    %59 = vector.extract_strided_slice %40 {offsets = [22, 0], sizes = [2, 256], strides = [1, 1]} : vector<32x256xf32> to vector<2x256xf32>
    %60 = vector.extract_strided_slice %40 {offsets = [24, 0], sizes = [2, 256], strides = [1, 1]} : vector<32x256xf32> to vector<2x256xf32>
    %61 = vector.extract_strided_slice %40 {offsets = [26, 0], sizes = [2, 256], strides = [1, 1]} : vector<32x256xf32> to vector<2x256xf32>
    %62 = vector.extract_strided_slice %40 {offsets = [28, 0], sizes = [2, 256], strides = [1, 1]} : vector<32x256xf32> to vector<2x256xf32>
    %63 = vector.extract_strided_slice %40 {offsets = [30, 0], sizes = [2, 256], strides = [1, 1]} : vector<32x256xf32> to vector<2x256xf32>
    %c0_24 = arith.constant 0 : index
    %c0_25 = arith.constant 0 : index
    %64 = vector.load %arg7[%c0_24, %c0_25] : memref<1x256xf32, #tpu.memory_space<vmem>>, vector<1x256xf32>
    %65 = vector.shape_cast %64 : vector<1x256xf32> to vector<1x256xf32>
    %66 = vector.broadcast %65 : vector<1x256xf32> to vector<2x256xf32>
    %cst_26 = arith.constant 0.000000e+00 : f32
    %67 = vector.broadcast %cst_26 : f32 to vector<2x32xf32>
    %cst_27 = arith.constant 0.000000e+00 : f32
    %68 = vector.broadcast %cst_27 : f32 to vector<2x32xf32>
    %cst_28 = arith.constant 0.000000e+00 : f32
    %69 = vector.broadcast %cst_28 : f32 to vector<2x32xf32>
    %70 = arith.negf %48 : vector<2x256xf32>
    %71 = math.exp %70 : vector<2x256xf32>
    %cst_29 = arith.constant 1.000000e+00 : f32
    %72 = vector.broadcast %cst_29 : f32 to vector<2x256xf32>
    %73 = arith.addf %72, %71 : vector<2x256xf32>
    %74 = arith.divf %72, %73 : vector<2x256xf32>
    %75 = arith.mulf %74, %44 : vector<2x256xf32>
    %76 = arith.subf %75, %47 : vector<2x256xf32>
    %77 = vector.extract_strided_slice %76 {offsets = [0, 32], sizes = [2, 32], strides = [1, 1]} : vector<2x256xf32> to vector<2x32xf32>
    %78 = arith.mulf %77, %67 : vector<2x32xf32>
    %79 = vector.extract_strided_slice %76 {offsets = [0, 0], sizes = [2, 32], strides = [1, 1]} : vector<2x256xf32> to vector<2x32xf32>
    %80 = vector.extract_strided_slice %76 {offsets = [0, 64], sizes = [2, 32], strides = [1, 1]} : vector<2x256xf32> to vector<2x32xf32>
    %81 = arith.mulf %79, %80 : vector<2x32xf32>
    %82 = arith.addf %78, %81 : vector<2x32xf32>
    %83 = vector.extract_strided_slice %76 {offsets = [0, 96], sizes = [2, 32], strides = [1, 1]} : vector<2x256xf32> to vector<2x32xf32>
    %84 = math.tanh %82 : vector<2x32xf32>
    %85 = arith.mulf %83, %84 : vector<2x32xf32>
    %86 = tpu.concatenate %85, %68 in 1 : vector<2x32xf32>, vector<2x32xf32> -> vector<2x64xf32>
    %87 = arith.truncf %86 : vector<2x64xf32> to vector<2x64xbf16>
    %cst_30 = arith.constant dense<0.000000e+00> : vector<2x256xf32>
    %88 = tpu.matmul %87, %41, %cst_30 {dimension_numbers = #tpu.dot_dimension_numbers<[1], [0], [0], [1], [0, 0, 1, 1], [], []>} : vector<2x64xbf16>, vector<64x256xbf16>, vector<2x256xf32> -> vector<2x256xf32>
    %89 = arith.addf %49, %88 : vector<2x256xf32>
    %90 = arith.negf %89 : vector<2x256xf32>
    %91 = math.exp %90 : vector<2x256xf32>
    %cst_31 = arith.constant 1.000000e+00 : f32
    %92 = vector.broadcast %cst_31 : f32 to vector<2x256xf32>
    %93 = arith.addf %92, %91 : vector<2x256xf32>
    %94 = arith.divf %92, %93 : vector<2x256xf32>
    %95 = arith.mulf %94, %44 : vector<2x256xf32>
    %96 = arith.subf %95, %47 : vector<2x256xf32>
    %97 = vector.extract_strided_slice %96 {offsets = [0, 32], sizes = [2, 32], strides = [1, 1]} : vector<2x256xf32> to vector<2x32xf32>
    %98 = arith.mulf %97, %82 : vector<2x32xf32>
    %99 = vector.extract_strided_slice %96 {offsets = [0, 0], sizes = [2, 32], strides = [1, 1]} : vector<2x256xf32> to vector<2x32xf32>
    %100 = vector.extract_strided_slice %96 {offsets = [0, 64], sizes = [2, 32], strides = [1, 1]} : vector<2x256xf32> to vector<2x32xf32>
    %101 = arith.mulf %99, %100 : vector<2x32xf32>
    %102 = arith.addf %98, %101 : vector<2x32xf32>
    %103 = vector.extract_strided_slice %96 {offsets = [0, 96], sizes = [2, 32], strides = [1, 1]} : vector<2x256xf32> to vector<2x32xf32>
    %104 = math.tanh %102 : vector<2x32xf32>
    %105 = arith.mulf %103, %104 : vector<2x32xf32>
    %106 = vector.extract_strided_slice %96 {offsets = [0, 160], sizes = [2, 32], strides = [1, 1]} : vector<2x256xf32> to vector<2x32xf32>
    %107 = arith.mulf %106, %69 : vector<2x32xf32>
    %108 = vector.extract_strided_slice %96 {offsets = [0, 128], sizes = [2, 32], strides = [1, 1]} : vector<2x256xf32> to vector<2x32xf32>
    %109 = vector.extract_strided_slice %96 {offsets = [0, 192], sizes = [2, 32], strides = [1, 1]} : vector<2x256xf32> to vector<2x32xf32>
    %110 = arith.mulf %108, %109 : vector<2x32xf32>
    %111 = arith.addf %107, %110 : vector<2x32xf32>
    %112 = vector.extract_strided_slice %96 {offsets = [0, 224], sizes = [2, 32], strides = [1, 1]} : vector<2x256xf32> to vector<2x32xf32>
    %113 = math.tanh %111 : vector<2x32xf32>
    %114 = arith.mulf %112, %113 : vector<2x32xf32>
    %115 = tpu.concatenate %105, %114 in 1 : vector<2x32xf32>, vector<2x32xf32> -> vector<2x64xf32>
    %116 = arith.truncf %115 : vector<2x64xf32> to vector<2x64xbf16>
    %cst_32 = arith.constant dense<0.000000e+00> : vector<2x256xf32>
    %117 = tpu.matmul %116, %41, %cst_32 {dimension_numbers = #tpu.dot_dimension_numbers<[1], [0], [0], [1], [0, 0, 1, 1], [], []>} : vector<2x64xbf16>, vector<64x256xbf16>, vector<2x256xf32> -> vector<2x256xf32>
    %118 = arith.addf %50, %117 : vector<2x256xf32>
    %119 = arith.negf %118 : vector<2x256xf32>
    %120 = math.exp %119 : vector<2x256xf32>
    %cst_33 = arith.constant 1.000000e+00 : f32
    %121 = vector.broadcast %cst_33 : f32 to vector<2x256xf32>
    %122 = arith.addf %121, %120 : vector<2x256xf32>
    %123 = arith.divf %121, %122 : vector<2x256xf32>
    %124 = arith.mulf %123, %44 : vector<2x256xf32>
    %125 = arith.subf %124, %47 : vector<2x256xf32>
    %126 = vector.extract_strided_slice %125 {offsets = [0, 32], sizes = [2, 32], strides = [1, 1]} : vector<2x256xf32> to vector<2x32xf32>
    %127 = arith.mulf %126, %102 : vector<2x32xf32>
    %128 = vector.extract_strided_slice %125 {offsets = [0, 0], sizes = [2, 32], strides = [1, 1]} : vector<2x256xf32> to vector<2x32xf32>
    %129 = vector.extract_strided_slice %125 {offsets = [0, 64], sizes = [2, 32], strides = [1, 1]} : vector<2x256xf32> to vector<2x32xf32>
    %130 = arith.mulf %128, %129 : vector<2x32xf32>
    %131 = arith.addf %127, %130 : vector<2x32xf32>
    %132 = vector.extract_strided_slice %125 {offsets = [0, 96], sizes = [2, 32], strides = [1, 1]} : vector<2x256xf32> to vector<2x32xf32>
    %133 = math.tanh %131 : vector<2x32xf32>
    %134 = arith.mulf %132, %133 : vector<2x32xf32>
    %135 = vector.extract_strided_slice %125 {offsets = [0, 160], sizes = [2, 32], strides = [1, 1]} : vector<2x256xf32> to vector<2x32xf32>
    %136 = arith.mulf %135, %111 : vector<2x32xf32>
    %137 = vector.extract_strided_slice %125 {offsets = [0, 128], sizes = [2, 32], strides = [1, 1]} : vector<2x256xf32> to vector<2x32xf32>
    %138 = vector.extract_strided_slice %125 {offsets = [0, 192], sizes = [2, 32], strides = [1, 1]} : vector<2x256xf32> to vector<2x32xf32>
    %139 = arith.mulf %137, %138 : vector<2x32xf32>
    %140 = arith.addf %136, %139 : vector<2x32xf32>
    %141 = vector.extract_strided_slice %125 {offsets = [0, 224], sizes = [2, 32], strides = [1, 1]} : vector<2x256xf32> to vector<2x32xf32>
    %142 = math.tanh %140 : vector<2x32xf32>
    %143 = arith.mulf %141, %142 : vector<2x32xf32>
    %144 = tpu.concatenate %134, %143 in 1 : vector<2x32xf32>, vector<2x32xf32> -> vector<2x64xf32>
    %145 = arith.truncf %144 : vector<2x64xf32> to vector<2x64xbf16>
    %cst_34 = arith.constant dense<0.000000e+00> : vector<2x256xf32>
    %146 = tpu.matmul %145, %41, %cst_34 {dimension_numbers = #tpu.dot_dimension_numbers<[1], [0], [0], [1], [0, 0, 1, 1], [], []>} : vector<2x64xbf16>, vector<64x256xbf16>, vector<2x256xf32> -> vector<2x256xf32>
    %147 = arith.addf %51, %146 : vector<2x256xf32>
    %148 = arith.negf %147 : vector<2x256xf32>
    %149 = math.exp %148 : vector<2x256xf32>
    %cst_35 = arith.constant 1.000000e+00 : f32
    %150 = vector.broadcast %cst_35 : f32 to vector<2x256xf32>
    %151 = arith.addf %150, %149 : vector<2x256xf32>
    %152 = arith.divf %150, %151 : vector<2x256xf32>
    %153 = arith.mulf %152, %44 : vector<2x256xf32>
    %154 = arith.subf %153, %47 : vector<2x256xf32>
    %155 = vector.extract_strided_slice %154 {offsets = [0, 32], sizes = [2, 32], strides = [1, 1]} : vector<2x256xf32> to vector<2x32xf32>
    %156 = arith.mulf %155, %131 : vector<2x32xf32>
    %157 = vector.extract_strided_slice %154 {offsets = [0, 0], sizes = [2, 32], strides = [1, 1]} : vector<2x256xf32> to vector<2x32xf32>
    %158 = vector.extract_strided_slice %154 {offsets = [0, 64], sizes = [2, 32], strides = [1, 1]} : vector<2x256xf32> to vector<2x32xf32>
    %159 = arith.mulf %157, %158 : vector<2x32xf32>
    %160 = arith.addf %156, %159 : vector<2x32xf32>
    %161 = vector.extract_strided_slice %154 {offsets = [0, 96], sizes = [2, 32], strides = [1, 1]} : vector<2x256xf32> to vector<2x32xf32>
    %162 = math.tanh %160 : vector<2x32xf32>
    %163 = arith.mulf %161, %162 : vector<2x32xf32>
    %164 = vector.extract_strided_slice %154 {offsets = [0, 160], sizes = [2, 32], strides = [1, 1]} : vector<2x256xf32> to vector<2x32xf32>
    %165 = arith.mulf %164, %140 : vector<2x32xf32>
    %166 = vector.extract_strided_slice %154 {offsets = [0, 128], sizes = [2, 32], strides = [1, 1]} : vector<2x256xf32> to vector<2x32xf32>
    %167 = vector.extract_strided_slice %154 {offsets = [0, 192], sizes = [2, 32], strides = [1, 1]} : vector<2x256xf32> to vector<2x32xf32>
    %168 = arith.mulf %166, %167 : vector<2x32xf32>
    %169 = arith.addf %165, %168 : vector<2x32xf32>
    %170 = vector.extract_strided_slice %154 {offsets = [0, 224], sizes = [2, 32], strides = [1, 1]} : vector<2x256xf32> to vector<2x32xf32>
    %171 = math.tanh %169 : vector<2x32xf32>
    %172 = arith.mulf %170, %171 : vector<2x32xf32>
    %173 = tpu.concatenate %163, %172 in 1 : vector<2x32xf32>, vector<2x32xf32> -> vector<2x64xf32>
    %174 = arith.truncf %173 : vector<2x64xf32> to vector<2x64xbf16>
    %cst_36 = arith.constant dense<0.000000e+00> : vector<2x256xf32>
    %175 = tpu.matmul %174, %41, %cst_36 {dimension_numbers = #tpu.dot_dimension_numbers<[1], [0], [0], [1], [0, 0, 1, 1], [], []>} : vector<2x64xbf16>, vector<64x256xbf16>, vector<2x256xf32> -> vector<2x256xf32>
    %176 = arith.addf %52, %175 : vector<2x256xf32>
    %177 = arith.negf %176 : vector<2x256xf32>
    %178 = math.exp %177 : vector<2x256xf32>
    %cst_37 = arith.constant 1.000000e+00 : f32
    %179 = vector.broadcast %cst_37 : f32 to vector<2x256xf32>
    %180 = arith.addf %179, %178 : vector<2x256xf32>
    %181 = arith.divf %179, %180 : vector<2x256xf32>
    %182 = arith.mulf %181, %44 : vector<2x256xf32>
    %183 = arith.subf %182, %47 : vector<2x256xf32>
    %184 = vector.extract_strided_slice %183 {offsets = [0, 32], sizes = [2, 32], strides = [1, 1]} : vector<2x256xf32> to vector<2x32xf32>
    %185 = arith.mulf %184, %160 : vector<2x32xf32>
    %186 = vector.extract_strided_slice %183 {offsets = [0, 0], sizes = [2, 32], strides = [1, 1]} : vector<2x256xf32> to vector<2x32xf32>
    %187 = vector.extract_strided_slice %183 {offsets = [0, 64], sizes = [2, 32], strides = [1, 1]} : vector<2x256xf32> to vector<2x32xf32>
    %188 = arith.mulf %186, %187 : vector<2x32xf32>
    %189 = arith.addf %185, %188 : vector<2x32xf32>
    %190 = vector.extract_strided_slice %183 {offsets = [0, 96], sizes = [2, 32], strides = [1, 1]} : vector<2x256xf32> to vector<2x32xf32>
    %191 = math.tanh %189 : vector<2x32xf32>
    %192 = arith.mulf %190, %191 : vector<2x32xf32>
    %193 = vector.extract_strided_slice %183 {offsets = [0, 160], sizes = [2, 32], strides = [1, 1]} : vector<2x256xf32> to vector<2x32xf32>
    %194 = arith.mulf %193, %169 : vector<2x32xf32>
    %195 = vector.extract_strided_slice %183 {offsets = [0, 128], sizes = [2, 32], strides = [1, 1]} : vector<2x256xf32> to vector<2x32xf32>
    %196 = vector.extract_strided_slice %183 {offsets = [0, 192], sizes = [2, 32], strides = [1, 1]} : vector<2x256xf32> to vector<2x32xf32>
    %197 = arith.mulf %195, %196 : vector<2x32xf32>
    %198 = arith.addf %194, %197 : vector<2x32xf32>
    %199 = vector.extract_strided_slice %183 {offsets = [0, 224], sizes = [2, 32], strides = [1, 1]} : vector<2x256xf32> to vector<2x32xf32>
    %200 = math.tanh %198 : vector<2x32xf32>
    %201 = arith.mulf %199, %200 : vector<2x32xf32>
    %202 = tpu.concatenate %192, %201 in 1 : vector<2x32xf32>, vector<2x32xf32> -> vector<2x64xf32>
    %203 = arith.truncf %202 : vector<2x64xf32> to vector<2x64xbf16>
    %cst_38 = arith.constant dense<0.000000e+00> : vector<2x256xf32>
    %204 = tpu.matmul %203, %41, %cst_38 {dimension_numbers = #tpu.dot_dimension_numbers<[1], [0], [0], [1], [0, 0, 1, 1], [], []>} : vector<2x64xbf16>, vector<64x256xbf16>, vector<2x256xf32> -> vector<2x256xf32>
    %205 = arith.addf %53, %204 : vector<2x256xf32>
    %206 = arith.negf %205 : vector<2x256xf32>
    %207 = math.exp %206 : vector<2x256xf32>
    %cst_39 = arith.constant 1.000000e+00 : f32
    %208 = vector.broadcast %cst_39 : f32 to vector<2x256xf32>
    %209 = arith.addf %208, %207 : vector<2x256xf32>
    %210 = arith.divf %208, %209 : vector<2x256xf32>
    %211 = arith.mulf %210, %44 : vector<2x256xf32>
    %212 = arith.subf %211, %47 : vector<2x256xf32>
    %213 = vector.extract_strided_slice %212 {offsets = [0, 32], sizes = [2, 32], strides = [1, 1]} : vector<2x256xf32> to vector<2x32xf32>
    %214 = arith.mulf %213, %189 : vector<2x32xf32>
    %215 = vector.extract_strided_slice %212 {offsets = [0, 0], sizes = [2, 32], strides = [1, 1]} : vector<2x256xf32> to vector<2x32xf32>
    %216 = vector.extract_strided_slice %212 {offsets = [0, 64], sizes = [2, 32], strides = [1, 1]} : vector<2x256xf32> to vector<2x32xf32>
    %217 = arith.mulf %215, %216 : vector<2x32xf32>
    %218 = arith.addf %214, %217 : vector<2x32xf32>
    %219 = vector.extract_strided_slice %212 {offsets = [0, 96], sizes = [2, 32], strides = [1, 1]} : vector<2x256xf32> to vector<2x32xf32>
    %220 = math.tanh %218 : vector<2x32xf32>
    %221 = arith.mulf %219, %220 : vector<2x32xf32>
    %222 = vector.extract_strided_slice %212 {offsets = [0, 160], sizes = [2, 32], strides = [1, 1]} : vector<2x256xf32> to vector<2x32xf32>
    %223 = arith.mulf %222, %198 : vector<2x32xf32>
    %224 = vector.extract_strided_slice %212 {offsets = [0, 128], sizes = [2, 32], strides = [1, 1]} : vector<2x256xf32> to vector<2x32xf32>
    %225 = vector.extract_strided_slice %212 {offsets = [0, 192], sizes = [2, 32], strides = [1, 1]} : vector<2x256xf32> to vector<2x32xf32>
    %226 = arith.mulf %224, %225 : vector<2x32xf32>
    %227 = arith.addf %223, %226 : vector<2x32xf32>
    %228 = vector.extract_strided_slice %212 {offsets = [0, 224], sizes = [2, 32], strides = [1, 1]} : vector<2x256xf32> to vector<2x32xf32>
    %229 = math.tanh %227 : vector<2x32xf32>
    %230 = arith.mulf %228, %229 : vector<2x32xf32>
    %231 = tpu.concatenate %221, %230 in 1 : vector<2x32xf32>, vector<2x32xf32> -> vector<2x64xf32>
    %232 = arith.truncf %231 : vector<2x64xf32> to vector<2x64xbf16>
    %cst_40 = arith.constant dense<0.000000e+00> : vector<2x256xf32>
    %233 = tpu.matmul %232, %41, %cst_40 {dimension_numbers = #tpu.dot_dimension_numbers<[1], [0], [0], [1], [0, 0, 1, 1], [], []>} : vector<2x64xbf16>, vector<64x256xbf16>, vector<2x256xf32> -> vector<2x256xf32>
    %234 = arith.addf %54, %233 : vector<2x256xf32>
    %235 = arith.negf %234 : vector<2x256xf32>
    %236 = math.exp %235 : vector<2x256xf32>
    %cst_41 = arith.constant 1.000000e+00 : f32
    %237 = vector.broadcast %cst_41 : f32 to vector<2x256xf32>
    %238 = arith.addf %237, %236 : vector<2x256xf32>
    %239 = arith.divf %237, %238 : vector<2x256xf32>
    %240 = arith.mulf %239, %44 : vector<2x256xf32>
    %241 = arith.subf %240, %47 : vector<2x256xf32>
    %242 = vector.extract_strided_slice %241 {offsets = [0, 32], sizes = [2, 32], strides = [1, 1]} : vector<2x256xf32> to vector<2x32xf32>
    %243 = arith.mulf %242, %218 : vector<2x32xf32>
    %244 = vector.extract_strided_slice %241 {offsets = [0, 0], sizes = [2, 32], strides = [1, 1]} : vector<2x256xf32> to vector<2x32xf32>
    %245 = vector.extract_strided_slice %241 {offsets = [0, 64], sizes = [2, 32], strides = [1, 1]} : vector<2x256xf32> to vector<2x32xf32>
    %246 = arith.mulf %244, %245 : vector<2x32xf32>
    %247 = arith.addf %243, %246 : vector<2x32xf32>
    %248 = vector.extract_strided_slice %241 {offsets = [0, 96], sizes = [2, 32], strides = [1, 1]} : vector<2x256xf32> to vector<2x32xf32>
    %249 = math.tanh %247 : vector<2x32xf32>
    %250 = arith.mulf %248, %249 : vector<2x32xf32>
    %251 = vector.extract_strided_slice %241 {offsets = [0, 160], sizes = [2, 32], strides = [1, 1]} : vector<2x256xf32> to vector<2x32xf32>
    %252 = arith.mulf %251, %227 : vector<2x32xf32>
    %253 = vector.extract_strided_slice %241 {offsets = [0, 128], sizes = [2, 32], strides = [1, 1]} : vector<2x256xf32> to vector<2x32xf32>
    %254 = vector.extract_strided_slice %241 {offsets = [0, 192], sizes = [2, 32], strides = [1, 1]} : vector<2x256xf32> to vector<2x32xf32>
    %255 = arith.mulf %253, %254 : vector<2x32xf32>
    %256 = arith.addf %252, %255 : vector<2x32xf32>
    %257 = vector.extract_strided_slice %241 {offsets = [0, 224], sizes = [2, 32], strides = [1, 1]} : vector<2x256xf32> to vector<2x32xf32>
    %258 = math.tanh %256 : vector<2x32xf32>
    %259 = arith.mulf %257, %258 : vector<2x32xf32>
    %260 = tpu.concatenate %250, %259 in 1 : vector<2x32xf32>, vector<2x32xf32> -> vector<2x64xf32>
    %261 = arith.truncf %260 : vector<2x64xf32> to vector<2x64xbf16>
    %cst_42 = arith.constant dense<0.000000e+00> : vector<2x256xf32>
    %262 = tpu.matmul %261, %41, %cst_42 {dimension_numbers = #tpu.dot_dimension_numbers<[1], [0], [0], [1], [0, 0, 1, 1], [], []>} : vector<2x64xbf16>, vector<64x256xbf16>, vector<2x256xf32> -> vector<2x256xf32>
    %263 = arith.addf %55, %262 : vector<2x256xf32>
    %264 = arith.negf %263 : vector<2x256xf32>
    %265 = math.exp %264 : vector<2x256xf32>
    %cst_43 = arith.constant 1.000000e+00 : f32
    %266 = vector.broadcast %cst_43 : f32 to vector<2x256xf32>
    %267 = arith.addf %266, %265 : vector<2x256xf32>
    %268 = arith.divf %266, %267 : vector<2x256xf32>
    %269 = arith.mulf %268, %44 : vector<2x256xf32>
    %270 = arith.subf %269, %47 : vector<2x256xf32>
    %271 = vector.extract_strided_slice %270 {offsets = [0, 32], sizes = [2, 32], strides = [1, 1]} : vector<2x256xf32> to vector<2x32xf32>
    %272 = arith.mulf %271, %247 : vector<2x32xf32>
    %273 = vector.extract_strided_slice %270 {offsets = [0, 0], sizes = [2, 32], strides = [1, 1]} : vector<2x256xf32> to vector<2x32xf32>
    %274 = vector.extract_strided_slice %270 {offsets = [0, 64], sizes = [2, 32], strides = [1, 1]} : vector<2x256xf32> to vector<2x32xf32>
    %275 = arith.mulf %273, %274 : vector<2x32xf32>
    %276 = arith.addf %272, %275 : vector<2x32xf32>
    %277 = vector.extract_strided_slice %270 {offsets = [0, 96], sizes = [2, 32], strides = [1, 1]} : vector<2x256xf32> to vector<2x32xf32>
    %278 = math.tanh %276 : vector<2x32xf32>
    %279 = arith.mulf %277, %278 : vector<2x32xf32>
    %280 = vector.extract_strided_slice %270 {offsets = [0, 160], sizes = [2, 32], strides = [1, 1]} : vector<2x256xf32> to vector<2x32xf32>
    %281 = arith.mulf %280, %256 : vector<2x32xf32>
    %282 = vector.extract_strided_slice %270 {offsets = [0, 128], sizes = [2, 32], strides = [1, 1]} : vector<2x256xf32> to vector<2x32xf32>
    %283 = vector.extract_strided_slice %270 {offsets = [0, 192], sizes = [2, 32], strides = [1, 1]} : vector<2x256xf32> to vector<2x32xf32>
    %284 = arith.mulf %282, %283 : vector<2x32xf32>
    %285 = arith.addf %281, %284 : vector<2x32xf32>
    %286 = vector.extract_strided_slice %270 {offsets = [0, 224], sizes = [2, 32], strides = [1, 1]} : vector<2x256xf32> to vector<2x32xf32>
    %287 = math.tanh %285 : vector<2x32xf32>
    %288 = arith.mulf %286, %287 : vector<2x32xf32>
    %289 = tpu.concatenate %279, %288 in 1 : vector<2x32xf32>, vector<2x32xf32> -> vector<2x64xf32>
    %290 = arith.truncf %289 : vector<2x64xf32> to vector<2x64xbf16>
    %cst_44 = arith.constant dense<0.000000e+00> : vector<2x256xf32>
    %291 = tpu.matmul %290, %41, %cst_44 {dimension_numbers = #tpu.dot_dimension_numbers<[1], [0], [0], [1], [0, 0, 1, 1], [], []>} : vector<2x64xbf16>, vector<64x256xbf16>, vector<2x256xf32> -> vector<2x256xf32>
    %292 = arith.addf %56, %291 : vector<2x256xf32>
    %293 = arith.negf %292 : vector<2x256xf32>
    %294 = math.exp %293 : vector<2x256xf32>
    %cst_45 = arith.constant 1.000000e+00 : f32
    %295 = vector.broadcast %cst_45 : f32 to vector<2x256xf32>
    %296 = arith.addf %295, %294 : vector<2x256xf32>
    %297 = arith.divf %295, %296 : vector<2x256xf32>
    %298 = arith.mulf %297, %44 : vector<2x256xf32>
    %299 = arith.subf %298, %47 : vector<2x256xf32>
    %300 = vector.extract_strided_slice %299 {offsets = [0, 32], sizes = [2, 32], strides = [1, 1]} : vector<2x256xf32> to vector<2x32xf32>
    %301 = arith.mulf %300, %276 : vector<2x32xf32>
    %302 = vector.extract_strided_slice %299 {offsets = [0, 0], sizes = [2, 32], strides = [1, 1]} : vector<2x256xf32> to vector<2x32xf32>
    %303 = vector.extract_strided_slice %299 {offsets = [0, 64], sizes = [2, 32], strides = [1, 1]} : vector<2x256xf32> to vector<2x32xf32>
    %304 = arith.mulf %302, %303 : vector<2x32xf32>
    %305 = arith.addf %301, %304 : vector<2x32xf32>
    %306 = vector.extract_strided_slice %299 {offsets = [0, 96], sizes = [2, 32], strides = [1, 1]} : vector<2x256xf32> to vector<2x32xf32>
    %307 = math.tanh %305 : vector<2x32xf32>
    %308 = arith.mulf %306, %307 : vector<2x32xf32>
    %309 = vector.extract_strided_slice %299 {offsets = [0, 160], sizes = [2, 32], strides = [1, 1]} : vector<2x256xf32> to vector<2x32xf32>
    %310 = arith.mulf %309, %285 : vector<2x32xf32>
    %311 = vector.extract_strided_slice %299 {offsets = [0, 128], sizes = [2, 32], strides = [1, 1]} : vector<2x256xf32> to vector<2x32xf32>
    %312 = vector.extract_strided_slice %299 {offsets = [0, 192], sizes = [2, 32], strides = [1, 1]} : vector<2x256xf32> to vector<2x32xf32>
    %313 = arith.mulf %311, %312 : vector<2x32xf32>
    %314 = arith.addf %310, %313 : vector<2x32xf32>
    %315 = vector.extract_strided_slice %299 {offsets = [0, 224], sizes = [2, 32], strides = [1, 1]} : vector<2x256xf32> to vector<2x32xf32>
    %316 = math.tanh %314 : vector<2x32xf32>
    %317 = arith.mulf %315, %316 : vector<2x32xf32>
    %318 = tpu.concatenate %308, %317 in 1 : vector<2x32xf32>, vector<2x32xf32> -> vector<2x64xf32>
    %319 = arith.truncf %318 : vector<2x64xf32> to vector<2x64xbf16>
    %cst_46 = arith.constant dense<0.000000e+00> : vector<2x256xf32>
    %320 = tpu.matmul %319, %41, %cst_46 {dimension_numbers = #tpu.dot_dimension_numbers<[1], [0], [0], [1], [0, 0, 1, 1], [], []>} : vector<2x64xbf16>, vector<64x256xbf16>, vector<2x256xf32> -> vector<2x256xf32>
    %321 = arith.addf %57, %320 : vector<2x256xf32>
    %322 = arith.negf %321 : vector<2x256xf32>
    %323 = math.exp %322 : vector<2x256xf32>
    %cst_47 = arith.constant 1.000000e+00 : f32
    %324 = vector.broadcast %cst_47 : f32 to vector<2x256xf32>
    %325 = arith.addf %324, %323 : vector<2x256xf32>
    %326 = arith.divf %324, %325 : vector<2x256xf32>
    %327 = arith.mulf %326, %44 : vector<2x256xf32>
    %328 = arith.subf %327, %47 : vector<2x256xf32>
    %329 = vector.extract_strided_slice %328 {offsets = [0, 32], sizes = [2, 32], strides = [1, 1]} : vector<2x256xf32> to vector<2x32xf32>
    %330 = arith.mulf %329, %305 : vector<2x32xf32>
    %331 = vector.extract_strided_slice %328 {offsets = [0, 0], sizes = [2, 32], strides = [1, 1]} : vector<2x256xf32> to vector<2x32xf32>
    %332 = vector.extract_strided_slice %328 {offsets = [0, 64], sizes = [2, 32], strides = [1, 1]} : vector<2x256xf32> to vector<2x32xf32>
    %333 = arith.mulf %331, %332 : vector<2x32xf32>
    %334 = arith.addf %330, %333 : vector<2x32xf32>
    %335 = vector.extract_strided_slice %328 {offsets = [0, 96], sizes = [2, 32], strides = [1, 1]} : vector<2x256xf32> to vector<2x32xf32>
    %336 = math.tanh %334 : vector<2x32xf32>
    %337 = arith.mulf %335, %336 : vector<2x32xf32>
    %338 = vector.extract_strided_slice %328 {offsets = [0, 160], sizes = [2, 32], strides = [1, 1]} : vector<2x256xf32> to vector<2x32xf32>
    %339 = arith.mulf %338, %314 : vector<2x32xf32>
    %340 = vector.extract_strided_slice %328 {offsets = [0, 128], sizes = [2, 32], strides = [1, 1]} : vector<2x256xf32> to vector<2x32xf32>
    %341 = vector.extract_strided_slice %328 {offsets = [0, 192], sizes = [2, 32], strides = [1, 1]} : vector<2x256xf32> to vector<2x32xf32>
    %342 = arith.mulf %340, %341 : vector<2x32xf32>
    %343 = arith.addf %339, %342 : vector<2x32xf32>
    %344 = vector.extract_strided_slice %328 {offsets = [0, 224], sizes = [2, 32], strides = [1, 1]} : vector<2x256xf32> to vector<2x32xf32>
    %345 = math.tanh %343 : vector<2x32xf32>
    %346 = arith.mulf %344, %345 : vector<2x32xf32>
    %347 = tpu.concatenate %337, %346 in 1 : vector<2x32xf32>, vector<2x32xf32> -> vector<2x64xf32>
    %348 = arith.truncf %347 : vector<2x64xf32> to vector<2x64xbf16>
    %cst_48 = arith.constant dense<0.000000e+00> : vector<2x256xf32>
    %349 = tpu.matmul %348, %41, %cst_48 {dimension_numbers = #tpu.dot_dimension_numbers<[1], [0], [0], [1], [0, 0, 1, 1], [], []>} : vector<2x64xbf16>, vector<64x256xbf16>, vector<2x256xf32> -> vector<2x256xf32>
    %350 = arith.addf %58, %349 : vector<2x256xf32>
    %351 = arith.negf %350 : vector<2x256xf32>
    %352 = math.exp %351 : vector<2x256xf32>
    %cst_49 = arith.constant 1.000000e+00 : f32
    %353 = vector.broadcast %cst_49 : f32 to vector<2x256xf32>
    %354 = arith.addf %353, %352 : vector<2x256xf32>
    %355 = arith.divf %353, %354 : vector<2x256xf32>
    %356 = arith.mulf %355, %44 : vector<2x256xf32>
    %357 = arith.subf %356, %47 : vector<2x256xf32>
    %358 = vector.extract_strided_slice %357 {offsets = [0, 32], sizes = [2, 32], strides = [1, 1]} : vector<2x256xf32> to vector<2x32xf32>
    %359 = arith.mulf %358, %334 : vector<2x32xf32>
    %360 = vector.extract_strided_slice %357 {offsets = [0, 0], sizes = [2, 32], strides = [1, 1]} : vector<2x256xf32> to vector<2x32xf32>
    %361 = vector.extract_strided_slice %357 {offsets = [0, 64], sizes = [2, 32], strides = [1, 1]} : vector<2x256xf32> to vector<2x32xf32>
    %362 = arith.mulf %360, %361 : vector<2x32xf32>
    %363 = arith.addf %359, %362 : vector<2x32xf32>
    %364 = vector.extract_strided_slice %357 {offsets = [0, 96], sizes = [2, 32], strides = [1, 1]} : vector<2x256xf32> to vector<2x32xf32>
    %365 = math.tanh %363 : vector<2x32xf32>
    %366 = arith.mulf %364, %365 : vector<2x32xf32>
    %367 = vector.extract_strided_slice %357 {offsets = [0, 160], sizes = [2, 32], strides = [1, 1]} : vector<2x256xf32> to vector<2x32xf32>
    %368 = arith.mulf %367, %343 : vector<2x32xf32>
    %369 = vector.extract_strided_slice %357 {offsets = [0, 128], sizes = [2, 32], strides = [1, 1]} : vector<2x256xf32> to vector<2x32xf32>
    %370 = vector.extract_strided_slice %357 {offsets = [0, 192], sizes = [2, 32], strides = [1, 1]} : vector<2x256xf32> to vector<2x32xf32>
    %371 = arith.mulf %369, %370 : vector<2x32xf32>
    %372 = arith.addf %368, %371 : vector<2x32xf32>
    %373 = vector.extract_strided_slice %357 {offsets = [0, 224], sizes = [2, 32], strides = [1, 1]} : vector<2x256xf32> to vector<2x32xf32>
    %374 = math.tanh %372 : vector<2x32xf32>
    %375 = arith.mulf %373, %374 : vector<2x32xf32>
    %376 = tpu.concatenate %366, %375 in 1 : vector<2x32xf32>, vector<2x32xf32> -> vector<2x64xf32>
    %377 = arith.truncf %376 : vector<2x64xf32> to vector<2x64xbf16>
    %cst_50 = arith.constant dense<0.000000e+00> : vector<2x256xf32>
    %378 = tpu.matmul %377, %41, %cst_50 {dimension_numbers = #tpu.dot_dimension_numbers<[1], [0], [0], [1], [0, 0, 1, 1], [], []>} : vector<2x64xbf16>, vector<64x256xbf16>, vector<2x256xf32> -> vector<2x256xf32>
    %379 = arith.addf %59, %378 : vector<2x256xf32>
    %380 = arith.negf %379 : vector<2x256xf32>
    %381 = math.exp %380 : vector<2x256xf32>
    %cst_51 = arith.constant 1.000000e+00 : f32
    %382 = vector.broadcast %cst_51 : f32 to vector<2x256xf32>
    %383 = arith.addf %382, %381 : vector<2x256xf32>
    %384 = arith.divf %382, %383 : vector<2x256xf32>
    %385 = arith.mulf %384, %44 : vector<2x256xf32>
    %386 = arith.subf %385, %47 : vector<2x256xf32>
    %387 = vector.extract_strided_slice %386 {offsets = [0, 32], sizes = [2, 32], strides = [1, 1]} : vector<2x256xf32> to vector<2x32xf32>
    %388 = arith.mulf %387, %363 : vector<2x32xf32>
    %389 = vector.extract_strided_slice %386 {offsets = [0, 0], sizes = [2, 32], strides = [1, 1]} : vector<2x256xf32> to vector<2x32xf32>
    %390 = vector.extract_strided_slice %386 {offsets = [0, 64], sizes = [2, 32], strides = [1, 1]} : vector<2x256xf32> to vector<2x32xf32>
    %391 = arith.mulf %389, %390 : vector<2x32xf32>
    %392 = arith.addf %388, %391 : vector<2x32xf32>
    %393 = vector.extract_strided_slice %386 {offsets = [0, 96], sizes = [2, 32], strides = [1, 1]} : vector<2x256xf32> to vector<2x32xf32>
    %394 = math.tanh %392 : vector<2x32xf32>
    %395 = arith.mulf %393, %394 : vector<2x32xf32>
    %396 = vector.extract_strided_slice %386 {offsets = [0, 160], sizes = [2, 32], strides = [1, 1]} : vector<2x256xf32> to vector<2x32xf32>
    %397 = arith.mulf %396, %372 : vector<2x32xf32>
    %398 = vector.extract_strided_slice %386 {offsets = [0, 128], sizes = [2, 32], strides = [1, 1]} : vector<2x256xf32> to vector<2x32xf32>
    %399 = vector.extract_strided_slice %386 {offsets = [0, 192], sizes = [2, 32], strides = [1, 1]} : vector<2x256xf32> to vector<2x32xf32>
    %400 = arith.mulf %398, %399 : vector<2x32xf32>
    %401 = arith.addf %397, %400 : vector<2x32xf32>
    %402 = vector.extract_strided_slice %386 {offsets = [0, 224], sizes = [2, 32], strides = [1, 1]} : vector<2x256xf32> to vector<2x32xf32>
    %403 = math.tanh %401 : vector<2x32xf32>
    %404 = arith.mulf %402, %403 : vector<2x32xf32>
    %405 = tpu.concatenate %395, %404 in 1 : vector<2x32xf32>, vector<2x32xf32> -> vector<2x64xf32>
    %406 = arith.truncf %405 : vector<2x64xf32> to vector<2x64xbf16>
    %cst_52 = arith.constant dense<0.000000e+00> : vector<2x256xf32>
    %407 = tpu.matmul %406, %41, %cst_52 {dimension_numbers = #tpu.dot_dimension_numbers<[1], [0], [0], [1], [0, 0, 1, 1], [], []>} : vector<2x64xbf16>, vector<64x256xbf16>, vector<2x256xf32> -> vector<2x256xf32>
    %408 = arith.addf %60, %407 : vector<2x256xf32>
    %409 = arith.negf %408 : vector<2x256xf32>
    %410 = math.exp %409 : vector<2x256xf32>
    %cst_53 = arith.constant 1.000000e+00 : f32
    %411 = vector.broadcast %cst_53 : f32 to vector<2x256xf32>
    %412 = arith.addf %411, %410 : vector<2x256xf32>
    %413 = arith.divf %411, %412 : vector<2x256xf32>
    %414 = arith.mulf %413, %44 : vector<2x256xf32>
    %415 = arith.subf %414, %47 : vector<2x256xf32>
    %416 = vector.extract_strided_slice %415 {offsets = [0, 32], sizes = [2, 32], strides = [1, 1]} : vector<2x256xf32> to vector<2x32xf32>
    %417 = arith.mulf %416, %392 : vector<2x32xf32>
    %418 = vector.extract_strided_slice %415 {offsets = [0, 0], sizes = [2, 32], strides = [1, 1]} : vector<2x256xf32> to vector<2x32xf32>
    %419 = vector.extract_strided_slice %415 {offsets = [0, 64], sizes = [2, 32], strides = [1, 1]} : vector<2x256xf32> to vector<2x32xf32>
    %420 = arith.mulf %418, %419 : vector<2x32xf32>
    %421 = arith.addf %417, %420 : vector<2x32xf32>
    %422 = vector.extract_strided_slice %415 {offsets = [0, 96], sizes = [2, 32], strides = [1, 1]} : vector<2x256xf32> to vector<2x32xf32>
    %423 = math.tanh %421 : vector<2x32xf32>
    %424 = arith.mulf %422, %423 : vector<2x32xf32>
    %425 = vector.extract_strided_slice %415 {offsets = [0, 160], sizes = [2, 32], strides = [1, 1]} : vector<2x256xf32> to vector<2x32xf32>
    %426 = arith.mulf %425, %401 : vector<2x32xf32>
    %427 = vector.extract_strided_slice %415 {offsets = [0, 128], sizes = [2, 32], strides = [1, 1]} : vector<2x256xf32> to vector<2x32xf32>
    %428 = vector.extract_strided_slice %415 {offsets = [0, 192], sizes = [2, 32], strides = [1, 1]} : vector<2x256xf32> to vector<2x32xf32>
    %429 = arith.mulf %427, %428 : vector<2x32xf32>
    %430 = arith.addf %426, %429 : vector<2x32xf32>
    %431 = vector.extract_strided_slice %415 {offsets = [0, 224], sizes = [2, 32], strides = [1, 1]} : vector<2x256xf32> to vector<2x32xf32>
    %432 = math.tanh %430 : vector<2x32xf32>
    %433 = arith.mulf %431, %432 : vector<2x32xf32>
    %434 = tpu.concatenate %424, %433 in 1 : vector<2x32xf32>, vector<2x32xf32> -> vector<2x64xf32>
    %435 = arith.truncf %434 : vector<2x64xf32> to vector<2x64xbf16>
    %cst_54 = arith.constant dense<0.000000e+00> : vector<2x256xf32>
    %436 = tpu.matmul %435, %41, %cst_54 {dimension_numbers = #tpu.dot_dimension_numbers<[1], [0], [0], [1], [0, 0, 1, 1], [], []>} : vector<2x64xbf16>, vector<64x256xbf16>, vector<2x256xf32> -> vector<2x256xf32>
    %437 = arith.addf %61, %436 : vector<2x256xf32>
    %438 = arith.negf %437 : vector<2x256xf32>
    %439 = math.exp %438 : vector<2x256xf32>
    %cst_55 = arith.constant 1.000000e+00 : f32
    %440 = vector.broadcast %cst_55 : f32 to vector<2x256xf32>
    %441 = arith.addf %440, %439 : vector<2x256xf32>
    %442 = arith.divf %440, %441 : vector<2x256xf32>
    %443 = arith.mulf %442, %44 : vector<2x256xf32>
    %444 = arith.subf %443, %47 : vector<2x256xf32>
    %445 = vector.extract_strided_slice %444 {offsets = [0, 32], sizes = [2, 32], strides = [1, 1]} : vector<2x256xf32> to vector<2x32xf32>
    %446 = arith.mulf %445, %421 : vector<2x32xf32>
    %447 = vector.extract_strided_slice %444 {offsets = [0, 0], sizes = [2, 32], strides = [1, 1]} : vector<2x256xf32> to vector<2x32xf32>
    %448 = vector.extract_strided_slice %444 {offsets = [0, 64], sizes = [2, 32], strides = [1, 1]} : vector<2x256xf32> to vector<2x32xf32>
    %449 = arith.mulf %447, %448 : vector<2x32xf32>
    %450 = arith.addf %446, %449 : vector<2x32xf32>
    %451 = vector.extract_strided_slice %444 {offsets = [0, 96], sizes = [2, 32], strides = [1, 1]} : vector<2x256xf32> to vector<2x32xf32>
    %452 = math.tanh %450 : vector<2x32xf32>
    %453 = arith.mulf %451, %452 : vector<2x32xf32>
    %454 = vector.extract_strided_slice %444 {offsets = [0, 160], sizes = [2, 32], strides = [1, 1]} : vector<2x256xf32> to vector<2x32xf32>
    %455 = arith.mulf %454, %430 : vector<2x32xf32>
    %456 = vector.extract_strided_slice %444 {offsets = [0, 128], sizes = [2, 32], strides = [1, 1]} : vector<2x256xf32> to vector<2x32xf32>
    %457 = vector.extract_strided_slice %444 {offsets = [0, 192], sizes = [2, 32], strides = [1, 1]} : vector<2x256xf32> to vector<2x32xf32>
    %458 = arith.mulf %456, %457 : vector<2x32xf32>
    %459 = arith.addf %455, %458 : vector<2x32xf32>
    %460 = vector.extract_strided_slice %444 {offsets = [0, 224], sizes = [2, 32], strides = [1, 1]} : vector<2x256xf32> to vector<2x32xf32>
    %461 = math.tanh %459 : vector<2x32xf32>
    %462 = arith.mulf %460, %461 : vector<2x32xf32>
    %463 = tpu.concatenate %453, %462 in 1 : vector<2x32xf32>, vector<2x32xf32> -> vector<2x64xf32>
    %464 = arith.truncf %463 : vector<2x64xf32> to vector<2x64xbf16>
    %cst_56 = arith.constant dense<0.000000e+00> : vector<2x256xf32>
    %465 = tpu.matmul %464, %41, %cst_56 {dimension_numbers = #tpu.dot_dimension_numbers<[1], [0], [0], [1], [0, 0, 1, 1], [], []>} : vector<2x64xbf16>, vector<64x256xbf16>, vector<2x256xf32> -> vector<2x256xf32>
    %466 = arith.addf %62, %465 : vector<2x256xf32>
    %467 = arith.negf %466 : vector<2x256xf32>
    %468 = math.exp %467 : vector<2x256xf32>
    %cst_57 = arith.constant 1.000000e+00 : f32
    %469 = vector.broadcast %cst_57 : f32 to vector<2x256xf32>
    %470 = arith.addf %469, %468 : vector<2x256xf32>
    %471 = arith.divf %469, %470 : vector<2x256xf32>
    %472 = arith.mulf %471, %44 : vector<2x256xf32>
    %473 = arith.subf %472, %47 : vector<2x256xf32>
    %474 = vector.extract_strided_slice %473 {offsets = [0, 32], sizes = [2, 32], strides = [1, 1]} : vector<2x256xf32> to vector<2x32xf32>
    %475 = arith.mulf %474, %450 : vector<2x32xf32>
    %476 = vector.extract_strided_slice %473 {offsets = [0, 0], sizes = [2, 32], strides = [1, 1]} : vector<2x256xf32> to vector<2x32xf32>
    %477 = vector.extract_strided_slice %473 {offsets = [0, 64], sizes = [2, 32], strides = [1, 1]} : vector<2x256xf32> to vector<2x32xf32>
    %478 = arith.mulf %476, %477 : vector<2x32xf32>
    %479 = arith.addf %475, %478 : vector<2x32xf32>
    %480 = vector.extract_strided_slice %473 {offsets = [0, 96], sizes = [2, 32], strides = [1, 1]} : vector<2x256xf32> to vector<2x32xf32>
    %481 = math.tanh %479 : vector<2x32xf32>
    %482 = arith.mulf %480, %481 : vector<2x32xf32>
    %483 = vector.extract_strided_slice %473 {offsets = [0, 160], sizes = [2, 32], strides = [1, 1]} : vector<2x256xf32> to vector<2x32xf32>
    %484 = arith.mulf %483, %459 : vector<2x32xf32>
    %485 = vector.extract_strided_slice %473 {offsets = [0, 128], sizes = [2, 32], strides = [1, 1]} : vector<2x256xf32> to vector<2x32xf32>
    %486 = vector.extract_strided_slice %473 {offsets = [0, 192], sizes = [2, 32], strides = [1, 1]} : vector<2x256xf32> to vector<2x32xf32>
    %487 = arith.mulf %485, %486 : vector<2x32xf32>
    %488 = arith.addf %484, %487 : vector<2x32xf32>
    %489 = vector.extract_strided_slice %473 {offsets = [0, 224], sizes = [2, 32], strides = [1, 1]} : vector<2x256xf32> to vector<2x32xf32>
    %490 = math.tanh %488 : vector<2x32xf32>
    %491 = arith.mulf %489, %490 : vector<2x32xf32>
    %492 = tpu.concatenate %482, %491 in 1 : vector<2x32xf32>, vector<2x32xf32> -> vector<2x64xf32>
    %493 = arith.truncf %492 : vector<2x64xf32> to vector<2x64xbf16>
    %cst_58 = arith.constant dense<0.000000e+00> : vector<2x256xf32>
    %494 = tpu.matmul %493, %41, %cst_58 {dimension_numbers = #tpu.dot_dimension_numbers<[1], [0], [0], [1], [0, 0, 1, 1], [], []>} : vector<2x64xbf16>, vector<64x256xbf16>, vector<2x256xf32> -> vector<2x256xf32>
    %495 = arith.addf %63, %494 : vector<2x256xf32>
    %496 = arith.negf %495 : vector<2x256xf32>
    %497 = math.exp %496 : vector<2x256xf32>
    %cst_59 = arith.constant 1.000000e+00 : f32
    %498 = vector.broadcast %cst_59 : f32 to vector<2x256xf32>
    %499 = arith.addf %498, %497 : vector<2x256xf32>
    %500 = arith.divf %498, %499 : vector<2x256xf32>
    %501 = arith.mulf %500, %44 : vector<2x256xf32>
    %502 = arith.subf %501, %47 : vector<2x256xf32>
    %503 = vector.extract_strided_slice %502 {offsets = [0, 32], sizes = [2, 32], strides = [1, 1]} : vector<2x256xf32> to vector<2x32xf32>
    %504 = arith.mulf %503, %479 : vector<2x32xf32>
    %505 = vector.extract_strided_slice %502 {offsets = [0, 0], sizes = [2, 32], strides = [1, 1]} : vector<2x256xf32> to vector<2x32xf32>
    %506 = vector.extract_strided_slice %502 {offsets = [0, 64], sizes = [2, 32], strides = [1, 1]} : vector<2x256xf32> to vector<2x32xf32>
    %507 = arith.mulf %505, %506 : vector<2x32xf32>
    %508 = arith.addf %504, %507 : vector<2x32xf32>
    %509 = vector.extract_strided_slice %502 {offsets = [0, 96], sizes = [2, 32], strides = [1, 1]} : vector<2x256xf32> to vector<2x32xf32>
    %510 = math.tanh %508 : vector<2x32xf32>
    %511 = arith.mulf %509, %510 : vector<2x32xf32>
    %512 = vector.extract_strided_slice %502 {offsets = [0, 160], sizes = [2, 32], strides = [1, 1]} : vector<2x256xf32> to vector<2x32xf32>
    %513 = arith.mulf %512, %488 : vector<2x32xf32>
    %514 = vector.extract_strided_slice %502 {offsets = [0, 128], sizes = [2, 32], strides = [1, 1]} : vector<2x256xf32> to vector<2x32xf32>
    %515 = vector.extract_strided_slice %502 {offsets = [0, 192], sizes = [2, 32], strides = [1, 1]} : vector<2x256xf32> to vector<2x32xf32>
    %516 = arith.mulf %514, %515 : vector<2x32xf32>
    %517 = arith.addf %513, %516 : vector<2x32xf32>
    %518 = vector.extract_strided_slice %502 {offsets = [0, 224], sizes = [2, 32], strides = [1, 1]} : vector<2x256xf32> to vector<2x32xf32>
    %519 = math.tanh %517 : vector<2x32xf32>
    %520 = arith.mulf %518, %519 : vector<2x32xf32>
    %521 = tpu.concatenate %511, %520 in 1 : vector<2x32xf32>, vector<2x32xf32> -> vector<2x64xf32>
    %522 = arith.truncf %521 : vector<2x64xf32> to vector<2x64xbf16>
    %cst_60 = arith.constant dense<0.000000e+00> : vector<2x256xf32>
    %523 = tpu.matmul %522, %41, %cst_60 {dimension_numbers = #tpu.dot_dimension_numbers<[1], [0], [0], [1], [0, 0, 1, 1], [], []>} : vector<2x64xbf16>, vector<64x256xbf16>, vector<2x256xf32> -> vector<2x256xf32>
    %524 = arith.addf %66, %523 : vector<2x256xf32>
    %525 = arith.negf %524 : vector<2x256xf32>
    %526 = math.exp %525 : vector<2x256xf32>
    %cst_61 = arith.constant 1.000000e+00 : f32
    %527 = vector.broadcast %cst_61 : f32 to vector<2x256xf32>
    %528 = arith.addf %527, %526 : vector<2x256xf32>
    %529 = arith.divf %527, %528 : vector<2x256xf32>
    %530 = arith.mulf %529, %44 : vector<2x256xf32>
    %531 = arith.subf %530, %47 : vector<2x256xf32>
    %532 = vector.extract_strided_slice %531 {offsets = [0, 160], sizes = [2, 32], strides = [1, 1]} : vector<2x256xf32> to vector<2x32xf32>
    %533 = arith.mulf %532, %517 : vector<2x32xf32>
    %534 = vector.extract_strided_slice %531 {offsets = [0, 128], sizes = [2, 32], strides = [1, 1]} : vector<2x256xf32> to vector<2x32xf32>
    %535 = vector.extract_strided_slice %531 {offsets = [0, 192], sizes = [2, 32], strides = [1, 1]} : vector<2x256xf32> to vector<2x32xf32>
    %536 = arith.mulf %534, %535 : vector<2x32xf32>
    %537 = arith.addf %533, %536 : vector<2x32xf32>
    %538 = vector.extract_strided_slice %531 {offsets = [0, 224], sizes = [2, 32], strides = [1, 1]} : vector<2x256xf32> to vector<2x32xf32>
    %539 = math.tanh %537 : vector<2x32xf32>
    %540 = arith.mulf %538, %539 : vector<2x32xf32>
    %c0_62 = arith.constant 0 : index
    %c0_63 = arith.constant 0 : index
    %541 = vector.load %arg10[%c0_62, %c0_63] : memref<2x32xf32, #tpu.memory_space<vmem>>, vector<2x32xf32>
    tpu.vector_store %arg10[%c0_62, %c0_63], %540 {strides = array<i32>} : memref<2x32xf32, #tpu.memory_space<vmem>>, vector<2x32xf32>,
    return
  }
}

</mosaic_0001>

<bundles_post_ra>
// kernel: tile.18
= control target key start
LH: loop header
LB: loop body
LE: loop exit
PB: predicated region body
PF: predicated region fallthrough
CT: control target
= control target key end

     0   :  { %s22_s0 = inlined_call_operand.vmem [shape: f32[128], index: 0, kind: input, shape index: {}]   ;;  %s23_s1 = inlined_call_operand.vmem [shape: f32[2,128], index: 1, kind: output, shape index: {}]  }
   0x1   :  { %v4_v0 = vld [vmem:[%s22_s0] ss:$0 sm:$0xff] }
   0x2   :  { %5 = vst [vmem:[%s23_s1] sm:$0x3] %v4_v0 }

// kernel: tile.28
= control target key start
LH: loop header
LB: loop body
LE: loop exit
PB: predicated region body
PF: predicated region fallthrough
CT: control target
= control target key end

     0   :  { %s28_s0 = inlined_call_operand.vmem [shape: f32[10], index: 0, kind: input, shape index: {}]   ;;  %s29_s1 = inlined_call_operand.vmem [shape: f32[9,10], index: 1, kind: output, shape index: {}]  }
   0x1   :  { %v4_v0 = vld [vmem:[%s28_s0] ss:$0 sm:$0xff] }
   0x2   :  { %5 = vst [vmem:[%s29_s1] sm:$0xff] %v4_v0  ;;  %8 = vst [vmem:[%s29_s1 + $0x8] sm:$0xff] %v4_v0 }

// kernel: tile.29
= control target key start
LH: loop header
LB: loop body
LE: loop exit
PB: predicated region body
PF: predicated region fallthrough
CT: control target
= control target key end

     0   :  { %s75_s10 = smov 80   ;;  %s76_s11 = smov 60   ;;  %vm3_vm0 = vcmask 80896   ;;  %vm9_vm1 = vcmask 736896   ;;  %vm15_vm2 = vcmask 654896   ;;  %vm21_vm3 = vcmask 572896   ;;  %s123_s0 = inlined_call_operand.vmem [shape: f32[9,10], index: 0, kind: input, shape index: {}]   ;;  %s124_s1 = inlined_call_operand.vmem [shape: f32[1,90], index: 1, kind: output, shape index: {}]  }
   0x1   :  { %v59_v0 = vld [vmem:[%s123_s0 + $0x8] sm:$0x1]   ;;  %v61_v1 = vld [vmem:[%s123_s0 + $0x6] sm:$0x1]   ;;  %v60_v2 = vld [vmem:[%s123_s0 + $0x7] sm:$0x1]  }
   0x2   :  { %7 = vrot.lane.b32.xlu0 %v59_v0, %s75_s10  ;;  %19 = vrot.lane.b32.xlu1 %v61_v1, %s76_s11  ;;  %v62_v3 = vld [vmem:[%s123_s0 + $0x5] sm:$0x1]   ;;  %v2_v4 = vld [vmem:[%s123_s0] sm:$0x1]   ;;  %s77_s18 = smov 70   ;;  %s78_s19 = smov 50  }
   0x3   :  { %4 = vst.msk [vmem:[#allocation0] sm:$0x1] %vm3_vm0, %v2_v4   ;;  %v63_v5 = vld [vmem:[%s123_s0 + $0x4] sm:$0x1]   ;;  %v64_v6 = vld [vmem:[%s123_s0 + $0x3] sm:$0x1]  }
   0x4   :  { %s79_s24 = smov 40   ;;  %s80_s25 = smov 30   ;;  %v65_v7 = vld [vmem:[%s123_s0 + $0x2] sm:$0x1]   ;;  %v66_v8 = vld [vmem:[%s123_s0 + $0x1] sm:$0x1]  }
   0x5   :  { %s81_s0 = smov 20   ;;  %s82_s30 = smov 10   ;;  %vm27_vm4 = vcmask 490896   ;;  %vm33_vm5 = vcmask 408896   ;;  %vm39_vm6 = vcmask 326896   ;;  %vm45_vm7 = vcmask 244896  }
   0x6   :  { %13 = vrot.lane.b32.xlu0 %v60_v2, %s77_s18  ;;  %25 = vrot.lane.b32.xlu1 %v62_v3, %s78_s19  ;;  %vm51_vm8 = vcmask 162896  }
   0xa   :  { %31 = vrot.lane.b32.xlu0 %v63_v5, %s79_s24  ;;  %37 = vrot.lane.b32.xlu1 %v64_v6, %s80_s25 }
   0xe   :  { %43 = vrot.lane.b32.xlu0 %v65_v7, %s81_s0  ;;  %49 = vrot.lane.b32.xlu1 %v66_v8, %s82_s30 }
  0x74   :  { %v8_v9 = vpop.permute.xlu0 %7   ;;  %v20_v10 = vpop.permute.xlu1 %19  }
  0x75   :  { %10 = vst.msk [vmem:[#allocation0] sm:$0x1] %vm9_vm1, %v8_v9  }
  0x78   :  { %v14_v11 = vpop.permute.xlu0 %13   ;;  %v26_v12 = vpop.permute.xlu1 %25  }
  0x79   :  { %16 = vst.msk [vmem:[#allocation0] sm:$0x1] %vm15_vm2, %v14_v11  }
  0x7a   :  { %22 = vst.msk [vmem:[#allocation0] sm:$0x1] %vm21_vm3, %v20_v10  }
  0x7b   :  { %28 = vst.msk [vmem:[#allocation0] sm:$0x1] %vm27_vm4, %v26_v12  }
  0x7c   :  { %v32_v13 = vpop.permute.xlu0 %31   ;;  %v38_v14 = vpop.permute.xlu1 %37  }
  0x7d   :  { %34 = vst.msk [vmem:[#allocation0] sm:$0x1] %vm33_vm5, %v32_v13  }
  0x7e   :  { %40 = vst.msk [vmem:[#allocation0] sm:$0x1] %vm39_vm6, %v38_v14  }
  0x80   :  { %v44_v15 = vpop.permute.xlu0 %43   ;;  %v50_v16 = vpop.permute.xlu1 %49  }
  0x81   :  { %46 = vst.msk [vmem:[#allocation0] sm:$0x1] %vm45_vm7, %v44_v15  }
  0x82   :  { %52 = vst.msk [vmem:[#allocation0] sm:$0x1] %vm51_vm8, %v50_v16  }
  0x89   :  { %v56_v17 = vld [vmem:[#allocation0] sm:$0x1] }
  0x8a   :  { %58 = vst [vmem:[%s124_s1] sm:$0x1] %v56_v17 }

// kernel: fe_forward.1
= control target key start
LH: loop header
LB: loop body
LE: loop exit
PB: predicated region body
PF: predicated region fallthrough
CT: control target
= control target key end

     0   :  { %vm380_vm0 = vcmask 1043456   ;;  %vm381_vm1 = vcmask 1044480   ;;  %v5005_v2 = vmov 65535   ;;  %vm283_vm2 = vcmask 203776   ;;  %s6574_s0 = inlined_call_operand.vmem [shape: bf16[512,25], index: 0, kind: input, shape index: {}]   ;;  %s6575_s1 = inlined_call_operand.vmem [shape: bf16[25,90], index: 1, kind: input, shape index: {}]   ;;  %s6576_s2 = inlined_call_operand.vmem [shape: f32[1,90], index: 2, kind: input, shape index: {}]   ;;  %s6577_s3 = inlined_call_operand.vmem [shape: f32[512,90], index: 3, kind: input, shape index: {}]   ;;  %s6578_s4 = inlined_call_operand.vmem [shape: bf16[90,20], index: 4, kind: input, shape index: {}]   ;;  %s6579_s5 = inlined_call_operand.vmem [shape: f32[1,20], index: 5, kind: input, shape index: {}]   ;;  %s6580_s6 = inlined_call_operand.vmem [shape: bf16[320,256], index: 6, kind: input, shape index: {}]   ;;  %s6581_s7 = inlined_call_operand.vmem [shape: f32[1,256], index: 7, kind: input, shape index: {}]   ;;  %s6582_s8 = inlined_call_operand.vmem [shape: bf16[64,256], index: 8, kind: input, shape index: {}]   ;;  %s6583_s9 = inlined_call_operand.vmem [shape: f32[2,256], index: 9, kind: input, shape index: {}]   ;;  %s6584_s10 = inlined_call_operand.hbm [shape: f32[2,32], index: 10, kind: output, shape index: {}]  }
   0x1   :  { %v4669_v0 = vld [vmem:[%s6575_s1] sm:$0xff]   ;;  %v4670_v1 = vld [vmem:[%s6575_s1 + $0x8] sm:$0x1f]   ;;  %v382_v3 = vsel %vm380_vm0, 4294967295, %v5005_v2  ;;  %v4673_v8 = vld [vmem:[%s6574_s0 + $0x10] sm:$0xff]  }
   0x2   :  { %4339 = vmatprep.subr.bf16.mxu0 %v4669_v0  ;;  %v4671_v4 = vld [vmem:[%s6574_s0] sm:$0xff]   ;;  %v383_v5 = vsel %vm381_vm1, %v382_v3, 0  ;;  %v4672_v7 = vld [vmem:[%s6574_s0 + $0x8] sm:$0xff]   ;;  %v4674_v9 = vld [vmem:[%s6574_s0 + $0x18] sm:$0xff]  }
   0x3   :  { %4340 = vmatpush3.bf16.msra.mxu0 %v4669_v0  ;;  %v385_v6 = vand.u32 %v4670_v1, %v383_v5  ;;  %4343 = vmatprep.mubr.msk.bf16.mxu0 %vm283_vm2, %v4671_v4  ;;  %v4675_v10 = vld [vmem:[%s6574_s0 + $0x20] sm:$0xff]   ;;  %v4676_v11 = vld [vmem:[%s6574_s0 + $0x28] sm:$0xff]   ;;  %v4677_v12 = vld [vmem:[%s6574_s0 + $0x30] sm:$0xff]  }
   0x4   :  { %v4678_v13 = vld [vmem:[%s6574_s0 + $0x38] sm:$0xff]   ;;  %v4679_v14 = vld [vmem:[%s6574_s0 + $0x40] sm:$0xff]   ;;  %v4704_v16 = vld [vmem:[%s6578_s4 + $0x8] sm:$0xff]  }
   0x5   :  { %4341 = vmatprep.subr.bf16.mxu0 %v385_v6  ;;  %v4703_v15 = vld [vmem:[%s6578_s4] sm:$0xff]   ;;  %v4680_v17 = vld [vmem:[%s6574_s0 + $0x48] sm:$0xff]   ;;  %v4705_v18 = vld [vmem:[%s6578_s4 + $0x10] sm:$0xff]  }
   0x6   :  { %4407 = vmatprep.subr.bf16.mxu1 %v4703_v15  ;;  %v4681_v19 = vld [vmem:[%s6574_s0 + $0x50] sm:$0xff]   ;;  %v4682_v20 = vld [vmem:[%s6574_s0 + $0x58] sm:$0xff]   ;;  %v4683_v21 = vld [vmem:[%s6574_s0 + $0x60] sm:$0xff]  }
   0x7   :  { %4342 = vmatpush3.bf16.msra.mxu0 %v385_v6  ;;  %4408 = vmatpush3.bf16.msra.mxu1 %v4703_v15  ;;  %v4684_v22 = vld [vmem:[%s6574_s0 + $0x68] sm:$0xff]  }
   0x8   :  { %4409 = vmatprep.subr.bf16.mxu1 %v4704_v16 }
   0xa   :  { %4344 = vmatmul.mubr.msk.bf16.vlgmr.msra.gmra.mrb[0].mxu0 %vm283_vm2, %v4672_v7 }
   0xb   :  { %4347 = vmatprep.mubr.msk.bf16.mxu0 %vm283_vm2, %v4673_v8  ;;  %4410 = vmatpush3.bf16.msra.mxu1 %v4704_v16 }
   0xc   :  { %4411 = vmatprep.subr.bf16.mxu1 %v4705_v18 }
   0xf   :  { %4412 = vmatpush3.bf16.msra.mxu1 %v4705_v18 }
  0x12   :  { %4348 = vmatmul.mubr.msk.bf16.gmra.mrb[4].mxu0 %vm283_vm2, %v4674_v9 }
  0x13   :  { %4351 = vmatprep.mubr.msk.bf16.mxu0 %vm283_vm2, %v4675_v10 }
  0x1a   :  { %4352 = vmatmul.mubr.msk.bf16.gmra.mrb[8].mxu0 %vm283_vm2, %v4676_v11 }
  0x1b   :  { %4355 = vmatprep.mubr.msk.bf16.mxu0 %vm283_vm2, %v4677_v12 }
  0x22   :  { %4356 = vmatmul.mubr.msk.bf16.gmra.mrb[12].mxu0 %vm283_vm2, %v4678_v13 }
  0x23   :  { %4359 = vmatprep.mubr.msk.bf16.mxu0 %vm283_vm2, %v4679_v14 }
  0x2a   :  { %4360 = vmatmul.mubr.msk.bf16.gmra.mrb[16].mxu0 %vm283_vm2, %v4680_v17 }
  0x2b   :  { %4363 = vmatprep.mubr.msk.bf16.mxu0 %vm283_vm2, %v4681_v19 }
  0x32   :  { %4364 = vmatmul.mubr.msk.bf16.gmra.mrb[20].mxu0 %vm283_vm2, %v4682_v20 }
  0x33   :  { %4367 = vmatprep.mubr.msk.bf16.mxu0 %vm283_vm2, %v4683_v21 }
  0x34   :  { %15 = vsyncpa [#allocation3], 0  ;;  %v4685_v23 = vld [vmem:[%s6574_s0 + $0x70] sm:$0xff]   ;;  %v4686_v24 = vld [vmem:[%s6574_s0 + $0x78] sm:$0xff]   ;;  %vm954_vm3 = vcmask 736256   ;;  %s5006_s16 = smov 20  }
  0x35   :  { %v4687_v25 = vld [vmem:[%s6574_s0 + $0x80] sm:$0xff]   ;;  %v4688_v26 = vld [vmem:[%s6574_s0 + $0x88] sm:$0xff]   ;;  %v4689_v27 = vld [vmem:[%s6574_s0 + $0x90] sm:$0xff]   ;;  %s5007_s20 = smov 40   ;;  %s5008_s23 = smov 60   ;;  %vm1647_vm4 = vcmask 162816  }
  0x36   :  { %v4690_v28 = vld [vmem:[%s6574_s0 + $0x98] sm:$0xff]   ;;  %v4691_v29 = vld [vmem:[%s6574_s0 + $0xa0] sm:$0xff]   ;;  %v4692_v30 = vld [vmem:[%s6574_s0 + $0xa8] sm:$0xff]   ;;  %s5009_s28 = smov 80   ;;  %s5010_s29 = smov 100   ;;  %vm1652_vm5 = vcmask 326656  }
  0x37   :  { %v4693_v31 = vld [vmem:[%s6574_s0 + $0xb0] sm:$0xff]   ;;  %v4706_v32 = vld [vmem:[%s6578_s4 + $0x18] sm:$0xff]   ;;  %v4695_v34 = vld [vmem:[%s6574_s0 + $0xc0] sm:$0xff]   ;;  %s5013_s1 = smov 32   ;;  %s5015_s11 = smov 72   ;;  %vm1657_vm6 = vcmask 490496  }
  0x38   :  { %v4694_v33 = vld [vmem:[%s6574_s0 + $0xb8] sm:$0xff]   ;;  %4413 = vmatprep.subr.bf16.mxu1 %v4706_v32  ;;  %v4707_v35 = vld [vmem:[%s6578_s4 + $0x20] sm:$0xff]   ;;  %v4708_v36 = vld [vmem:[%s6578_s4 + $0x28] sm:$0x1f]   ;;  %s5016_s14 = smov 92   ;;  %s5017_s17 = smov 112  }
  0x39   :  { %4414 = vmatpush3.bf16.msra.mxu1 %v4706_v32  ;;  %v4696_v37 = vld [vmem:[%s6574_s0 + $0xc8] sm:$0xff]   ;;  %v1052_v38 = vsel %vm381_vm1, %v4708_v36, 0  ;;  %v4697_v39 = vld [vmem:[%s6574_s0 + $0xd0] sm:$0xff]   ;;  %v4698_v40 = vld [vmem:[%s6574_s0 + $0xd8] sm:$0xff]   ;;  %s5018_s18 = smov 4   ;;  %s5020_s19 = smov 24  }
  0x3a   :  { %4368 = vmatmul.mubr.msk.bf16.gmra.mrb[24].mxu0 %vm283_vm2, %v4684_v22  ;;  %4415 = vmatprep.subr.bf16.mxu1 %v4707_v35  ;;  %v4699_v41 = vld [vmem:[%s6574_s0 + $0xe0] sm:$0xff]   ;;  %v4700_v42 = vld [vmem:[%s6574_s0 + $0xe8] sm:$0xff]   ;;  %v4701_v43 = vld [vmem:[%s6574_s0 + $0xf0] sm:$0xff]   ;;  %s5021_s21 = smov 44   ;;  %vm1662_vm7 = vcmask 654336   ;;  %vm1667_vm8 = vcmask 818176  }
  0x3b   :  { %4371 = vmatprep.mubr.msk.bf16.mxu0 %vm283_vm2, %v4685_v23  ;;  %v4702_v44 = vld [vmem:[%s6574_s0 + $0xf8] sm:$0xff]   ;;  %v5237_v45 = vld [vmem:[%s6576_s2] ss:$0 sm:$0xff]  ;;  %v742_v54 = vld [vmem:[%s6577_s3 + $0x10] sm:$0xff]  ;;  %s5011_s2 = smov 120   ;;  %vm1672_vm9 = vcmask 982016  }
  0x3c   :  { %v743_v56 = vld [vmem:[%s6577_s3 + $0x18] sm:$0xff]  ;;  %v740_v58 = vld [vmem:[%s6577_s3] sm:$0xff]  ;;  %v741_v60 = vld [vmem:[%s6577_s3 + $0x8] sm:$0xff]  ;;  %vm1677_vm10 = vcmask 97280   ;;  %vm1682_vm11 = vcmask 261120   ;;  %vm1687_vm12 = vcmask 424960  }
  0x3d   :  { %4416 = vmatpush3.bf16.msra.mxu1 %v4707_v35  ;;  %v746_v12 = vld [vmem:[%s6577_s3 + $0x30] sm:$0xff]  ;;  %v747_v14 = vld [vmem:[%s6577_s3 + $0x38] sm:$0xff]  ;;  %v744_v16 = vld [vmem:[%s6577_s3 + $0x20] sm:$0xff]  ;;  %vm1697_vm13 = vcmask 752640   ;;  %vm1692_vm14 = vcmask 588800   ;;  %vm1702_vm15 = vcmask 916480  }
  0x3e   :  { %4499 = vmatprep.subr.msk.bf16.mxu1 %vm381_vm1, %v4708_v36  ;;  %v745_v18 = vld [vmem:[%s6577_s3 + $0x28] sm:$0xff]  ;;  %v751_v36 = vld [vmem:[%s6577_s3 + $0x58] sm:$0xff]  ;;  %vm1707_vm0 = vcmask 31744   ;;  %vm1712_vm1 = vcmask 195584  }
  0x41   :  { %4418 = vmatpush3.bf16.msra.mxu1 %v1052_v38  ;;  %v748_v38 = vld [vmem:[%s6577_s3 + $0x40] sm:$0xff] }
  0x42   :  { %4372 = vmatmul.mubr.msk.bf16.gmra.mrb[28].mxu0 %vm283_vm2, %v4686_v24 }
  0x43   :  { %4375 = vmatprep.mubr.msk.bf16.mxu0 %vm283_vm2, %v4687_v25 }
  0x4a   :  { %4376 = vmatmul.mubr.msk.bf16.gmra.mrb[32].mxu0 %vm283_vm2, %v4688_v26 }
  0x4b   :  { %4379 = vmatprep.mubr.msk.bf16.mxu0 %vm283_vm2, %v4689_v27 }
  0x52   :  { %4380 = vmatmul.mubr.msk.bf16.gmra.mrb[36].mxu0 %vm283_vm2, %v4690_v28 }
  0x53   :  { %4383 = vmatprep.mubr.msk.bf16.mxu0 %vm283_vm2, %v4691_v29 }
  0x5a   :  { %4384 = vmatmul.mubr.msk.bf16.gmra.mrb[40].mxu0 %vm283_vm2, %v4692_v30 }
  0x5b   :  { %4387 = vmatprep.mubr.msk.bf16.mxu0 %vm283_vm2, %v4693_v31 }
  0x62   :  { %4388 = vmatmul.mubr.msk.bf16.gmra.mrb[44].mxu0 %vm283_vm2, %v4694_v33 }
  0x63   :  { %4391 = vmatprep.mubr.msk.bf16.mxu0 %vm283_vm2, %v4695_v34  ;;  %v750_v34 = vld [vmem:[%s6577_s3 + $0x50] sm:$0xff] }
  0x6a   :  { %4392 = vmatmul.mubr.msk.bf16.gmra.mrb[48].mxu0 %vm283_vm2, %v4696_v37 }
  0x6b   :  { %4395 = vmatprep.mubr.msk.bf16.mxu0 %vm283_vm2, %v4697_v39 }
  0x72   :  { %4396 = vmatmul.mubr.msk.bf16.gmra.mrb[52].mxu0 %vm283_vm2, %v4698_v40  ;;  %v749_v40 = vld [vmem:[%s6577_s3 + $0x48] sm:$0xff] }
  0x73   :  { %4399 = vmatprep.mubr.msk.bf16.mxu0 %vm283_vm2, %v4699_v41 }
  0x7a   :  { %4400 = vmatmul.mubr.msk.bf16.gmra.mrb[56].mxu0 %vm283_vm2, %v4700_v42 }
  0x7b   :  { %4403 = vmatprep.mubr.msk.bf16.mxu0 %vm283_vm2, %v4701_v43 }
  0x82   :  { %4404 = vmatmul.mubr.msk.bf16.gmra.mrb[60].mxu0 %vm283_vm2, %v4702_v44  ;;  %vm1717_vm2 = vcmask 359424  }
  0xdd   :  { %v4345_v46 = vpop.f32.mrb[0].mxu0 }
  0xde   :  { %v430_v47 = vadd.f32 %v4345_v46, %v5237_v45  ;;  %v421_v48 = vpop.f32.mrb[1].mxu0 }
  0xdf   :  { %v422_v49 = vadd.f32 %v5237_v45, %v421_v48  ;;  %v4346_v50 = vpop.f32.mrb[2].mxu0 }
  0xe0   :  { %v678_v51 = vmax.f32 %v430_v47, 0.0  ;;  %v433_v52 = vadd.f32 %v4346_v50, %v5237_v45  ;;  %v424_v53 = vpop.f32.mrb[3].mxu0 }
  0xe1   :  { %v676_v55 = vmax.f32 %v422_v49, 0.0  ;;  %v425_v57 = vadd.f32 %v5237_v45, %v424_v53 }
  0xe2   :  { %v679_v59 = vmax.f32 %v433_v52, 0.0  ;;  %v806_v62 = vmul.f32 %v742_v54, %v678_v51 }
  0xe3   :  { %v677_v61 = vmax.f32 %v425_v57, 0.0  ;;  %v804_v0 = vmul.f32 %v740_v58, %v676_v55  ;;  %v754_v57 = vld [vmem:[%s6577_s3 + $0x70] sm:$0xff] }
  0xe4   :  { %v807_v63 = vmul.f32 %v743_v56, %v679_v59  ;;  %v755_v59 = vld [vmem:[%s6577_s3 + $0x78] sm:$0xff] }
  0xe5   :  { %v805_v1 = vmul.f32 %v741_v60, %v677_v61  ;;  %v4349_v2 = vpop.f32.mrb[4].mxu0  ;;  %v752_v61 = vld [vmem:[%s6577_s3 + $0x60] sm:$0xff] }
  0xe6   :  { %v869_v3 = vpack.c.bf16 %v807_v63, %v806_v62  ;;  %v446_v4 = vadd.f32 %v4349_v2, %v5237_v45  ;;  %v437_v5 = vpop.f32.mrb[5].mxu0  ;;  %v753_v63 = vld [vmem:[%s6577_s3 + $0x68] sm:$0xff] }
  0xe7   :  { %v438_v6 = vadd.f32 %v5237_v45, %v437_v5  ;;  %v4350_v7 = vpop.f32.mrb[6].mxu0  ;;  %v868_v8 = vpack.c.bf16 %v805_v1, %v804_v0 }
  0xe8   :  { %v682_v9 = vmax.f32 %v446_v4, 0.0  ;;  %v449_v10 = vadd.f32 %v4350_v7, %v5237_v45  ;;  %v440_v11 = vpop.f32.mrb[7].mxu0 }
  0xe9   :  { %v680_v13 = vmax.f32 %v438_v6, 0.0  ;;  %v441_v15 = vadd.f32 %v5237_v45, %v440_v11  ;;  %4419 = vmatprep.mubr.msk.bf16.mxu1 %vm954_vm3, %v868_v8 }
  0xea   :  { %v683_v17 = vmax.f32 %v449_v10, 0.0  ;;  %4420 = vmatmul.mubr.msk.bf16.vlgmr.msra.gmra.mrb[0].mxu1 %vm954_vm3, %v869_v3  ;;  %v810_v20 = vmul.f32 %v746_v12, %v682_v9 }
  0xeb   :  { %v681_v19 = vmax.f32 %v441_v15, 0.0  ;;  %v808_v22 = vmul.f32 %v744_v16, %v680_v13  ;;  %v758_v15 = vld [vmem:[%s6577_s3 + $0x90] sm:$0xff] }
  0xec   :  { %v811_v21 = vmul.f32 %v747_v14, %v683_v17  ;;  %v759_v17 = vld [vmem:[%s6577_s3 + $0x98] sm:$0xff] }
  0xed   :  { %v809_v23 = vmul.f32 %v745_v18, %v681_v19  ;;  %v4353_v24 = vpop.f32.mrb[8].mxu0  ;;  %v756_v19 = vld [vmem:[%s6577_s3 + $0x80] sm:$0xff] }
  0xee   :  { %v871_v25 = vpack.c.bf16 %v811_v21, %v810_v20  ;;  %v462_v26 = vadd.f32 %v4353_v24, %v5237_v45  ;;  %v453_v27 = vpop.f32.mrb[9].mxu0  ;;  %v757_v21 = vld [vmem:[%s6577_s3 + $0x88] sm:$0xff] }
  0xef   :  { %v870_v28 = vpack.c.bf16 %v809_v23, %v808_v22  ;;  %v454_v29 = vadd.f32 %v5237_v45, %v453_v27  ;;  %v4354_v30 = vpop.f32.mrb[10].mxu0 }
  0xf0   :  { %v686_v31 = vmax.f32 %v462_v26, 0.0  ;;  %v465_v32 = vadd.f32 %v4354_v30, %v5237_v45  ;;  %v456_v33 = vpop.f32.mrb[11].mxu0 }
  0xf1   :  { %v684_v35 = vmax.f32 %v454_v29, 0.0  ;;  %v457_v37 = vadd.f32 %v5237_v45, %v456_v33  ;;  %4423 = vmatprep.mubr.msk.bf16.mxu1 %vm954_vm3, %v870_v28 }
  0xf2   :  { %v687_v39 = vmax.f32 %v465_v32, 0.0  ;;  %4424 = vmatmul.mubr.msk.bf16.gmra.mrb[4].mxu1 %vm954_vm3, %v871_v25  ;;  %v814_v42 = vmul.f32 %v750_v34, %v686_v31 }
  0xf3   :  { %v685_v41 = vmax.f32 %v457_v37, 0.0  ;;  %v812_v44 = vmul.f32 %v748_v38, %v684_v35  ;;  %v762_v37 = vld [vmem:[%s6577_s3 + $0xb0] sm:$0xff] }
  0xf4   :  { %v815_v43 = vmul.f32 %v751_v36, %v687_v39  ;;  %v763_v39 = vld [vmem:[%s6577_s3 + $0xb8] sm:$0xff] }
  0xf5   :  { %v813_v46 = vmul.f32 %v749_v40, %v685_v41  ;;  %v4357_v47 = vpop.f32.mrb[12].mxu0  ;;  %v760_v41 = vld [vmem:[%s6577_s3 + $0xa0] sm:$0xff] }
  0xf6   :  { %v873_v48 = vpack.c.bf16 %v815_v43, %v814_v42  ;;  %v478_v49 = vadd.f32 %v4357_v47, %v5237_v45  ;;  %v469_v50 = vpop.f32.mrb[13].mxu0  ;;  %v761_v43 = vld [vmem:[%s6577_s3 + $0xa8] sm:$0xff] }
  0xf7   :  { %v872_v51 = vpack.c.bf16 %v813_v46, %v812_v44  ;;  %v470_v52 = vadd.f32 %v5237_v45, %v469_v50  ;;  %v4358_v53 = vpop.f32.mrb[14].mxu0 }
  0xf8   :  { %v690_v54 = vmax.f32 %v478_v49, 0.0  ;;  %v481_v55 = vadd.f32 %v4358_v53, %v5237_v45  ;;  %v472_v56 = vpop.f32.mrb[15].mxu0 }
  0xf9   :  { %v688_v58 = vmax.f32 %v470_v52, 0.0  ;;  %v473_v60 = vadd.f32 %v5237_v45, %v472_v56  ;;  %4427 = vmatprep.mubr.msk.bf16.mxu1 %vm954_vm3, %v872_v51 }
  0xfa   :  { %v691_v62 = vmax.f32 %v481_v55, 0.0  ;;  %4428 = vmatmul.mubr.msk.bf16.gmra.mrb[8].mxu1 %vm954_vm3, %v873_v48  ;;  %v818_v1 = vmul.f32 %v754_v57, %v690_v54 }
  0xfb   :  { %v689_v0 = vmax.f32 %v473_v60, 0.0  ;;  %v816_v3 = vmul.f32 %v752_v61, %v688_v58  ;;  %v766_v60 = vld [vmem:[%s6577_s3 + $0xd0] sm:$0xff] }
  0xfc   :  { %v819_v2 = vmul.f32 %v755_v59, %v691_v62  ;;  %v767_v62 = vld [vmem:[%s6577_s3 + $0xd8] sm:$0xff] }
  0xfd   :  { %v817_v4 = vmul.f32 %v753_v63, %v689_v0  ;;  %v4361_v5 = vpop.f32.mrb[16].mxu0  ;;  %v764_v0 = vld [vmem:[%s6577_s3 + $0xc0] sm:$0xff] }
  0xfe   :  { %v875_v6 = vpack.c.bf16 %v819_v2, %v818_v1  ;;  %v494_v7 = vadd.f32 %v4361_v5, %v5237_v45  ;;  %v485_v8 = vpop.f32.mrb[17].mxu0  ;;  %v765_v2 = vld [vmem:[%s6577_s3 + $0xc8] sm:$0xff] }
  0xff   :  { %v874_v9 = vpack.c.bf16 %v817_v4, %v816_v3  ;;  %v486_v10 = vadd.f32 %v5237_v45, %v485_v8  ;;  %v4362_v11 = vpop.f32.mrb[18].mxu0 }
 0x100   :  { %v694_v12 = vmax.f32 %v494_v7, 0.0  ;;  %v497_v13 = vadd.f32 %v4362_v11, %v5237_v45  ;;  %v488_v14 = vpop.f32.mrb[19].mxu0 }
 0x101   :  { %v692_v16 = vmax.f32 %v486_v10, 0.0  ;;  %v489_v18 = vadd.f32 %v5237_v45, %v488_v14  ;;  %4431 = vmatprep.mubr.msk.bf16.mxu1 %vm954_vm3, %v874_v9 }
 0x102   :  { %v695_v20 = vmax.f32 %v497_v13, 0.0  ;;  %4432 = vmatmul.mubr.msk.bf16.gmra.mrb[12].mxu1 %vm954_vm3, %v875_v6  ;;  %v822_v23 = vmul.f32 %v758_v15, %v694_v12 }
 0x103   :  { %v693_v22 = vmax.f32 %v489_v18, 0.0  ;;  %v820_v25 = vmul.f32 %v756_v19, %v692_v16  ;;  %v770_v18 = vld [vmem:[%s6577_s3 + $0xf0] sm:$0xff] }
 0x104   :  { %v823_v24 = vmul.f32 %v759_v17, %v695_v20  ;;  %v771_v20 = vld [vmem:[%s6577_s3 + $0xf8] sm:$0xff] }
 0x105   :  { %v821_v26 = vmul.f32 %v757_v21, %v693_v22  ;;  %v4365_v27 = vpop.f32.mrb[20].mxu0  ;;  %v768_v22 = vld [vmem:[%s6577_s3 + $0xe0] sm:$0xff] }
 0x106   :  { %v877_v28 = vpack.c.bf16 %v823_v24, %v822_v23  ;;  %v510_v29 = vadd.f32 %v4365_v27, %v5237_v45  ;;  %v501_v30 = vpop.f32.mrb[21].mxu0  ;;  %v769_v24 = vld [vmem:[%s6577_s3 + $0xe8] sm:$0xff] }
 0x107   :  { %v876_v31 = vpack.c.bf16 %v821_v26, %v820_v25  ;;  %v502_v32 = vadd.f32 %v5237_v45, %v501_v30  ;;  %v4366_v33 = vpop.f32.mrb[22].mxu0 }
 0x108   :  { %v698_v34 = vmax.f32 %v510_v29, 0.0  ;;  %v513_v35 = vadd.f32 %v4366_v33, %v5237_v45  ;;  %v504_v36 = vpop.f32.mrb[23].mxu0 }
 0x109   :  { %v696_v38 = vmax.f32 %v502_v32, 0.0  ;;  %v505_v40 = vadd.f32 %v5237_v45, %v504_v36  ;;  %4435 = vmatprep.mubr.msk.bf16.mxu1 %vm954_vm3, %v876_v31 }
 0x10a   :  { %v699_v42 = vmax.f32 %v513_v35, 0.0  ;;  %4436 = vmatmul.mubr.msk.bf16.gmra.mrb[16].mxu1 %vm954_vm3, %v877_v28  ;;  %v826_v46 = vmul.f32 %v762_v37, %v698_v34 }
 0x10b   :  { %v697_v44 = vmax.f32 %v505_v40, 0.0  ;;  %v824_v48 = vmul.f32 %v760_v41, %v696_v38  ;;  %v774_v40 = vld [vmem:[%s6577_s3 + $0x110] sm:$0xff] }
 0x10c   :  { %v827_v47 = vmul.f32 %v763_v39, %v699_v42  ;;  %v775_v42 = vld [vmem:[%s6577_s3 + $0x118] sm:$0xff] }
 0x10d   :  { %v825_v49 = vmul.f32 %v761_v43, %v697_v44  ;;  %v4369_v50 = vpop.f32.mrb[24].mxu0  ;;  %v772_v44 = vld [vmem:[%s6577_s3 + $0x100] sm:$0xff] }
 0x10e   :  { %v879_v51 = vpack.c.bf16 %v827_v47, %v826_v46  ;;  %v526_v52 = vadd.f32 %v4369_v50, %v5237_v45  ;;  %v517_v53 = vpop.f32.mrb[25].mxu0  ;;  %v773_v47 = vld [vmem:[%s6577_s3 + $0x108] sm:$0xff] }
 0x10f   :  { %v878_v54 = vpack.c.bf16 %v825_v49, %v824_v48  ;;  %v518_v55 = vadd.f32 %v5237_v45, %v517_v53  ;;  %v4370_v56 = vpop.f32.mrb[26].mxu0 }
 0x110   :  { %v702_v57 = vmax.f32 %v526_v52, 0.0  ;;  %v529_v58 = vadd.f32 %v4370_v56, %v5237_v45  ;;  %v520_v59 = vpop.f32.mrb[27].mxu0 }
 0x111   :  { %v700_v61 = vmax.f32 %v518_v55, 0.0  ;;  %v521_v63 = vadd.f32 %v5237_v45, %v520_v59  ;;  %4439 = vmatprep.mubr.msk.bf16.mxu1 %vm954_vm3, %v878_v54 }
 0x112   :  { %v703_v1 = vmax.f32 %v529_v58, 0.0  ;;  %4440 = vmatmul.mubr.msk.bf16.gmra.mrb[20].mxu1 %vm954_vm3, %v879_v51  ;;  %v830_v4 = vmul.f32 %v766_v60, %v702_v57 }
 0x113   :  { %v701_v3 = vmax.f32 %v521_v63, 0.0  ;;  %v828_v6 = vmul.f32 %v764_v0, %v700_v61  ;;  %v778_v63 = vld [vmem:[%s6577_s3 + $0x130] sm:$0xff] }
 0x114   :  { %v831_v5 = vmul.f32 %v767_v62, %v703_v1  ;;  %v779_v1 = vld [vmem:[%s6577_s3 + $0x138] sm:$0xff] }
 0x115   :  { %v829_v7 = vmul.f32 %v765_v2, %v701_v3  ;;  %v4373_v8 = vpop.f32.mrb[28].mxu0  ;;  %v776_v3 = vld [vmem:[%s6577_s3 + $0x120] sm:$0xff] }
 0x116   :  { %v881_v9 = vpack.c.bf16 %v831_v5, %v830_v4  ;;  %v542_v10 = vadd.f32 %v4373_v8, %v5237_v45  ;;  %v533_v11 = vpop.f32.mrb[29].mxu0  ;;  %v777_v5 = vld [vmem:[%s6577_s3 + $0x128] sm:$0xff] }
 0x117   :  { %v880_v12 = vpack.c.bf16 %v829_v7, %v828_v6  ;;  %v534_v13 = vadd.f32 %v5237_v45, %v533_v11  ;;  %v4374_v14 = vpop.f32.mrb[30].mxu0 }
 0x118   :  { %v706_v15 = vmax.f32 %v542_v10, 0.0  ;;  %v545_v16 = vadd.f32 %v4374_v14, %v5237_v45  ;;  %v536_v17 = vpop.f32.mrb[31].mxu0 }
 0x119   :  { %v704_v19 = vmax.f32 %v534_v13, 0.0  ;;  %v537_v21 = vadd.f32 %v5237_v45, %v536_v17  ;;  %4443 = vmatprep.mubr.msk.bf16.mxu1 %vm954_vm3, %v880_v12 }
 0x11a   :  { %v707_v23 = vmax.f32 %v545_v16, 0.0  ;;  %4444 = vmatmul.mubr.msk.bf16.gmra.mrb[24].mxu1 %vm954_vm3, %v881_v9  ;;  %v834_v26 = vmul.f32 %v770_v18, %v706_v15 }
 0x11b   :  { %v705_v25 = vmax.f32 %v537_v21, 0.0  ;;  %v832_v28 = vmul.f32 %v768_v22, %v704_v19  ;;  %v782_v21 = vld [vmem:[%s6577_s3 + $0x150] sm:$0xff] }
 0x11c   :  { %v835_v27 = vmul.f32 %v771_v20, %v707_v23  ;;  %v783_v23 = vld [vmem:[%s6577_s3 + $0x158] sm:$0xff] }
 0x11d   :  { %v833_v29 = vmul.f32 %v769_v24, %v705_v25  ;;  %v4377_v30 = vpop.f32.mrb[32].mxu0  ;;  %v780_v25 = vld [vmem:[%s6577_s3 + $0x140] sm:$0xff] }
 0x11e   :  { %v883_v31 = vpack.c.bf16 %v835_v27, %v834_v26  ;;  %v558_v32 = vadd.f32 %v4377_v30, %v5237_v45  ;;  %v549_v33 = vpop.f32.mrb[33].mxu0  ;;  %v781_v27 = vld [vmem:[%s6577_s3 + $0x148] sm:$0xff] }
 0x11f   :  { %v882_v34 = vpack.c.bf16 %v833_v29, %v832_v28  ;;  %v550_v35 = vadd.f32 %v5237_v45, %v549_v33  ;;  %v4378_v36 = vpop.f32.mrb[34].mxu0 }
 0x120   :  { %v710_v37 = vmax.f32 %v558_v32, 0.0  ;;  %v561_v38 = vadd.f32 %v4378_v36, %v5237_v45  ;;  %v552_v39 = vpop.f32.mrb[35].mxu0 }
 0x121   :  { %v708_v41 = vmax.f32 %v550_v35, 0.0  ;;  %v553_v43 = vadd.f32 %v5237_v45, %v552_v39  ;;  %4447 = vmatprep.mubr.msk.bf16.mxu1 %vm954_vm3, %v882_v34 }
 0x122   :  { %v711_v46 = vmax.f32 %v561_v38, 0.0  ;;  %4448 = vmatmul.mubr.msk.bf16.gmra.mrb[28].mxu1 %vm954_vm3, %v883_v31  ;;  %v838_v49 = vmul.f32 %v774_v40, %v710_v37 }
 0x123   :  { %v709_v48 = vmax.f32 %v553_v43, 0.0  ;;  %v836_v51 = vmul.f32 %v772_v44, %v708_v41  ;;  %v786_v43 = vld [vmem:[%s6577_s3 + $0x170] sm:$0xff] }
 0x124   :  { %v839_v50 = vmul.f32 %v775_v42, %v711_v46  ;;  %v787_v46 = vld [vmem:[%s6577_s3 + $0x178] sm:$0xff] }
 0x125   :  { %v837_v52 = vmul.f32 %v773_v47, %v709_v48  ;;  %v4381_v53 = vpop.f32.mrb[36].mxu0  ;;  %v784_v48 = vld [vmem:[%s6577_s3 + $0x160] sm:$0xff] }
 0x126   :  { %v885_v54 = vpack.c.bf16 %v839_v50, %v838_v49  ;;  %v574_v55 = vadd.f32 %v4381_v53, %v5237_v45  ;;  %v565_v56 = vpop.f32.mrb[37].mxu0  ;;  %v785_v50 = vld [vmem:[%s6577_s3 + $0x168] sm:$0xff] }
 0x127   :  { %v884_v57 = vpack.c.bf16 %v837_v52, %v836_v51  ;;  %v566_v58 = vadd.f32 %v5237_v45, %v565_v56  ;;  %v4382_v59 = vpop.f32.mrb[38].mxu0 }
 0x128   :  { %v714_v60 = vmax.f32 %v574_v55, 0.0  ;;  %v577_v61 = vadd.f32 %v4382_v59, %v5237_v45  ;;  %v568_v62 = vpop.f32.mrb[39].mxu0 }
 0x129   :  { %v712_v0 = vmax.f32 %v566_v58, 0.0  ;;  %v569_v2 = vadd.f32 %v5237_v45, %v568_v62  ;;  %4451 = vmatprep.mubr.msk.bf16.mxu1 %vm954_vm3, %v884_v57 }
 0x12a   :  { %v715_v4 = vmax.f32 %v577_v61, 0.0  ;;  %4452 = vmatmul.mubr.msk.bf16.gmra.mrb[32].mxu1 %vm954_vm3, %v885_v54  ;;  %v842_v7 = vmul.f32 %v778_v63, %v714_v60 }
 0x12b   :  { %v713_v6 = vmax.f32 %v569_v2, 0.0  ;;  %v840_v9 = vmul.f32 %v776_v3, %v712_v0  ;;  %v790_v2 = vld [vmem:[%s6577_s3 + $0x190] sm:$0xff] }
 0x12c   :  { %v843_v8 = vmul.f32 %v779_v1, %v715_v4  ;;  %v791_v4 = vld [vmem:[%s6577_s3 + $0x198] sm:$0xff] }
 0x12d   :  { %v841_v10 = vmul.f32 %v777_v5, %v713_v6  ;;  %v4385_v11 = vpop.f32.mrb[40].mxu0  ;;  %v788_v6 = vld [vmem:[%s6577_s3 + $0x180] sm:$0xff] }
 0x12e   :  { %v887_v12 = vpack.c.bf16 %v843_v8, %v842_v7  ;;  %v590_v13 = vadd.f32 %v4385_v11, %v5237_v45  ;;  %v581_v14 = vpop.f32.mrb[41].mxu0  ;;  %v789_v8 = vld [vmem:[%s6577_s3 + $0x188] sm:$0xff] }
 0x12f   :  { %v886_v15 = vpack.c.bf16 %v841_v10, %v840_v9  ;;  %v582_v16 = vadd.f32 %v5237_v45, %v581_v14  ;;  %v4386_v17 = vpop.f32.mrb[42].mxu0 }
 0x130   :  { %v718_v18 = vmax.f32 %v590_v13, 0.0  ;;  %v593_v19 = vadd.f32 %v4386_v17, %v5237_v45  ;;  %v584_v20 = vpop.f32.mrb[43].mxu0 }
 0x131   :  { %v716_v22 = vmax.f32 %v582_v16, 0.0  ;;  %v585_v24 = vadd.f32 %v5237_v45, %v584_v20  ;;  %4455 = vmatprep.mubr.msk.bf16.mxu1 %vm954_vm3, %v886_v15 }
 0x132   :  { %v719_v26 = vmax.f32 %v593_v19, 0.0  ;;  %4456 = vmatmul.mubr.msk.bf16.gmra.mrb[36].mxu1 %vm954_vm3, %v887_v12  ;;  %v846_v29 = vmul.f32 %v782_v21, %v718_v18 }
 0x133   :  { %v717_v28 = vmax.f32 %v585_v24, 0.0  ;;  %v844_v31 = vmul.f32 %v780_v25, %v716_v22  ;;  %v794_v24 = vld [vmem:[%s6577_s3 + $0x1b0] sm:$0xff] }
 0x134   :  { %v847_v30 = vmul.f32 %v783_v23, %v719_v26  ;;  %v795_v26 = vld [vmem:[%s6577_s3 + $0x1b8] sm:$0xff] }
 0x135   :  { %v845_v32 = vmul.f32 %v781_v27, %v717_v28  ;;  %v4389_v33 = vpop.f32.mrb[44].mxu0  ;;  %v792_v28 = vld [vmem:[%s6577_s3 + $0x1a0] sm:$0xff] }
 0x136   :  { %v889_v34 = vpack.c.bf16 %v847_v30, %v846_v29  ;;  %v606_v35 = vadd.f32 %v4389_v33, %v5237_v45  ;;  %v597_v36 = vpop.f32.mrb[45].mxu0  ;;  %v793_v30 = vld [vmem:[%s6577_s3 + $0x1a8] sm:$0xff] }
 0x137   :  { %v888_v37 = vpack.c.bf16 %v845_v32, %v844_v31  ;;  %v598_v38 = vadd.f32 %v5237_v45, %v597_v36  ;;  %v4390_v39 = vpop.f32.mrb[46].mxu0 }
 0x138   :  { %v722_v40 = vmax.f32 %v606_v35, 0.0  ;;  %v609_v41 = vadd.f32 %v4390_v39, %v5237_v45  ;;  %v600_v42 = vpop.f32.mrb[47].mxu0 }
 0x139   :  { %v720_v44 = vmax.f32 %v598_v38, 0.0  ;;  %v601_v47 = vadd.f32 %v5237_v45, %v600_v42  ;;  %4459 = vmatprep.mubr.msk.bf16.mxu1 %vm954_vm3, %v888_v37 }
 0x13a   :  { %v723_v49 = vmax.f32 %v609_v41, 0.0  ;;  %4460 = vmatmul.mubr.msk.bf16.gmra.mrb[40].mxu1 %vm954_vm3, %v889_v34  ;;  %v850_v52 = vmul.f32 %v786_v43, %v722_v40 }
 0x13b   :  { %v721_v51 = vmax.f32 %v601_v47, 0.0  ;;  %v848_v54 = vmul.f32 %v784_v48, %v720_v44  ;;  %v798_v47 = vld [vmem:[%s6577_s3 + $0x1d0] sm:$0xff] }
 0x13c   :  { %v851_v53 = vmul.f32 %v787_v46, %v723_v49  ;;  %v799_v49 = vld [vmem:[%s6577_s3 + $0x1d8] sm:$0xff] }
 0x13d   :  { %v849_v55 = vmul.f32 %v785_v50, %v721_v51  ;;  %v4393_v56 = vpop.f32.mrb[48].mxu0  ;;  %v796_v51 = vld [vmem:[%s6577_s3 + $0x1c0] sm:$0xff] }
 0x13e   :  { %v891_v57 = vpack.c.bf16 %v851_v53, %v850_v52  ;;  %v622_v58 = vadd.f32 %v4393_v56, %v5237_v45  ;;  %v613_v59 = vpop.f32.mrb[49].mxu0  ;;  %v797_v53 = vld [vmem:[%s6577_s3 + $0x1c8] sm:$0xff] }
 0x13f   :  { %v890_v60 = vpack.c.bf16 %v849_v55, %v848_v54  ;;  %v614_v61 = vadd.f32 %v5237_v45, %v613_v59  ;;  %v4394_v62 = vpop.f32.mrb[50].mxu0 }
 0x140   :  { %v726_v63 = vmax.f32 %v622_v58, 0.0  ;;  %v625_v0 = vadd.f32 %v4394_v62, %v5237_v45  ;;  %v616_v1 = vpop.f32.mrb[51].mxu0 }
 0x141   :  { %v724_v3 = vmax.f32 %v614_v61, 0.0  ;;  %v617_v5 = vadd.f32 %v5237_v45, %v616_v1  ;;  %4463 = vmatprep.mubr.msk.bf16.mxu1 %vm954_vm3, %v890_v60 }
 0x142   :  { %v727_v7 = vmax.f32 %v625_v0, 0.0  ;;  %4464 = vmatmul.mubr.msk.bf16.gmra.mrb[44].mxu1 %vm954_vm3, %v891_v57  ;;  %v854_v10 = vmul.f32 %v790_v2, %v726_v63 }
 0x143   :  { %v725_v9 = vmax.f32 %v617_v5, 0.0  ;;  %v852_v12 = vmul.f32 %v788_v6, %v724_v3  ;;  %v802_v5 = vld [vmem:[%s6577_s3 + $0x1f0] sm:$0xff] }
 0x144   :  { %v855_v11 = vmul.f32 %v791_v4, %v727_v7  ;;  %v803_v7 = vld [vmem:[%s6577_s3 + $0x1f8] sm:$0xff] }
 0x145   :  { %v853_v13 = vmul.f32 %v789_v8, %v725_v9  ;;  %v4397_v14 = vpop.f32.mrb[52].mxu0  ;;  %v800_v9 = vld [vmem:[%s6577_s3 + $0x1e0] sm:$0xff] }
 0x146   :  { %v893_v15 = vpack.c.bf16 %v855_v11, %v854_v10  ;;  %v638_v16 = vadd.f32 %v4397_v14, %v5237_v45  ;;  %v629_v17 = vpop.f32.mrb[53].mxu0  ;;  %v801_v11 = vld [vmem:[%s6577_s3 + $0x1e8] sm:$0xff] }
 0x147   :  { %v892_v18 = vpack.c.bf16 %v853_v13, %v852_v12  ;;  %v630_v19 = vadd.f32 %v5237_v45, %v629_v17  ;;  %v4398_v20 = vpop.f32.mrb[54].mxu0 }
 0x148   :  { %v730_v21 = vmax.f32 %v638_v16, 0.0  ;;  %v641_v22 = vadd.f32 %v4398_v20, %v5237_v45  ;;  %v632_v23 = vpop.f32.mrb[55].mxu0  ;;  %v4712_v20 = vld [vmem:[%s6580_s6 + $0x10] ss:$8 sps:$4 sm:$0xff]  }
 0x149   :  { %v728_v25 = vmax.f32 %v630_v19, 0.0  ;;  %v633_v27 = vadd.f32 %v5237_v45, %v632_v23  ;;  %4467 = vmatprep.mubr.msk.bf16.mxu1 %vm954_vm3, %v892_v18  ;;  %v4709_v18 = vld [vmem:[%s6580_s6] ss:$8 sps:$4 sm:$0xff]   ;;  %v4711_v19 = vld [vmem:[%s6580_s6 + $0x4] ss:$8 sps:$4 sm:$0xff]  }
 0x14a   :  { %v731_v29 = vmax.f32 %v641_v22, 0.0  ;;  %4468 = vmatmul.mubr.msk.bf16.gmra.mrb[48].mxu1 %vm954_vm3, %v893_v15  ;;  %v858_v32 = vmul.f32 %v794_v24, %v730_v21  ;;  %1987 = vmatprep.subr.bf16.mxu0 %v4711_v19  ;;  %v4714_v21 = vld [vmem:[%s6580_s6 + $0x14] ss:$8 sps:$4 sm:$0xff]   ;;  %v4715_v22 = vld [vmem:[%s6580_s6 + $0x20] ss:$8 sps:$4 sm:$0xff]  }
 0x14b   :  { %v729_v31 = vmax.f32 %v633_v27, 0.0  ;;  %v856_v34 = vmul.f32 %v792_v28, %v728_v25  ;;  %1988 = vmatpush1.bf16.msra.mxu0 %v4709_v18  ;;  %v4717_v23 = vld [vmem:[%s6580_s6 + $0x24] ss:$8 sps:$4 sm:$0xff]   ;;  %v4718_v25 = vld [vmem:[%s6580_s6 + $0x30] ss:$8 sps:$4 sm:$0xff]  }
 0x14c   :  { %v859_v33 = vmul.f32 %v795_v26, %v731_v29  ;;  %1989 = vmatprep.subr.bf16.mxu0 %v4714_v21  ;;  %v4720_v26 = vld [vmem:[%s6580_s6 + $0x34] ss:$8 sps:$4 sm:$0xff]  }
 0x14d   :  { %v857_v35 = vmul.f32 %v793_v30, %v729_v31  ;;  %v4401_v36 = vpop.f32.mrb[56].mxu0  ;;  %v4721_v30 = vld [vmem:[%s6580_s6 + $0x40] ss:$8 sps:$4 sm:$0xff]   ;;  %v4723_v31 = vld [vmem:[%s6580_s6 + $0x44] ss:$8 sps:$4 sm:$0xff]  }
 0x14e   :  { %v895_v37 = vpack.c.bf16 %v859_v33, %v858_v32  ;;  %v654_v38 = vadd.f32 %v4401_v36, %v5237_v45  ;;  %v645_v39 = vpop.f32.mrb[57].mxu0  ;;  %v5568_v32 = vld [vmem:[%s6579_s5] ss:$0 sm:$0xff] }
 0x14f   :  { %v894_v40 = vpack.c.bf16 %v857_v35, %v856_v34  ;;  %v646_v41 = vadd.f32 %v5237_v45, %v645_v39  ;;  %v4402_v42 = vpop.f32.mrb[58].mxu0  ;;  %1990 = vmatpush1.bf16.msra.mxu0 %v4712_v20 }
 0x150   :  { %v734_v43 = vmax.f32 %v654_v38, 0.0  ;;  %v657_v44 = vadd.f32 %v4402_v42, %v5237_v45  ;;  %v648_v46 = vpop.f32.mrb[59].mxu0  ;;  %1991 = vmatprep.subr.bf16.mxu0 %v4717_v23 }
 0x151   :  { %v732_v48 = vmax.f32 %v646_v41, 0.0  ;;  %v649_v50 = vadd.f32 %v5237_v45, %v648_v46  ;;  %4471 = vmatprep.mubr.msk.bf16.mxu1 %vm954_vm3, %v894_v40 }
 0x152   :  { %v735_v52 = vmax.f32 %v657_v44, 0.0  ;;  %4472 = vmatmul.mubr.msk.bf16.gmra.mrb[52].mxu1 %vm954_vm3, %v895_v37  ;;  %v862_v55 = vmul.f32 %v798_v47, %v734_v43  ;;  %v4724_v47 = vld [vmem:[%s6580_s6 + $0x50] ss:$8 sps:$4 sm:$0xff]  }
 0x153   :  { %v733_v54 = vmax.f32 %v649_v50, 0.0  ;;  %v860_v57 = vmul.f32 %v796_v51, %v732_v48  ;;  %1992 = vmatpush1.bf16.msra.mxu0 %v4715_v22  ;;  %v4726_v48 = vld [vmem:[%s6580_s6 + $0x54] ss:$8 sps:$4 sm:$0xff]  }
 0x154   :  { %v863_v56 = vmul.f32 %v799_v49, %v735_v52  ;;  %1993 = vmatprep.subr.bf16.mxu0 %v4720_v26 }
 0x155   :  { %v861_v58 = vmul.f32 %v797_v53, %v733_v54  ;;  %v4405_v59 = vpop.f32.mrb[60].mxu0 }
 0x156   :  { %v897_v60 = vpack.c.bf16 %v863_v56, %v862_v55  ;;  %v670_v61 = vadd.f32 %v4405_v59, %v5237_v45  ;;  %v661_v62 = vpop.f32.mrb[61].mxu0 }
 0x157   :  { %v896_v63 = vpack.c.bf16 %v861_v58, %v860_v57  ;;  %v662_v0 = vadd.f32 %v5237_v45, %v661_v62  ;;  %v4406_v1 = vpop.f32.mrb[62].mxu0  ;;  %1994 = vmatpush1.bf16.msra.mxu0 %v4718_v25 }
 0x158   :  { %v738_v2 = vmax.f32 %v670_v61, 0.0  ;;  %v673_v3 = vadd.f32 %v4406_v1, %v5237_v45  ;;  %v664_v4 = vpop.f32.mrb[63].mxu0  ;;  %1995 = vmatprep.subr.bf16.mxu0 %v4723_v31 }
 0x159   :  { %v736_v6 = vmax.f32 %v662_v0, 0.0  ;;  %v665_v8 = vadd.f32 %v5237_v45, %v664_v4  ;;  %4475 = vmatprep.mubr.msk.bf16.mxu1 %vm954_vm3, %v896_v63  ;;  %v4727_v63 = vld [vmem:[%s6580_s6 + $0x60] ss:$8 sps:$4 sm:$0xff]   ;;  %v4729_v0 = vld [vmem:[%s6580_s6 + $0x64] ss:$8 sps:$4 sm:$0xff]  }
 0x15a   :  { %v739_v10 = vmax.f32 %v673_v3, 0.0  ;;  %4476 = vmatmul.mubr.msk.bf16.gmra.mrb[56].mxu1 %vm954_vm3, %v897_v60  ;;  %v866_v13 = vmul.f32 %v802_v5, %v738_v2 }
 0x15b   :  { %v737_v12 = vmax.f32 %v665_v8, 0.0  ;;  %v864_v15 = vmul.f32 %v800_v9, %v736_v6  ;;  %1996 = vmatpush1.bf16.msra.mxu0 %v4721_v30 }
 0x15c   :  { %v867_v14 = vmul.f32 %v803_v7, %v739_v10  ;;  %1997 = vmatprep.subr.bf16.mxu0 %v4726_v48 }
 0x15d   :  { %v865_v16 = vmul.f32 %v801_v11, %v737_v12 }
 0x15e   :  { %v899_v17 = vpack.c.bf16 %v867_v14, %v866_v13 }
 0x15f   :  { %v898_v45 = vpack.c.bf16 %v865_v16, %v864_v15  ;;  %1998 = vmatpush1.bf16.msra.mxu0 %v4724_v47  ;;  %v4730_v15 = vld [vmem:[%s6580_s6 + $0x70] ss:$8 sps:$4 sm:$0xff]   ;;  %v4732_v16 = vld [vmem:[%s6580_s6 + $0x74] ss:$8 sps:$4 sm:$0xff]  }
 0x160   :  { %1999 = vmatprep.subr.bf16.mxu0 %v4729_v0 }
 0x161   :  { %4479 = vmatprep.mubr.msk.bf16.mxu1 %vm954_vm3, %v898_v45 }
 0x162   :  { %4480 = vmatmul.mubr.msk.bf16.gmra.mrb[60].mxu1 %vm954_vm3, %v899_v17  ;;  %vm1980_vm3 = vcmask 523264  }
 0x163   :  { %2000 = vmatpush1.bf16.msra.mxu0 %v4727_v63 }
 0x164   :  { %2001 = vmatprep.subr.bf16.mxu0 %v4732_v16 }
 0x167   :  { %2002 = vmatpush1.bf16.msra.mxu0 %v4730_v15  ;;  %v4741_v15 = vld [vmem:[%s6580_s6 + $0xa4] ss:$8 sps:$4 sm:$0xff]  }
 0x1bd   :  { %v5545_v24 = vpop.f32.mrb[0].mxu1 }
 0x1be   :  { %v5553_v27 = vpop.f32.mrb[1].mxu1 }
 0x1bf   :  { %v5555_v28 = vpop.f32.mrb[2].mxu1 }
 0x1c0   :  { %v5557_v29 = vpop.f32.mrb[3].mxu1 }
 0x1c5   :  { %v4425_v33 = vpop.f32.mrb[4].mxu1 }
 0x1c6   :  { %v1113_v34 = vadd.f32 %v4425_v33, %v5568_v32  ;;  %v1104_v35 = vpop.f32.mrb[5].mxu1 }
 0x1c7   :  { %v1105_v36 = vadd.f32 %v5568_v32, %v1104_v35  ;;  %v4426_v37 = vpop.f32.mrb[6].mxu1  ;;  %v4733_v35 = vld [vmem:[%s6580_s6 + $0x80] ss:$8 sps:$4 sm:$0xff]  }
 0x1c8   :  { %v1116_v38 = vadd.f32 %v4426_v37, %v5568_v32  ;;  %v1107_v39 = vpop.f32.mrb[7].mxu1  ;;  %v1349_v41 = vmax.f32 %v1113_v34, 0.0 }
 0x1c9   :  { %v1108_v40 = vadd.f32 %v5568_v32, %v1107_v39  ;;  %v1347_v43 = vmax.f32 %v1105_v36, 0.0  ;;  %v4735_v36 = vld [vmem:[%s6580_s6 + $0x84] ss:$8 sps:$4 sm:$0xff]  }
 0x1ca   :  { %v1350_v42 = vmax.f32 %v1116_v38, 0.0  ;;  %2003 = vmatprep.subr.bf16.mxu0 %v4735_v36  ;;  %v4744_v36 = vld [vmem:[%s6580_s6 + $0xb4] ss:$8 sps:$4 sm:$0xff]  }
 0x1cb   :  { %v1348_v44 = vmax.f32 %v1108_v40, 0.0  ;;  %2004 = vmatpush1.bf16.msra.mxu0 %v4733_v35  ;;  %v4742_v35 = vld [vmem:[%s6580_s6 + $0xb0] ss:$8 sps:$4 sm:$0xff]  }
 0x1cc   :  { %v4519_v46 = vpack.i.bf16 %v1350_v42, %v1349_v41 }
 0x1cd   :  { %v4429_v49 = vpop.f32.mrb[8].mxu1  ;;  %v4524_v50 = vpack.i.bf16 %v1348_v44, %v1347_v43 }
 0x1ce   :  { %v1129_v51 = vadd.f32 %v4429_v49, %v5568_v32  ;;  %4520 = vrot.lane.b32.xlu0 %v4519_v46, %s5006_s16  ;;  %v1120_v52 = vpop.f32.mrb[9].mxu1 }
 0x1cf   :  { %v1121_v53 = vadd.f32 %v5568_v32, %v1120_v52  ;;  %v4430_v54 = vpop.f32.mrb[10].mxu1  ;;  %4525 = vrot.lane.b32.xlu1 %v4524_v50, %s5006_s16  ;;  %s5012_s16 = smov 12  }
 0x1d0   :  { %v1132_v55 = vadd.f32 %v4430_v54, %v5568_v32  ;;  %v1123_v56 = vpop.f32.mrb[11].mxu1  ;;  %v1353_v58 = vmax.f32 %v1129_v51, 0.0 }
 0x1d1   :  { %v1124_v57 = vadd.f32 %v5568_v32, %v1123_v56  ;;  %v1351_v60 = vmax.f32 %v1121_v53, 0.0 }
 0x1d2   :  { %v1354_v59 = vmax.f32 %v1132_v55, 0.0 }
 0x1d3   :  { %v1352_v61 = vmax.f32 %v1124_v57, 0.0 }
 0x1d4   :  { %v5584_v62 = vpack.i.bf16 %v1354_v59, %v1353_v58 }
 0x1d5   :  { %v4529_v1 = vpack.i.bf16 %v1352_v61, %v1351_v60  ;;  %v4433_v2 = vpop.f32.mrb[12].mxu1  ;;  %v4736_v60 = vld [vmem:[%s6580_s6 + $0x90] ss:$8 sps:$4 sm:$0xff]   ;;  %v4738_v61 = vld [vmem:[%s6580_s6 + $0x94] ss:$8 sps:$4 sm:$0xff]  }
 0x1d6   :  { %v1145_v3 = vadd.f32 %v4433_v2, %v5568_v32  ;;  %v1136_v4 = vpop.f32.mrb[13].mxu1  ;;  %2005 = vmatprep.subr.bf16.mxu0 %v4738_v61 }
 0x1d7   :  { %v1137_v5 = vadd.f32 %v5568_v32, %v1136_v4  ;;  %v4434_v6 = vpop.f32.mrb[14].mxu1  ;;  %4530 = vrot.lane.b32.xlu0 %v4529_v1, %s5007_s20  ;;  %2006 = vmatpush1.bf16.msra.mxu0 %v4736_v60 }
 0x1d8   :  { %v1148_v7 = vadd.f32 %v4434_v6, %v5568_v32  ;;  %v1139_v8 = vpop.f32.mrb[15].mxu1  ;;  %v1357_v10 = vmax.f32 %v1145_v3, 0.0  ;;  %2007 = vmatprep.subr.bf16.mxu0 %v4741_v15 }
 0x1d9   :  { %v1140_v9 = vadd.f32 %v5568_v32, %v1139_v8  ;;  %v1355_v12 = vmax.f32 %v1137_v5, 0.0 }
 0x1da   :  { %v1358_v11 = vmax.f32 %v1148_v7, 0.0 }
 0x1db   :  { %v1356_v13 = vmax.f32 %v1140_v9, 0.0 }
 0x1dc   :  { %v5597_v14 = vpack.i.bf16 %v1358_v11, %v1357_v10 }
 0x1dd   :  { %v4534_v17 = vpack.i.bf16 %v1356_v13, %v1355_v12  ;;  %v4437_v45 = vpop.f32.mrb[16].mxu1  ;;  %v4739_v13 = vld [vmem:[%s6580_s6 + $0xa0] ss:$8 sps:$4 sm:$0xff]  }
 0x1de   :  { %v1161_v18 = vadd.f32 %v4437_v45, %v5568_v32  ;;  %v1152_v19 = vpop.f32.mrb[17].mxu1  ;;  %2008 = vmatpush1.bf16.msra.mxu0 %v4739_v13 }
 0x1df   :  { %v1153_v20 = vadd.f32 %v5568_v32, %v1152_v19  ;;  %v4438_v21 = vpop.f32.mrb[18].mxu1  ;;  %4535 = vrot.lane.b32.xlu0 %v4534_v17, %s5008_s23  ;;  %2009 = vmatprep.subr.bf16.mxu0 %v4744_v36 }
 0x1e0   :  { %v1164_v22 = vadd.f32 %v4438_v21, %v5568_v32  ;;  %v1155_v23 = vpop.f32.mrb[19].mxu1  ;;  %v1361_v26 = vmax.f32 %v1161_v18, 0.0 }
 0x1e1   :  { %v1156_v25 = vadd.f32 %v5568_v32, %v1155_v23  ;;  %v1359_v31 = vmax.f32 %v1153_v20, 0.0 }
 0x1e2   :  { %v1362_v30 = vmax.f32 %v1164_v22, 0.0  ;;  %2010 = vmatpush1.bf16.msra.mxu0 %v4742_v35 }
 0x1e3   :  { %v1360_v33 = vmax.f32 %v1156_v25, 0.0 }
 0x1e4   :  { %v5610_v34 = vpack.i.bf16 %v1362_v30, %v1361_v26 }
 0x1e5   :  { %v4539_v37 = vpack.i.bf16 %v1360_v33, %v1359_v31  ;;  %v4441_v38 = vpop.f32.mrb[20].mxu1 }
 0x1e6   :  { %v1177_v39 = vadd.f32 %v4441_v38, %v5568_v32  ;;  %v1168_v40 = vpop.f32.mrb[21].mxu1 }
 0x1e7   :  { %v1169_v41 = vadd.f32 %v5568_v32, %v1168_v40  ;;  %v4442_v42 = vpop.f32.mrb[22].mxu1  ;;  %4540 = vrot.lane.b32.xlu0 %v4539_v37, %s5009_s28 }
 0x1e8   :  { %v1180_v43 = vadd.f32 %v4442_v42, %v5568_v32  ;;  %v1171_v44 = vpop.f32.mrb[23].mxu1  ;;  %v1365_v47 = vmax.f32 %v1177_v39, 0.0 }
 0x1e9   :  { %v1172_v46 = vadd.f32 %v5568_v32, %v1171_v44  ;;  %v1363_v49 = vmax.f32 %v1169_v41, 0.0 }
 0x1ea   :  { %v1366_v48 = vmax.f32 %v1180_v43, 0.0 }
 0x1eb   :  { %v1364_v50 = vmax.f32 %v1172_v46, 0.0 }
 0x1ec   :  { %v5623_v51 = vpack.i.bf16 %v1366_v48, %v1365_v47 }
 0x1ed   :  { %v4544_v52 = vpack.i.bf16 %v1364_v50, %v1363_v49  ;;  %v4445_v53 = vpop.f32.mrb[24].mxu1  ;;  %v4747_v50 = vld [vmem:[%s6580_s6 + $0xc4] ss:$8 sps:$4 sm:$0xff]  }
 0x1ee   :  { %v1193_v54 = vadd.f32 %v4445_v53, %v5568_v32  ;;  %v1184_v55 = vpop.f32.mrb[25].mxu1  ;;  %2011 = vmatprep.subr.bf16.mxu0 %v4747_v50 }
 0x1ef   :  { %v1185_v56 = vadd.f32 %v5568_v32, %v1184_v55  ;;  %v4446_v57 = vpop.f32.mrb[26].mxu1  ;;  %4545 = vrot.lane.b32.xlu0 %v4544_v52, %s5010_s29 }
 0x1f0   :  { %v1196_v58 = vadd.f32 %v4446_v57, %v5568_v32  ;;  %v1187_v59 = vpop.f32.mrb[27].mxu1  ;;  %v1369_v0 = vmax.f32 %v1193_v54, 0.0 }
 0x1f1   :  { %v1188_v63 = vadd.f32 %v5568_v32, %v1187_v59  ;;  %v1367_v2 = vmax.f32 %v1185_v56, 0.0 }
 0x1f2   :  { %v1370_v1 = vmax.f32 %v1196_v58, 0.0 }
 0x1f3   :  { %v1368_v3 = vmax.f32 %v1188_v63, 0.0 }
 0x1f4   :  { %v4549_v4 = vpack.i.bf16 %v1370_v1, %v1369_v0 }
 0x1f5   :  { %v4554_v5 = vpack.i.bf16 %v1368_v3, %v1367_v2  ;;  %v4449_v6 = vpop.f32.mrb[28].mxu1  ;;  %v4748_v2 = vld [vmem:[%s6580_s6 + $0xd0] ss:$8 sps:$4 sm:$0xff]  }
 0x1f6   :  { %v1209_v7 = vadd.f32 %v4449_v6, %v5568_v32  ;;  %v1200_v8 = vpop.f32.mrb[29].mxu1  ;;  %4550 = vrot.lane.b32.xlu0 %v4549_v4, %s5011_s2 }
 0x1f7   :  { %v1201_v9 = vadd.f32 %v5568_v32, %v1200_v8  ;;  %v4450_v10 = vpop.f32.mrb[30].mxu1  ;;  %v4753_v8 = vld [vmem:[%s6580_s6 + $0xe4] ss:$8 sps:$4 sm:$0xff]  }
 0x1f8   :  { %v1212_v11 = vadd.f32 %v4450_v10, %v5568_v32  ;;  %v1203_v12 = vpop.f32.mrb[31].mxu1  ;;  %v1373_v17 = vmax.f32 %v1209_v7, 0.0 }
 0x1f9   :  { %v1204_v16 = vadd.f32 %v5568_v32, %v1203_v12  ;;  %v1371_v18 = vmax.f32 %v1201_v9, 0.0 }
 0x1fa   :  { %v1374_v45 = vmax.f32 %v1212_v11, 0.0  ;;  %4555 = vrot.lane.b32.xlu0 %v4554_v5, %s5011_s2 }
 0x1fb   :  { %v1372_v19 = vmax.f32 %v1204_v16, 0.0 }
 0x1fc   :  { %v4559_v20 = vpack.i.bf16 %v1374_v45, %v1373_v17 }
 0x1fd   :  { %v4564_v21 = vpack.i.bf16 %v1372_v19, %v1371_v18  ;;  %v4453_v22 = vpop.f32.mrb[32].mxu1 }
 0x1fe   :  { %v1225_v23 = vadd.f32 %v4453_v22, %v5568_v32  ;;  %v1216_v25 = vpop.f32.mrb[33].mxu1  ;;  %4560 = vrot.lane.b32.xlu1 %v4559_v20, %s5012_s16 }
 0x1ff   :  { %v1217_v26 = vadd.f32 %v5568_v32, %v1216_v25  ;;  %v4454_v30 = vpop.f32.mrb[34].mxu1  ;;  %4565 = vrot.lane.b32.xlu0 %v4564_v21, %s5012_s16  ;;  %v4756_v25 = vld [vmem:[%s6580_s6 + $0xf4] ss:$8 sps:$4 sm:$0xff]  }
 0x200   :  { %v1228_v31 = vadd.f32 %v4454_v30, %v5568_v32  ;;  %v1219_v33 = vpop.f32.mrb[35].mxu1  ;;  %v1377_v38 = vmax.f32 %v1225_v23, 0.0  ;;  %v4754_v23 = vld [vmem:[%s6580_s6 + $0xf0] ss:$8 sps:$4 sm:$0xff]  }
 0x201   :  { %v1220_v37 = vadd.f32 %v5568_v32, %v1219_v33  ;;  %v1375_v40 = vmax.f32 %v1217_v26, 0.0 }
 0x202   :  { %v1378_v39 = vmax.f32 %v1228_v31, 0.0 }
 0x203   :  { %v1376_v41 = vmax.f32 %v1220_v37, 0.0  ;;  %4570 = vrot.lane.b32.xlu0 %v5584_v62, %s5007_s20  ;;  %v4745_v62 = vld [vmem:[%s6580_s6 + $0xc0] ss:$8 sps:$4 sm:$0xff]  }
 0x204   :  { %v4584_v42 = vpack.i.bf16 %v1378_v39, %v1377_v38  ;;  %2012 = vmatpush1.bf16.msra.mxu0 %v4745_v62 }
 0x205   :  { %v4589_v43 = vpack.i.bf16 %v1376_v41, %v1375_v40  ;;  %v4457_v44 = vpop.f32.mrb[36].mxu1 }
 0x206   :  { %v1241_v46 = vadd.f32 %v4457_v44, %v5568_v32  ;;  %v1232_v47 = vpop.f32.mrb[37].mxu1  ;;  %4585 = vrot.lane.b32.xlu1 %v4584_v42, %s5013_s1 }
 0x207   :  { %v1233_v48 = vadd.f32 %v5568_v32, %v1232_v47  ;;  %v4458_v49 = vpop.f32.mrb[38].mxu1  ;;  %4575 = vrot.lane.b32.xlu0 %v5597_v14, %s5008_s23  ;;  %s5014_s23 = smov 52  }
 0x208   :  { %v1244_v52 = vadd.f32 %v4458_v49, %v5568_v32  ;;  %v1235_v53 = vpop.f32.mrb[39].mxu1  ;;  %v1381_v55 = vmax.f32 %v1241_v46, 0.0  ;;  %v4759_v49 = vld [vmem:[%s6580_s6 + $0x104] ss:$8 sps:$4 sm:$0xff]  }
 0x209   :  { %v1236_v54 = vadd.f32 %v5568_v32, %v1235_v53  ;;  %v1379_v14 = vmax.f32 %v1233_v48, 0.0 }
 0x20a   :  { %v1382_v56 = vmax.f32 %v1244_v52, 0.0  ;;  %4590 = vrot.lane.b32.xlu1 %v4589_v43, %s5013_s1 }
 0x20b   :  { %v1380_v57 = vmax.f32 %v1236_v54, 0.0  ;;  %4580 = vrot.lane.b32.xlu0 %v5610_v34, %s5009_s28  ;;  %v4750_v34 = vld [vmem:[%s6580_s6 + $0xd4] ss:$8 sps:$4 sm:$0xff]  }
 0x20c   :  { %v4594_v58 = vpack.i.bf16 %v1382_v56, %v1381_v55  ;;  %2013 = vmatprep.subr.bf16.mxu0 %v4750_v34 }
 0x20d   :  { %v4599_v59 = vpack.i.bf16 %v1380_v57, %v1379_v14  ;;  %v4461_v60 = vpop.f32.mrb[40].mxu1  ;;  %2014 = vmatpush1.bf16.msra.mxu0 %v4748_v2 }
 0x20e   :  { %v1257_v61 = vadd.f32 %v4461_v60, %v5568_v32  ;;  %v1248_v63 = vpop.f32.mrb[41].mxu1  ;;  %4595 = vrot.lane.b32.xlu1 %v4594_v58, %s5014_s23  ;;  %2015 = vmatprep.subr.bf16.mxu0 %v4753_v8 }
 0x20f   :  { %v1249_v0 = vadd.f32 %v5568_v32, %v1248_v63  ;;  %v4462_v1 = vpop.f32.mrb[42].mxu1  ;;  %4630 = vrot.lane.b32.xlu0 %v5623_v51, %s5010_s29  ;;  %v4751_v51 = vld [vmem:[%s6580_s6 + $0xe0] ss:$8 sps:$4 sm:$0xff]  }
 0x210   :  { %v1260_v3 = vadd.f32 %v4462_v1, %v5568_v32  ;;  %v1251_v4 = vpop.f32.mrb[43].mxu1  ;;  %v1385_v6 = vmax.f32 %v1257_v61, 0.0 }
 0x211   :  { %v1252_v5 = vadd.f32 %v5568_v32, %v1251_v4  ;;  %v1383_v9 = vmax.f32 %v1249_v0, 0.0  ;;  %2016 = vmatpush1.bf16.msra.mxu0 %v4751_v51 }
 0x212   :  { %v1386_v7 = vmax.f32 %v1260_v3, 0.0  ;;  %4600 = vrot.lane.b32.xlu1 %v4599_v59, %s5014_s23  ;;  %2017 = vmatprep.subr.bf16.mxu0 %v4756_v25 }
 0x213   :  { %v1384_v10 = vmax.f32 %v1252_v5, 0.0 }
 0x214   :  { %v4604_v11 = vpack.i.bf16 %v1386_v7, %v1385_v6 }
 0x215   :  { %v4609_v12 = vpack.i.bf16 %v1384_v10, %v1383_v9  ;;  %v4465_v13 = vpop.f32.mrb[44].mxu1  ;;  %2018 = vmatpush1.bf16.msra.mxu0 %v4754_v23 }
 0x216   :  { %v1273_v15 = vadd.f32 %v4465_v13, %v5568_v32  ;;  %v1264_v16 = vpop.f32.mrb[45].mxu1  ;;  %4605 = vrot.lane.b32.xlu1 %v4604_v11, %s5015_s11  ;;  %2040 = vmatprep.subr.bf16.mxu0 %v4759_v49 }
 0x217   :  { %v1265_v17 = vadd.f32 %v5568_v32, %v1264_v16  ;;  %v4466_v45 = vpop.f32.mrb[46].mxu1 }
 0x218   :  { %v1276_v18 = vadd.f32 %v4466_v45, %v5568_v32  ;;  %v1267_v19 = vpop.f32.mrb[47].mxu1  ;;  %v1389_v21 = vmax.f32 %v1273_v15, 0.0 }
 0x219   :  { %v1268_v20 = vadd.f32 %v5568_v32, %v1267_v19  ;;  %v1387_v26 = vmax.f32 %v1265_v17, 0.0  ;;  %v5019_v17 = vmov 0   ;;  %v1770_v19 = vlaneseq }
 0x21a   :  { %v1390_v22 = vmax.f32 %v1276_v18, 0.0  ;;  %4610 = vrot.lane.b32.xlu1 %v4609_v12, %s5015_s11  ;;  %2232 = vmatprep.mubr.bf16.mxu1 %v5019_v17 }
 0x21b   :  { %v1388_v30 = vmax.f32 %v1268_v20, 0.0  ;;  %v5728_v23 = vshrl.u32 %v1770_v19, 7 }
 0x21c   :  { %v4624_v31 = vpack.i.bf16 %v1390_v22, %v1389_v21 }
 0x21d   :  { %v4614_v33 = vpack.i.bf16 %v1388_v30, %v1387_v26  ;;  %v4469_v35 = vpop.f32.mrb[48].mxu1  ;;  %v5733_v30 = vld [vmem:[%s6581_s7] sm:$0x3] }
 0x21e   :  { %v1289_v36 = vadd.f32 %v4469_v35, %v5568_v32  ;;  %v1280_v37 = vpop.f32.mrb[49].mxu1  ;;  %v5736_v35 = vsub.s32 1, %v5728_v23 }
 0x21f   :  { %v1281_v38 = vadd.f32 %v5568_v32, %v1280_v37  ;;  %v4470_v39 = vpop.f32.mrb[50].mxu1  ;;  %4615 = vrot.lane.b32.xlu1 %v4614_v33, %s5016_s14 }
 0x220   :  { %v1292_v40 = vadd.f32 %v4470_v39, %v5568_v32  ;;  %v1283_v41 = vpop.f32.mrb[51].mxu1  ;;  %v1393_v43 = vmax.f32 %v1289_v36, 0.0 }
 0x221   :  { %v1284_v42 = vadd.f32 %v5568_v32, %v1283_v41  ;;  %v1391_v46 = vmax.f32 %v1281_v38, 0.0  ;;  %v5742_v38 = vrot.slane %v5733_v30, %v5736_v35 }
 0x222   :  { %v1394_v44 = vmax.f32 %v1292_v40, 0.0 }
 0x223   :  { %v1392_v47 = vmax.f32 %v1284_v42, 0.0 }
 0x224   :  { %v4634_v48 = vpack.i.bf16 %v1394_v44, %v1393_v43  ;;  %v1089_v43 = vadd.f32 %v5568_v32, %v5553_v27 }
 0x225   :  { %v4619_v62 = vpack.i.bf16 %v1392_v47, %v1391_v46  ;;  %v4473_v50 = vpop.f32.mrb[52].mxu1  ;;  %v1092_v46 = vadd.f32 %v5568_v32, %v5557_v29 }
 0x226   :  { %v1305_v52 = vadd.f32 %v4473_v50, %v5568_v32  ;;  %v1296_v53 = vpop.f32.mrb[53].mxu1 }
 0x227   :  { %v1297_v54 = vadd.f32 %v5568_v32, %v1296_v53  ;;  %v4474_v55 = vpop.f32.mrb[54].mxu1  ;;  %4620 = vrot.lane.b32.xlu1 %v4619_v62, %s5017_s17  ;;  %v1343_v62 = vmax.f32 %v1089_v43, 0.0  ;;  %v1344_v53 = vmax.f32 %v1092_v46, 0.0 }
 0x228   :  { %v1308_v56 = vadd.f32 %v4474_v55, %v5568_v32  ;;  %v1299_v14 = vpop.f32.mrb[55].mxu1  ;;  %v1397_v58 = vmax.f32 %v1305_v52, 0.0 }
 0x229   :  { %v1300_v57 = vadd.f32 %v5568_v32, %v1299_v14  ;;  %v1395_v60 = vmax.f32 %v1297_v54, 0.0 }
 0x22a   :  { %v1398_v59 = vmax.f32 %v1308_v56, 0.0 }
 0x22b   :  { %v1396_v61 = vmax.f32 %v1300_v57, 0.0  ;;  %4625 = vrot.lane.b32.xlu1 %v4624_v31, %s5016_s14 }
 0x22c   :  { %v5713_v63 = vpack.i.bf16 %v1398_v59, %v1397_v58 }
 0x22d   :  { %v4639_v0 = vpack.i.bf16 %v1396_v61, %v1395_v60  ;;  %v4477_v1 = vpop.f32.mrb[56].mxu1 }
 0x22e   :  { %v1321_v2 = vadd.f32 %v4477_v1, %v5568_v32  ;;  %v1312_v34 = vpop.f32.mrb[57].mxu1 }
 0x22f   :  { %v1313_v3 = vadd.f32 %v5568_v32, %v1312_v34  ;;  %v4478_v4 = vpop.f32.mrb[58].mxu1  ;;  %4640 = vrot.lane.b32.xlu0 %v4639_v0, %s5018_s18  ;;  %4635 = vrot.lane.b32.xlu1 %v4634_v48, %s5017_s17 }
 0x230   :  { %v1324_v5 = vadd.f32 %v4478_v4, %v5568_v32  ;;  %v1315_v6 = vpop.f32.mrb[59].mxu1  ;;  %v1401_v51 = vmax.f32 %v1321_v2, 0.0 }
 0x231   :  { %v1316_v7 = vadd.f32 %v5568_v32, %v1315_v6  ;;  %v1399_v9 = vmax.f32 %v1313_v3, 0.0 }
 0x232   :  { %v1402_v8 = vmax.f32 %v1324_v5, 0.0 }
 0x233   :  { %v1400_v10 = vmax.f32 %v1316_v7, 0.0 }
 0x234   :  { %v5720_v11 = vpack.i.bf16 %v1402_v8, %v1401_v51 }
 0x235   :  { %v4644_v12 = vpack.i.bf16 %v1400_v10, %v1399_v9  ;;  %v4481_v13 = vpop.f32.mrb[60].mxu1 }
 0x236   :  { %v1337_v15 = vadd.f32 %v4481_v13, %v5568_v32  ;;  %v1328_v16 = vpop.f32.mrb[61].mxu1 }
 0x237   :  { %v1329_v45 = vadd.f32 %v5568_v32, %v1328_v16  ;;  %v4482_v18 = vpop.f32.mrb[62].mxu1  ;;  %4645 = vrot.lane.b32.xlu1 %v4644_v12, %s5020_s19 }
 0x238   :  { %v1340_v20 = vadd.f32 %v4482_v18, %v5568_v32  ;;  %v1331_v21 = vpop.f32.mrb[63].mxu1  ;;  %v1405_v25 = vmax.f32 %v1337_v15, 0.0  ;;  %v1100_v18 = vadd.f32 %v5555_v28, %v5568_v32 }
 0x239   :  { %v1332_v22 = vadd.f32 %v5568_v32, %v1331_v21  ;;  %v1403_v31 = vmax.f32 %v1329_v45, 0.0  ;;  %v1097_v45 = vadd.f32 %v5545_v24, %v5568_v32 }
 0x23a   :  { %v1406_v26 = vmax.f32 %v1340_v20, 0.0 }
 0x23b   :  { %v1404_v33 = vmax.f32 %v1332_v22, 0.0 }
 0x23c   :  { %v5738_v36 = vpack.i.bf16 %v1406_v26, %v1405_v25 }
 0x23d   :  { %v4649_v37 = vpack.i.bf16 %v1404_v33, %v1403_v31  ;;  %v1345_v31 = vmax.f32 %v1097_v45, 0.0  ;;  %v1346_v33 = vmax.f32 %v1100_v18, 0.0 }
 0x23f   :  { %4650 = vrot.lane.b32.xlu0 %v4649_v37, %s5021_s21 }
 0x240   :  { %v5745_v39 = vpop.permute.xlu0 %4520 }
 0x241   :  { %v4526_v44 = vpop.permute.xlu1 %4525  ;;  %v4523_v19 = vunpack.i.h.bf16 %v5745_v39  ;;  %v4522_v20 = vunpack.i.l.bf16 %v5745_v39 }
 0x242   :  { %v4528_v48 = vunpack.i.h.bf16 %v4526_v44  ;;  %v4527_v49 = vunpack.i.l.bf16 %v4526_v44 }
 0x243   :  { %v1651_v43 = vsel %vm1647_vm4, %v1346_v33, %v4523_v19  ;;  %v1650_v24 = vsel %vm1647_vm4, %v1345_v31, %v4522_v20 }
 0x244   :  { %v1648_v57 = vsel %vm1647_vm4, %v1343_v62, %v4527_v49  ;;  %v1649_v29 = vsel %vm1647_vm4, %v1344_v53, %v4528_v48  ;;  %vm4046_vm4 = vcmask 254976  }
 0x249   :  { %v4531_v40 = vpop.permute.xlu0 %4530 }
 0x24a   :  { %v4533_v50 = vunpack.i.h.bf16 %v4531_v40  ;;  %v4532_v52 = vunpack.i.l.bf16 %v4531_v40 }
 0x24c   :  { %v1653_v60 = vsel %vm1652_vm5, %v1648_v57, %v4532_v52  ;;  %v1654_v61 = vsel %vm1652_vm5, %v1649_v29, %v4533_v50 }
 0x251   :  { %v4536_v41 = vpop.permute.xlu0 %4535 }
 0x252   :  { %v4538_v54 = vunpack.i.h.bf16 %v4536_v41  ;;  %v4537_v55 = vunpack.i.l.bf16 %v4536_v41 }
 0x254   :  { %v1658_v0 = vsel %vm1657_vm6, %v1653_v60, %v4537_v55  ;;  %v1659_v1 = vsel %vm1657_vm6, %v1654_v61, %v4538_v54 }
 0x259   :  { %v4541_v42 = vpop.permute.xlu0 %4540 }
 0x25a   :  { %v4543_v27 = vunpack.i.h.bf16 %v4541_v42  ;;  %v4542_v14 = vunpack.i.l.bf16 %v4541_v42 }
 0x25c   :  { %v1663_v34 = vsel %vm1662_vm7, %v1658_v0, %v4542_v14  ;;  %v1664_v3 = vsel %vm1662_vm7, %v1659_v1, %v4543_v27 }
 0x261   :  { %v4546_v47 = vpop.permute.xlu0 %4545 }
 0x262   :  { %v4548_v58 = vunpack.i.h.bf16 %v4546_v47  ;;  %v4547_v59 = vunpack.i.l.bf16 %v4546_v47 }
 0x264   :  { %v1668_v6 = vsel %vm1667_vm8, %v1663_v34, %v4547_v59  ;;  %v1669_v7 = vsel %vm1667_vm8, %v1664_v3, %v4548_v58 }
 0x268   :  { %v5751_v56 = vpop.permute.xlu0 %4550 }
 0x269   :  { %v4553_v62 = vunpack.i.h.bf16 %v5751_v56  ;;  %v4552_v50 = vunpack.i.l.bf16 %v5751_v56 }
 0x26c   :  { %v5759_v2 = vpop.permute.xlu0 %4555 }
 0x26d   :  { %v4558_v4 = vunpack.i.h.bf16 %v5759_v2  ;;  %v4557_v5 = vunpack.i.l.bf16 %v5759_v2 }
 0x26f   :  { %v5768_v51 = vsel %vm1672_vm9, %v1668_v6, %v4557_v5  ;;  %v5771_v8 = vsel %vm1672_vm9, %v1669_v7, %v4558_v4 }
 0x270   :  { %v1722_v9 = vpack.c.bf16 %v5771_v8, %v5768_v51  ;;  %v5775_v12 = vpop.permute.xlu1 %4560  ;;  %v4765_v8 = vld [vmem:[%s6580_s6 + $0x124] ss:$8 sps:$4 sm:$0xff]  }
 0x271   :  { %v4566_v10 = vpop.permute.xlu0 %4565  ;;  %v4562_v31 = vunpack.i.l.bf16 %v5775_v12 }
 0x272   :  { %v4568_v59 = vunpack.i.h.bf16 %v4566_v10  ;;  %v4567_v60 = vunpack.i.l.bf16 %v4566_v10 }
 0x274   :  { %v1678_v7 = vsel %vm1677_vm10, %v4557_v5, %v4567_v60 }
 0x275   :  { %v4571_v13 = vpop.permute.xlu0 %4570 }
 0x276   :  { %v4573_v22 = vunpack.i.h.bf16 %v4571_v13  ;;  %v4572_v25 = vunpack.i.l.bf16 %v4571_v13  ;;  %v1679_v13 = vsel %vm1677_vm10, %v4558_v4, %v4568_v59 }
 0x278   :  { %v5777_v15 = vpop.permute.xlu1 %4585  ;;  %v1656_v28 = vsel %vm1652_vm5, %v1651_v43, %v4573_v22  ;;  %v1655_v32 = vsel %vm1652_vm5, %v1650_v24, %v4572_v25 }
 0x279   :  { %v4576_v16 = vpop.permute.xlu0 %4575 }
 0x27a   :  { %v4578_v37 = vunpack.i.h.bf16 %v4576_v16  ;;  %v4577_v40 = vunpack.i.l.bf16 %v4576_v16 }
 0x27c   :  { %v4591_v21 = vpop.permute.xlu1 %4590  ;;  %v1660_v46 = vsel %vm1657_vm6, %v1655_v32, %v4577_v40  ;;  %v1661_v47 = vsel %vm1657_vm6, %v1656_v28, %v4578_v37  ;;  %v4588_v40 = vunpack.i.h.bf16 %v5777_v15 }
 0x27d   :  { %v4581_v26 = vpop.permute.xlu0 %4580  ;;  %v4593_v61 = vunpack.i.h.bf16 %v4591_v21  ;;  %v4592_v0 = vunpack.i.l.bf16 %v4591_v21 }
 0x27e   :  { %v4583_v41 = vunpack.i.h.bf16 %v4581_v26  ;;  %v4582_v42 = vunpack.i.l.bf16 %v4581_v26  ;;  %v4563_v26 = vunpack.i.h.bf16 %v5775_v12 }
 0x27f   :  { %v1684_v18 = vsel %vm1682_vm11, %v1679_v13, %v4593_v61  ;;  %v1683_v19 = vsel %vm1682_vm11, %v1678_v7, %v4592_v0 }
 0x280   :  { %v5787_v44 = vpop.permute.xlu1 %4595  ;;  %v1665_v52 = vsel %vm1662_vm7, %v1660_v46, %v4582_v42  ;;  %v1666_v53 = vsel %vm1662_vm7, %v1661_v47, %v4583_v41  ;;  %v4587_v41 = vunpack.i.l.bf16 %v5777_v15  ;;  %v4762_v47 = vld [vmem:[%s6580_s6 + $0x114] ss:$8 sps:$4 sm:$0xff]  }
 0x281   :  { %v4631_v39 = vpop.permute.xlu0 %4630  ;;  %v4598_v24 = vunpack.i.h.bf16 %v5787_v44  ;;  %v4597_v12 = vunpack.i.l.bf16 %v5787_v44 }
 0x282   :  { %v4633_v48 = vunpack.i.h.bf16 %v4631_v39  ;;  %v4632_v49 = vunpack.i.l.bf16 %v4631_v39  ;;  %v4757_v39 = vld [vmem:[%s6580_s6 + $0x100] ss:$8 sps:$4 sm:$0xff]  }
 0x284   :  { %v4601_v54 = vpop.permute.xlu1 %4600  ;;  %v1670_v55 = vsel %vm1667_vm8, %v1665_v52, %v4632_v49  ;;  %v1671_v27 = vsel %vm1667_vm8, %v1666_v53, %v4633_v48  ;;  %v1681_v48 = vsel %vm1677_vm10, %v4553_v62, %v4563_v26  ;;  %v1680_v49 = vsel %vm1677_vm10, %v4552_v50, %v4562_v31 }
 0x285   :  { %v5800_v14 = vsel %vm1672_vm9, %v1670_v55, %v4552_v50  ;;  %v5803_v57 = vsel %vm1672_vm9, %v1671_v27, %v4553_v62  ;;  %v4603_v2 = vunpack.i.h.bf16 %v4601_v54  ;;  %v4602_v34 = vunpack.i.l.bf16 %v4601_v54  ;;  %v4760_v62 = vld [vmem:[%s6580_s6 + $0x110] ss:$8 sps:$4 sm:$0xff]  }
 0x286   :  { %v1725_v29 = vpack.c.bf16 %v5803_v57, %v5800_v14  ;;  %v1685_v44 = vsel %vm1682_vm11, %v1680_v49, %v4587_v41  ;;  %v1686_v54 = vsel %vm1682_vm11, %v1681_v48, %v4588_v40  ;;  %v5930_v49 = vld [vmem:[%s6582_s8 + $0x4] ss:$8 sps:$4 sm:$0xff]  }
 0x287   :  { %v1688_v10 = vsel %vm1687_vm12, %v1683_v19, %v4602_v34  ;;  %v1689_v20 = vsel %vm1687_vm12, %v1684_v18, %v4603_v2  ;;  %v1690_v55 = vsel %vm1687_vm12, %v1685_v44, %v4597_v12  ;;  %v1691_v27 = vsel %vm1687_vm12, %v1686_v54, %v4598_v24  ;;  %v4763_v2 = vld [vmem:[%s6580_s6 + $0x120] ss:$8 sps:$4 sm:$0xff]   ;;  %v4768_v34 = vld [vmem:[%s6580_s6 + $0x134] ss:$8 sps:$4 sm:$0xff]   ;;  %2200 = vmatprep.subr.bf16.mxu1 %v5930_v49 }
 0x288   :  { %v4606_v58 = vpop.permute.xlu1 %4605 }
 0x289   :  { %v4608_v46 = vunpack.i.h.bf16 %v4606_v58  ;;  %v4607_v15 = vunpack.i.l.bf16 %v4606_v58 }
 0x28b   :  { %v1695_v50 = vsel %vm1692_vm14, %v1690_v55, %v4607_v15  ;;  %v5947_v55 = vld [vmem:[%s6582_s8 + $0x14] ss:$8 sps:$4 sm:$0xff]  }
 0x28c   :  { %v4611_v56 = vpop.permute.xlu1 %4610 }
 0x28d   :  { %v4613_v3 = vunpack.i.h.bf16 %v4611_v56  ;;  %v4612_v6 = vunpack.i.l.bf16 %v4611_v56  ;;  %v1696_v56 = vsel %vm1692_vm14, %v1691_v27, %v4608_v46  ;;  %v5952_v27 = vld [vmem:[%s6582_s8 + $0x10] ss:$8 sps:$4 sm:$0xff]  }
 0x28f   :  { %v1693_v5 = vsel %vm1692_vm14, %v1688_v10, %v4612_v6  ;;  %v1694_v4 = vsel %vm1692_vm14, %v1689_v20, %v4613_v3  ;;  %v4766_v3 = vld [vmem:[%s6580_s6 + $0x130] ss:$8 sps:$4 sm:$0xff]  }
 0x291   :  { %v4616_v1 = vpop.permute.xlu1 %4615 }
 0x292   :  { %v4618_v16 = vunpack.i.h.bf16 %v4616_v1  ;;  %v4617_v45 = vunpack.i.l.bf16 %v4616_v1 }
 0x294   :  { %v1698_v33 = vsel %vm1697_vm13, %v1693_v5, %v4617_v45  ;;  %v1699_v37 = vsel %vm1697_vm13, %v1694_v4, %v4618_v16 }
 0x299   :  { %v5813_v21 = vpop.permute.xlu1 %4620 }
 0x29a   :  { %v4623_v22 = vunpack.i.h.bf16 %v5813_v21  ;;  %v4622_v25 = vunpack.i.l.bf16 %v5813_v21  ;;  %v2101_v21 = vld [vmem:[%s6583_s9] ss:$2 sm:$0x3] }
 0x29c   :  { %v1703_v42 = vsel %vm1702_vm15, %v1698_v33, %v4622_v25  ;;  %v1704_v43 = vsel %vm1702_vm15, %v1699_v37, %v4623_v22  ;;  %v1772_v37 = vsub.s32 0, %v5728_v23 }
 0x29d   :  { %v4626_v28 = vpop.permute.xlu1 %4625  ;;  %v1723_v32 = vpack.c.bf16 %v1704_v43, %v1703_v42 }
 0x29e   :  { %v4628_v52 = vunpack.i.h.bf16 %v4626_v28  ;;  %v4627_v53 = vunpack.i.l.bf16 %v4626_v28  ;;  %v5907_v40 = vrot.slane %v5733_v30, %v1772_v37  ;;  %v5919_v23 = vrot.slane %v2101_v21, %v1772_v37 }
 0x29f   :  { %2019 = vmatprep.mubr.bf16.mxu0 %v1723_v32 }
 0x2a0   :  { %2020 = vmatmul.mubr.bf16.vlgmr.msra.gmra.mrb[64].mxu0 %v1722_v9  ;;  %v1700_v9 = vsel %vm1697_vm13, %v1695_v50, %v4627_v53  ;;  %v1701_v60 = vsel %vm1697_vm13, %v1696_v56, %v4628_v52  ;;  %v5935_v52 = vld [vmem:[%s6582_s8] ss:$8 sps:$4 sm:$0xff]   ;;  %v5972_v56 = vld [vmem:[%s6582_s8 + $0x34] ss:$8 sps:$4 sm:$0xff]  }
 0x2a1   :  { %v5848_v58 = vpop.permute.xlu1 %4635  ;;  %2041 = vmatpush1.bf16.msra.mxu0 %v4757_v39  ;;  %v4641_v6 = vpop.permute.xlu0 %4640  ;;  %2201 = vmatpush1.bf16.msra.mxu1 %v5935_v52  ;;  %v5965_v50 = vld [vmem:[%s6582_s8 + $0x20] ss:$8 sps:$4 sm:$0xff]  }
 0x2a2   :  { %v4638_v59 = vunpack.i.h.bf16 %v5848_v58  ;;  %v4637_v51 = vunpack.i.l.bf16 %v5848_v58  ;;  %2042 = vmatprep.subr.bf16.mxu0 %v4762_v47  ;;  %v4643_v13 = vunpack.i.h.bf16 %v4641_v6  ;;  %v4642_v16 = vunpack.i.l.bf16 %v4641_v6  ;;  %2202 = vmatprep.subr.bf16.mxu1 %v5947_v55 }
 0x2a4   :  { %v1705_v61 = vsel %vm1702_vm15, %v1700_v9, %v4637_v51  ;;  %v1706_v0 = vsel %vm1702_vm15, %v1701_v60, %v4638_v59  ;;  %v1708_v57 = vsel %vm1707_vm0, %v4622_v25, %v4642_v16  ;;  %v5900_v25 = vrot.slane %v2101_v21, %v5736_v35 }
 0x2a5   :  { %v1726_v1 = vpack.c.bf16 %v1706_v0, %v1705_v61  ;;  %2043 = vmatpush1.bf16.msra.mxu0 %v4760_v62  ;;  %v5957_v62 = vld [vmem:[%s6582_s8 + $0x24] ss:$8 sps:$4 sm:$0xff]   ;;  %2203 = vmatpush1.bf16.msra.mxu1 %v5952_v27 }
 0x2a6   :  { %2044 = vmatprep.subr.bf16.mxu0 %v4765_v8  ;;  %2204 = vmatprep.subr.bf16.mxu1 %v5957_v62  ;;  %v5979_v8 = vld [vmem:[%s6582_s8 + $0x30] ss:$8 sps:$4 sm:$0xff]  }
 0x2a7   :  { %2029 = vmatprep.mubr.bf16.mxu0 %v1726_v1 }
 0x2a8   :  { %2030 = vmatmul.mubr.bf16.gmra.mrb[68].mxu0 %v1725_v29  ;;  %v1709_v29 = vsel %vm1707_vm0, %v4623_v22, %v4643_v13  ;;  %v4210_v22 = vld [vmem:[%s6583_s9 + $0x1] ss:$2 sm:$0x3]  ;;  %s5022_s9 = smov 64  }
 0x2a9   :  { %2045 = vmatpush1.bf16.msra.mxu0 %v4763_v2  ;;  %2072 = vmatprep.mubr.bf16.mxu0 %v5019_v17  ;;  %v4646_v7 = vpop.permute.xlu1 %4645  ;;  %v5903_v33 = vrot.slane %v4210_v22, %v5736_v35  ;;  %v5921_v30 = vrot.slane %v4210_v22, %v1772_v37 }
 0x2aa   :  { %2046 = vmatprep.subr.bf16.mxu0 %v4768_v34  ;;  %v4648_v45 = vunpack.i.h.bf16 %v4646_v7  ;;  %v4647_v18 = vunpack.i.l.bf16 %v4646_v7  ;;  %2205 = vmatpush1.bf16.msra.mxu1 %v5965_v50 }
 0x2ab   :  { %2206 = vmatprep.subr.bf16.mxu1 %v5972_v56 }
 0x2ac   :  { %v1713_v20 = vsel %vm1712_vm1, %v1708_v57, %v4647_v18  ;;  %v1714_v5 = vsel %vm1712_vm1, %v1709_v29, %v4648_v45 }
 0x2ad   :  { %2047 = vmatpush1.bf16.msra.mxu0 %v4766_v3 }
 0x2ae   :  { %2317 = vmatprep.subr.bf16.mxu0 %v5930_v49  ;;  %2207 = vmatpush1.bf16.msra.mxu1 %v5979_v8 }
 0x2af   :  { %2437 = vmatprep.subr.bf16.mxu1 %v5930_v49 }
 0x2b1   :  { %v4651_v14 = vpop.permute.xlu0 %4650 }
 0x2b2   :  { %v4653_v19 = vunpack.i.h.bf16 %v4651_v14  ;;  %v4652_v10 = vunpack.i.l.bf16 %v4651_v14 }
 0x2b4   :  { %v1718_v4 = vsel %vm1717_vm2, %v1713_v20, %v4652_v10  ;;  %v1719_v26 = vsel %vm1717_vm2, %v1714_v5, %v4653_v19 }
 0x2b5   :  { %v1724_v31 = vpack.c.bf16 %v1719_v26, %v1718_v4 }
 0x2b7   :  { %4208 = vmatmul.mubr.msk.bf16.vlgmr.msra.gmra.mrb[64].mxu0 %vm1980_vm3, %v1724_v31 }
 0x2b8   :  { %2082 = vmatprep.mubr.bf16.mxu0 %v5019_v17  ;;  %2318 = vmatpush1.bf16.msra.mxu0 %v5935_v52 }
 0x2b9   :  { %2319 = vmatprep.subr.bf16.mxu0 %v5947_v55 }
 0x2bc   :  { %2320 = vmatpush1.bf16.msra.mxu0 %v5952_v27 }
 0x2bd   :  { %2321 = vmatprep.subr.bf16.mxu0 %v5957_v62 }
 0x2c0   :  { %2322 = vmatpush1.bf16.msra.mxu0 %v5965_v50 }
 0x2c1   :  { %2323 = vmatprep.subr.bf16.mxu0 %v5972_v56 }
 0x2c4   :  { %2324 = vmatpush1.bf16.msra.mxu0 %v5979_v8 }
 0x2c5   :  { %2557 = vmatprep.subr.bf16.mxu0 %v5930_v49 }
 0x38a   :  { %v2074_v41 = vpop.f32.mrb[64].mxu0 }
 0x38b   :  { %v5910_v42 = vadd.f32 %v2074_v41, %v5907_v40  ;;  %v5912_v43 = vpop.f32.mrb[65].mxu0 }
 0x38c   :  { %v5914_v24 = vpop.f32.mrb[66].mxu0  ;;  %v6003_v7 = vadd.f32 %v5912_v43, %v5742_v38 }
 0x38d   :  { %v4211_v12 = vmul.f32 -1.442695, %v5910_v42  ;;  %v5917_v28 = vpop.f32.mrb[67].mxu0 }
 0x38f   :  { %4781 = vpow2.f32 %v4211_v12 }
 0x399   :  { %v4782_v35 = vpop.eup %4781 }
 0x39a   :  { %v2129_v32 = vadd.f32 1.0, %v4782_v35 }
 0x39c   :  { %4783 = vrcp.f32 %v2129_v32 }
 0x3a6   :  { %v4784_v39 = vpop.eup %4783 }
 0x3a7   :  { %v2132_v46 = vmul.f32 %v4784_v39, %v5919_v23 }
 0x3a9   :  { %v2133_v15 = vsub.f32 %v2132_v46, %v5921_v30 }
 0x3ab   :  { %2136 = vrot.lane.b32.xlu1 %v2133_v15, %s5022_s9  ;;  %v2134_v53 = vmul.f32 0.0, %v2133_v15 }
 0x41d   :  { %v2137_v47 = vpop.permute.xlu1 %2136 }
 0x41e   :  { %v2139_v48 = vmul.f32 %v2137_v47, %v2133_v15 }
 0x420   :  { %2141 = vrot.lane.b32.xlu0 %v2139_v48, %s5013_s1 }
 0x492   :  { %v2142_v44 = vpop.permute.xlu0 %2141 }
 0x493   :  { %v5941_v54 = vadd.f32 %v2142_v44, %v2134_v53 }
 0x495   :  { %4785 = vtanh.f32 %v5941_v54  ;;  %v2266_v32 = vrot.slane %v5941_v54, 6 }
 0x49f   :  { %v4786_v9 = vpop.eup %4785 }
 0x4a0   :  { %2147 = vrot.lane.b32.xlu1 %v4786_v9, %s5022_s9 }
 0x512   :  { %v2148_v60 = vpop.permute.xlu1 %2147 }
 0x513   :  { %v2150_v61 = vmul.f32 %v2148_v60, %v2133_v15 }
 0x515   :  { %2152 = vrot.lane.b32.xlu0 %v2150_v61, %s5013_s1 }
 0x587   :  { %v2153_v0 = vpop.permute.xlu0 %2152 }
 0x588   :  { %v2155_v1 = vsel %vm1682_vm11, %v2153_v0, 0.0 }
 0x589   :  { %v2156_v2 = vpack.c.bf16 %v2155_v1, %v2155_v1 }
 0x58b   :  { %4220 = vmatmul.mubr.msk.bf16.vlgmr.msra.gmra.mrb[64].mxu1 %vm1980_vm3, %v2156_v2 }
 0x58c   :  { %2438 = vmatpush1.bf16.msra.mxu1 %v5935_v52  ;;  %2469 = vmatprep.mubr.bf16.mxu1 %v5019_v17 }
 0x58d   :  { %2439 = vmatprep.subr.bf16.mxu1 %v5947_v55 }
 0x590   :  { %2440 = vmatpush1.bf16.msra.mxu1 %v5952_v27 }
 0x591   :  { %2441 = vmatprep.subr.bf16.mxu1 %v5957_v62 }
 0x594   :  { %2442 = vmatpush1.bf16.msra.mxu1 %v5965_v50 }
 0x595   :  { %2443 = vmatprep.subr.bf16.mxu1 %v5972_v56 }
 0x598   :  { %2444 = vmatpush1.bf16.msra.mxu1 %v5979_v8 }
 0x599   :  { %2669 = vmatprep.subr.bf16.mxu1 %v5930_v49 }
 0x65e   :  { %v2234_v34 = vpop.f32.mrb[64].mxu1 }
 0x65f   :  { %v2243_v3 = vrot.slane %v2234_v34, 6  ;;  %v2236_v6 = vpop.f32.mrb[65].mxu1 }
 0x660   :  { %v2244_v13 = vrot.slane %v2236_v6, 6  ;;  %v2238_v16 = vpop.f32.mrb[66].mxu1 }
 0x661   :  { %v2247_v45 = vadd.f32 %v5910_v42, %v2243_v3  ;;  %v2239_v18 = vpop.f32.mrb[67].mxu1 }
 0x662   :  { %v2248_v14 = vadd.f32 %v6003_v7, %v2244_v13 }
 0x663   :  { %v4221_v57 = vmul.f32 -1.442695, %v2247_v45 }
 0x664   :  { %v4222_v29 = vmul.f32 -1.442695, %v2248_v14 }
 0x665   :  { %4787 = vpow2.f32 %v4221_v57 }
 0x666   :  { %4789 = vpow2.f32 %v4222_v29 }
 0x66f   :  { %v4788_v19 = vpop.eup %4787 }
 0x670   :  { %v4790_v10 = vpop.eup %4789  ;;  %v2255_v20 = vadd.f32 1.0, %v4788_v19 }
 0x671   :  { %v2256_v5 = vadd.f32 1.0, %v4790_v10 }
 0x672   :  { %4791 = vrcp.f32 %v2255_v20 }
 0x673   :  { %4793 = vrcp.f32 %v2256_v5 }
 0x67c   :  { %v4792_v4 = vpop.eup %4791 }
 0x67d   :  { %v4794_v26 = vpop.eup %4793  ;;  %v2261_v31 = vmul.f32 %v4792_v4, %v5919_v23 }
 0x67e   :  { %v2262_v21 = vmul.f32 %v4794_v26, %v5900_v25 }
 0x67f   :  { %v2263_v22 = vsub.f32 %v2261_v31, %v5921_v30 }
 0x680   :  { %v2264_v37 = vsub.f32 %v2262_v21, %v5903_v33 }
 0x681   :  { %2270 = vrot.lane.b32.xlu1 %v2263_v22, %s5022_s9  ;;  %v2268_v39 = vmul.f32 %v2266_v32, %v2263_v22 }
 0x682   :  { %2287 = vrot.lane.b32.xlu0 %v2264_v37, %s5022_s9  ;;  %v2285_v15 = vmul.f32 0.0, %v2264_v37 }
 0x6f3   :  { %v2271_v41 = vpop.permute.xlu1 %2270 }
 0x6f4   :  { %v2273_v43 = vmul.f32 %v2271_v41, %v2263_v22  ;;  %v2288_v12 = vpop.permute.xlu0 %2287 }
 0x6f5   :  { %v2290_v35 = vmul.f32 %v2288_v12, %v2264_v37 }
 0x6f6   :  { %2275 = vrot.lane.b32.xlu1 %v2273_v43, %s5013_s1 }
 0x6f7   :  { %2292 = vrot.lane.b32.xlu0 %v2290_v35, %s5013_s1 }
 0x768   :  { %v2276_v46 = vpop.permute.xlu1 %2275 }
 0x769   :  { %v6016_v47 = vadd.f32 %v2276_v46, %v2268_v39  ;;  %v2293_v48 = vpop.permute.xlu0 %2292 }
 0x76a   :  { %v6018_v53 = vadd.f32 %v2293_v48, %v2285_v15 }
 0x76b   :  { %4795 = vtanh.f32 %v6016_v47 }
 0x76c   :  { %4797 = vtanh.f32 %v6018_v53 }
 0x775   :  { %v4796_v44 = vpop.eup %4795 }
 0x776   :  { %v4798_v9 = vpop.eup %4797  ;;  %2281 = vrot.lane.b32.xlu1 %v4796_v44, %s5022_s9 }
 0x777   :  { %2298 = vrot.lane.b32.xlu0 %v4798_v9, %s5022_s9 }
 0x77a   :  { %4655 = vrot.lane.b32.xlu1 %v5713_v63, %s5018_s18 }
 0x77b   :  { %4660 = vrot.lane.b32.xlu0 %v5720_v11, %s5020_s19 }
 0x77e   :  { %4665 = vrot.lane.b32.xlu1 %v5738_v36, %s5021_s21 }
 0x7e8   :  { %v2282_v54 = vpop.permute.xlu1 %2281 }
 0x7e9   :  { %v2284_v60 = vmul.f32 %v2282_v54, %v2263_v22  ;;  %v2299_v61 = vpop.permute.xlu0 %2298 }
 0x7ea   :  { %v2301_v0 = vmul.f32 %v2299_v61, %v2264_v37 }
 0x7eb   :  { %2303 = vrot.lane.b32.xlu0 %v2284_v60, %s5013_s1 }
 0x7ec   :  { %v4656_v1 = vpop.permute.xlu1 %4655  ;;  %2307 = vrot.lane.b32.xlu1 %v2301_v0, %s5022_s9 }
 0x7ed   :  { %v4658_v2 = vunpack.i.h.bf16 %v4656_v1  ;;  %v4657_v34 = vunpack.i.l.bf16 %v4656_v1  ;;  %v4661_v3 = vpop.permute.xlu0 %4660 }
 0x7ee   :  { %v4663_v6 = vunpack.i.h.bf16 %v4661_v3  ;;  %v4662_v63 = vunpack.i.l.bf16 %v4661_v3 }
 0x7ef   :  { %v1711_v11 = vsel %vm1707_vm0, %v4638_v59, %v4658_v2  ;;  %v1710_v36 = vsel %vm1707_vm0, %v4637_v51, %v4657_v34 }
 0x7f0   :  { %v4666_v13 = vpop.permute.xlu1 %4665  ;;  %v1716_v18 = vsel %vm1712_vm1, %v1711_v11, %v4663_v6  ;;  %v1715_v14 = vsel %vm1712_vm1, %v1710_v36, %v4662_v63  ;;  %v2383_v11 = vrot.slane %v6016_v47, 6  ;;  %v2403_v36 = vrot.slane %v6018_v53, 6 }
 0x7f1   :  { %v4668_v16 = vunpack.i.h.bf16 %v4666_v13  ;;  %v4667_v45 = vunpack.i.l.bf16 %v4666_v13 }
 0x7f3   :  { %v1720_v57 = vsel %vm1717_vm2, %v1715_v14, %v4667_v45  ;;  %v1721_v29 = vsel %vm1717_vm2, %v1716_v18, %v4668_v16 }
 0x7f4   :  { %v1727_v19 = vpack.c.bf16 %v1721_v29, %v1720_v57 }
 0x7f6   :  { %4209 = vmatmul.mubr.msk.bf16.gmra.mrb[68].mxu0 %vm1980_vm3, %v1727_v19 }
 0x7f7   :  { %2349 = vmatprep.mubr.bf16.mxu0 %v5019_v17 }
 0x85d   :  { %v2304_v59 = vpop.permute.xlu0 %2303 }
 0x85e   :  { %v2308_v58 = vpop.permute.xlu1 %2307 }
 0x85f   :  { %v2310_v51 = vsel %vm1682_vm11, %v2304_v59, %v2308_v58 }
 0x860   :  { %v2311_v10 = vpack.c.bf16 %v2310_v51, %v2310_v51 }
 0x862   :  { %v2313_v20 = vrot.slane %v2311_v10, 1 }
 0x864   :  { %4223 = vmatmul.mubr.msk.bf16.vlgmr.msra.gmra.mrb[72].mxu0 %vm1980_vm3, %v2313_v20 }
 0x865   :  { %2558 = vmatpush1.bf16.msra.mxu0 %v5935_v52  ;;  %2589 = vmatprep.mubr.bf16.mxu0 %v5019_v17 }
 0x866   :  { %2559 = vmatprep.subr.bf16.mxu0 %v5947_v55 }
 0x869   :  { %2560 = vmatpush1.bf16.msra.mxu0 %v5952_v27 }
 0x86a   :  { %2561 = vmatprep.subr.bf16.mxu0 %v5957_v62 }
 0x86d   :  { %2562 = vmatpush1.bf16.msra.mxu0 %v5965_v50 }
 0x86e   :  { %2563 = vmatprep.subr.bf16.mxu0 %v5972_v56 }
 0x871   :  { %2564 = vmatpush1.bf16.msra.mxu0 %v5979_v8 }
 0x872   :  { %2789 = vmatprep.subr.bf16.mxu0 %v5930_v49 }
 0x8c9   :  { %v6055_v5 = vpop.f32.mrb[68].mxu0 }
 0x8ca   :  { %v6057_v4 = vpop.f32.mrb[69].mxu0 }
 0x8cb   :  { %v6059_v26 = vpop.f32.mrb[70].mxu0 }
 0x8cc   :  { %v6061_v31 = vpop.f32.mrb[71].mxu0 }
 0x937   :  { %v2351_v21 = vpop.f32.mrb[72].mxu0 }
 0x938   :  { %v2360_v22 = vrot.slane %v2351_v21, 4  ;;  %v2353_v37 = vpop.f32.mrb[73].mxu0 }
 0x939   :  { %v2361_v41 = vrot.slane %v2353_v37, 4  ;;  %v2355_v43 = vpop.f32.mrb[74].mxu0 }
 0x93a   :  { %v2364_v12 = vadd.f32 %v5910_v42, %v2360_v22  ;;  %v2356_v35 = vpop.f32.mrb[75].mxu0 }
 0x93b   :  { %v2365_v32 = vadd.f32 %v6003_v7, %v2361_v41 }
 0x93c   :  { %v4224_v39 = vmul.f32 -1.442695, %v2364_v12 }
 0x93d   :  { %v4225_v46 = vmul.f32 -1.442695, %v2365_v32 }
 0x93e   :  { %4799 = vpow2.f32 %v4224_v39 }
 0x93f   :  { %4801 = vpow2.f32 %v4225_v46 }
 0x948   :  { %v4800_v15 = vpop.eup %4799 }
 0x949   :  { %v4802_v48 = vpop.eup %4801  ;;  %v2372_v44 = vadd.f32 1.0, %v4800_v15 }
 0x94a   :  { %v2373_v9 = vadd.f32 1.0, %v4802_v48 }
 0x94b   :  { %4803 = vrcp.f32 %v2372_v44 }
 0x94c   :  { %4805 = vrcp.f32 %v2373_v9 }
 0x955   :  { %v4804_v54 = vpop.eup %4803 }
 0x956   :  { %v4806_v60 = vpop.eup %4805  ;;  %v2378_v61 = vmul.f32 %v4804_v54, %v5919_v23 }
 0x957   :  { %v2379_v0 = vmul.f32 %v4806_v60, %v5900_v25 }
 0x958   :  { %v2380_v1 = vsub.f32 %v2378_v61, %v5921_v30 }
 0x959   :  { %v2381_v2 = vsub.f32 %v2379_v0, %v5903_v33 }
 0x95a   :  { %2387 = vrot.lane.b32.xlu0 %v2380_v1, %s5022_s9  ;;  %v2385_v13 = vmul.f32 %v2383_v11, %v2380_v1 }
 0x95b   :  { %2407 = vrot.lane.b32.xlu1 %v2381_v2, %s5022_s9  ;;  %v2405_v45 = vmul.f32 %v2403_v36, %v2381_v2 }
 0x9cc   :  { %v2388_v34 = vpop.permute.xlu0 %2387 }
 0x9cd   :  { %v2390_v3 = vmul.f32 %v2388_v34, %v2380_v1  ;;  %v2408_v6 = vpop.permute.xlu1 %2407 }
 0x9ce   :  { %v2410_v63 = vmul.f32 %v2408_v6, %v2381_v2 }
 0x9cf   :  { %2392 = vrot.lane.b32.xlu0 %v2390_v3, %s5013_s1 }
 0x9d0   :  { %2412 = vrot.lane.b32.xlu1 %v2410_v63, %s5013_s1 }
 0xa41   :  { %v2393_v16 = vpop.permute.xlu0 %2392 }
 0xa42   :  { %v6075_v18 = vadd.f32 %v2393_v16, %v2385_v13  ;;  %v2413_v14 = vpop.permute.xlu1 %2412 }
 0xa43   :  { %v6077_v57 = vadd.f32 %v2413_v14, %v2405_v45 }
 0xa44   :  { %4807 = vtanh.f32 %v6075_v18  ;;  %v2503_v11 = vrot.slane %v6075_v18, 6 }
 0xa45   :  { %4809 = vtanh.f32 %v6077_v57  ;;  %v2523_v36 = vrot.slane %v6077_v57, 6 }
 0xa4e   :  { %v4808_v29 = vpop.eup %4807 }
 0xa4f   :  { %v4810_v19 = vpop.eup %4809  ;;  %2398 = vrot.lane.b32.xlu0 %v4808_v29, %s5022_s9 }
 0xa50   :  { %2418 = vrot.lane.b32.xlu1 %v4810_v19, %s5022_s9 }
 0xac1   :  { %v2399_v47 = vpop.permute.xlu0 %2398 }
 0xac2   :  { %v2401_v53 = vmul.f32 %v2399_v47, %v2380_v1  ;;  %v2419_v59 = vpop.permute.xlu1 %2418 }
 0xac3   :  { %v2421_v58 = vmul.f32 %v2419_v59, %v2381_v2 }
 0xac4   :  { %2423 = vrot.lane.b32.xlu0 %v2401_v53, %s5013_s1 }
 0xac5   :  { %2427 = vrot.lane.b32.xlu1 %v2421_v58, %s5022_s9 }
 0xb36   :  { %v2424_v51 = vpop.permute.xlu0 %2423 }
 0xb37   :  { %v2428_v10 = vpop.permute.xlu1 %2427 }
 0xb38   :  { %v2430_v20 = vsel %vm1682_vm11, %v2424_v51, %v2428_v10 }
 0xb39   :  { %v2431_v21 = vpack.c.bf16 %v2430_v20, %v2430_v20 }
 0xb3b   :  { %v2433_v22 = vrot.slane %v2431_v21, 2 }
 0xb3d   :  { %4226 = vmatmul.mubr.msk.bf16.vlgmr.msra.gmra.mrb[68].mxu1 %vm1980_vm3, %v2433_v22 }
 0xb3e   :  { %2670 = vmatpush1.bf16.msra.mxu1 %v5935_v52  ;;  %2701 = vmatprep.mubr.bf16.mxu1 %v5019_v17 }
 0xb3f   :  { %2671 = vmatprep.subr.bf16.mxu1 %v5947_v55 }
 0xb42   :  { %2672 = vmatpush1.bf16.msra.mxu1 %v5952_v27 }
 0xb43   :  { %2673 = vmatprep.subr.bf16.mxu1 %v5957_v62 }
 0xb46   :  { %2674 = vmatpush1.bf16.msra.mxu1 %v5965_v50 }
 0xb47   :  { %2675 = vmatprep.subr.bf16.mxu1 %v5972_v56 }
 0xb4a   :  { %2676 = vmatpush1.bf16.msra.mxu1 %v5979_v8 }
 0xb4b   :  { %2909 = vmatprep.subr.bf16.mxu1 %v5930_v49 }
 0xc10   :  { %v2471_v37 = vpop.f32.mrb[68].mxu1 }
 0xc11   :  { %v2480_v41 = vrot.slane %v2471_v37, 2  ;;  %v2473_v43 = vpop.f32.mrb[69].mxu1  ;;  %v6131_v37 = vadd.f32 %v5914_v24, %v5907_v40 }
 0xc12   :  { %v2481_v12 = vrot.slane %v2473_v43, 2  ;;  %v2475_v35 = vpop.f32.mrb[70].mxu1 }
 0xc13   :  { %v2484_v32 = vadd.f32 %v5910_v42, %v2480_v41  ;;  %v2476_v39 = vpop.f32.mrb[71].mxu1  ;;  %v6135_v41 = vadd.f32 %v5917_v28, %v5742_v38 }
 0xc14   :  { %v2485_v46 = vadd.f32 %v6003_v7, %v2481_v12 }
 0xc15   :  { %v4227_v15 = vmul.f32 -1.442695, %v2484_v32 }
 0xc16   :  { %v4228_v48 = vmul.f32 -1.442695, %v2485_v46 }
 0xc17   :  { %4811 = vpow2.f32 %v4227_v15 }
 0xc18   :  { %4813 = vpow2.f32 %v4228_v48 }
 0xc21   :  { %v4812_v44 = vpop.eup %4811 }
 0xc22   :  { %v4814_v9 = vpop.eup %4813  ;;  %v2492_v54 = vadd.f32 1.0, %v4812_v44 }
 0xc23   :  { %v2493_v60 = vadd.f32 1.0, %v4814_v9 }
 0xc24   :  { %4815 = vrcp.f32 %v2492_v54 }
 0xc25   :  { %4817 = vrcp.f32 %v2493_v60 }
 0xc2e   :  { %v4816_v61 = vpop.eup %4815 }
 0xc2f   :  { %v4818_v0 = vpop.eup %4817  ;;  %v2498_v1 = vmul.f32 %v4816_v61, %v5919_v23 }
 0xc30   :  { %v2499_v2 = vmul.f32 %v4818_v0, %v5900_v25 }
 0xc31   :  { %v2500_v42 = vsub.f32 %v2498_v1, %v5921_v30 }
 0xc32   :  { %v2501_v7 = vsub.f32 %v2499_v2, %v5903_v33 }
 0xc33   :  { %2507 = vrot.lane.b32.xlu0 %v2500_v42, %s5022_s9  ;;  %v2505_v13 = vmul.f32 %v2503_v11, %v2500_v42 }
 0xc34   :  { %2527 = vrot.lane.b32.xlu1 %v2501_v7, %s5022_s9  ;;  %v2525_v45 = vmul.f32 %v2523_v36, %v2501_v7 }
 0xca5   :  { %v2508_v34 = vpop.permute.xlu0 %2507 }
 0xca6   :  { %v2510_v3 = vmul.f32 %v2508_v34, %v2500_v42  ;;  %v2528_v6 = vpop.permute.xlu1 %2527 }
 0xca7   :  { %v2530_v63 = vmul.f32 %v2528_v6, %v2501_v7 }
 0xca8   :  { %2512 = vrot.lane.b32.xlu0 %v2510_v3, %s5013_s1 }
 0xca9   :  { %2532 = vrot.lane.b32.xlu1 %v2530_v63, %s5013_s1 }
 0xd1a   :  { %v2513_v16 = vpop.permute.xlu0 %2512 }
 0xd1b   :  { %v6108_v14 = vadd.f32 %v2513_v16, %v2505_v13  ;;  %v2533_v29 = vpop.permute.xlu1 %2532 }
 0xd1c   :  { %v6110_v19 = vadd.f32 %v2533_v29, %v2525_v45 }
 0xd1d   :  { %4819 = vtanh.f32 %v6108_v14  ;;  %v2617_v6 = vrot.slane %v6108_v14, 6 }
 0xd1e   :  { %4821 = vtanh.f32 %v6110_v19  ;;  %v2637_v63 = vrot.slane %v6110_v19, 6 }
 0xd27   :  { %v4820_v47 = vpop.eup %4819 }
 0xd28   :  { %v4822_v53 = vpop.eup %4821  ;;  %2518 = vrot.lane.b32.xlu0 %v4820_v47, %s5022_s9 }
 0xd29   :  { %2538 = vrot.lane.b32.xlu1 %v4822_v53, %s5022_s9 }
 0xd9a   :  { %v2519_v18 = vpop.permute.xlu0 %2518 }
 0xd9b   :  { %v2521_v57 = vmul.f32 %v2519_v18, %v2500_v42  ;;  %v2539_v59 = vpop.permute.xlu1 %2538 }
 0xd9c   :  { %v2541_v58 = vmul.f32 %v2539_v59, %v2501_v7 }
 0xd9d   :  { %2543 = vrot.lane.b32.xlu0 %v2521_v57, %s5013_s1 }
 0xd9e   :  { %2547 = vrot.lane.b32.xlu1 %v2541_v58, %s5022_s9 }
 0xe0f   :  { %v2544_v51 = vpop.permute.xlu0 %2543 }
 0xe10   :  { %v2548_v10 = vpop.permute.xlu1 %2547 }
 0xe11   :  { %v2550_v20 = vsel %vm1682_vm11, %v2544_v51, %v2548_v10 }
 0xe12   :  { %v2551_v21 = vpack.c.bf16 %v2550_v20, %v2550_v20 }
 0xe14   :  { %v2553_v22 = vrot.slane %v2551_v21, 3 }
 0xe16   :  { %4229 = vmatmul.mubr.msk.bf16.vlgmr.msra.gmra.mrb[76].mxu0 %vm1980_vm3, %v2553_v22 }
 0xe17   :  { %2790 = vmatpush1.bf16.msra.mxu0 %v5935_v52  ;;  %2821 = vmatprep.mubr.bf16.mxu0 %v5019_v17 }
 0xe18   :  { %2791 = vmatprep.subr.bf16.mxu0 %v5947_v55 }
 0xe1b   :  { %2792 = vmatpush1.bf16.msra.mxu0 %v5952_v27 }
 0xe1c   :  { %2793 = vmatprep.subr.bf16.mxu0 %v5957_v62 }
 0xe1f   :  { %2794 = vmatpush1.bf16.msra.mxu0 %v5965_v50 }
 0xe20   :  { %2795 = vmatprep.subr.bf16.mxu0 %v5972_v56 }
 0xe23   :  { %2796 = vmatpush1.bf16.msra.mxu0 %v5979_v8 }
 0xe24   :  { %3029 = vmatprep.subr.bf16.mxu0 %v5930_v49 }
 0xee9   :  { %v2591_v43 = vpop.f32.mrb[76].mxu0 }
 0xeea   :  { %v2598_v12 = vadd.f32 %v6131_v37, %v2591_v43  ;;  %v2593_v35 = vpop.f32.mrb[77].mxu0 }
 0xeeb   :  { %v2599_v32 = vadd.f32 %v6135_v41, %v2593_v35  ;;  %v2595_v39 = vpop.f32.mrb[78].mxu0 }
 0xeec   :  { %v4230_v46 = vmul.f32 -1.442695, %v2598_v12  ;;  %v2596_v15 = vpop.f32.mrb[79].mxu0 }
 0xeed   :  { %v4231_v48 = vmul.f32 -1.442695, %v2599_v32 }
 0xeee   :  { %4823 = vpow2.f32 %v4230_v46 }
 0xeef   :  { %4825 = vpow2.f32 %v4231_v48 }
 0xef8   :  { %v4824_v44 = vpop.eup %4823 }
 0xef9   :  { %v4826_v9 = vpop.eup %4825  ;;  %v2606_v24 = vadd.f32 1.0, %v4824_v44 }
 0xefa   :  { %v2607_v54 = vadd.f32 1.0, %v4826_v9 }
 0xefb   :  { %4827 = vrcp.f32 %v2606_v24 }
 0xefc   :  { %4829 = vrcp.f32 %v2607_v54 }
 0xf05   :  { %v4828_v28 = vpop.eup %4827 }
 0xf06   :  { %v4830_v60 = vpop.eup %4829  ;;  %v2612_v61 = vmul.f32 %v4828_v28, %v5919_v23 }
 0xf07   :  { %v2613_v0 = vmul.f32 %v4830_v60, %v5900_v25 }
 0xf08   :  { %v2614_v1 = vsub.f32 %v2612_v61, %v5921_v30 }
 0xf09   :  { %v2615_v2 = vsub.f32 %v2613_v0, %v5903_v33 }
 0xf0a   :  { %2621 = vrot.lane.b32.xlu0 %v2614_v1, %s5022_s9  ;;  %v2619_v11 = vmul.f32 %v2617_v6, %v2614_v1 }
 0xf0b   :  { %2641 = vrot.lane.b32.xlu1 %v2615_v2, %s5022_s9  ;;  %v2639_v13 = vmul.f32 %v2637_v63, %v2615_v2 }
 0xf7c   :  { %v2622_v42 = vpop.permute.xlu0 %2621 }
 0xf7d   :  { %v2624_v7 = vmul.f32 %v2622_v42, %v2614_v1  ;;  %v2642_v34 = vpop.permute.xlu1 %2641 }
 0xf7e   :  { %v2644_v3 = vmul.f32 %v2642_v34, %v2615_v2 }
 0xf7f   :  { %2626 = vrot.lane.b32.xlu0 %v2624_v7, %s5013_s1 }
 0xf80   :  { %2646 = vrot.lane.b32.xlu1 %v2644_v3, %s5013_s1 }
 0xff1   :  { %v2627_v36 = vpop.permute.xlu0 %2626 }
 0xff2   :  { %v6149_v16 = vadd.f32 %v2627_v36, %v2619_v11  ;;  %v2647_v45 = vpop.permute.xlu1 %2646 }
 0xff3   :  { %v6151_v29 = vadd.f32 %v2647_v45, %v2639_v13 }
 0xff4   :  { %4831 = vtanh.f32 %v6149_v16  ;;  %v2735_v3 = vrot.slane %v6149_v16, 6 }
 0xff5   :  { %4833 = vtanh.f32 %v6151_v29  ;;  %v2755_v6 = vrot.slane %v6151_v29, 6 }
 0xffe   :  { %v4832_v47 = vpop.eup %4831 }
 0xfff   :  { %v4834_v53 = vpop.eup %4833  ;;  %2632 = vrot.lane.b32.xlu0 %v4832_v47, %s5022_s9 }
0x1000   :  { %2652 = vrot.lane.b32.xlu1 %v4834_v53, %s5022_s9 }
0x1071   :  { %v2633_v14 = vpop.permute.xlu0 %2632 }
0x1072   :  { %v2635_v19 = vmul.f32 %v2633_v14, %v2614_v1  ;;  %v2653_v18 = vpop.permute.xlu1 %2652 }
0x1073   :  { %v2655_v57 = vmul.f32 %v2653_v18, %v2615_v2 }
0x1074   :  { %2657 = vrot.lane.b32.xlu0 %v2635_v19, %s5013_s1 }
0x1075   :  { %2661 = vrot.lane.b32.xlu1 %v2655_v57, %s5022_s9 }
0x10e6   :  { %v2658_v59 = vpop.permute.xlu0 %2657 }
0x10e7   :  { %v2662_v58 = vpop.permute.xlu1 %2661 }
0x10e8   :  { %v2664_v51 = vsel %vm1682_vm11, %v2658_v59, %v2662_v58 }
0x10e9   :  { %v2665_v10 = vpack.c.bf16 %v2664_v51, %v2664_v51 }
0x10eb   :  { %4232 = vmatmul.mubr.msk.bf16.vlgmr.msra.gmra.mrb[72].mxu1 %vm1980_vm3, %v2665_v10 }
0x10ec   :  { %2910 = vmatpush1.bf16.msra.mxu1 %v5935_v52  ;;  %2941 = vmatprep.mubr.bf16.mxu1 %v5019_v17 }
0x10ed   :  { %2911 = vmatprep.subr.bf16.mxu1 %v5947_v55 }
0x10f0   :  { %2912 = vmatpush1.bf16.msra.mxu1 %v5952_v27 }
0x10f1   :  { %2913 = vmatprep.subr.bf16.mxu1 %v5957_v62 }
0x10f4   :  { %2914 = vmatpush1.bf16.msra.mxu1 %v5965_v50 }
0x10f5   :  { %2915 = vmatprep.subr.bf16.mxu1 %v5972_v56 }
0x10f8   :  { %2916 = vmatpush1.bf16.msra.mxu1 %v5979_v8 }
0x10f9   :  { %3141 = vmatprep.subr.bf16.mxu1 %v5930_v49 }
0x11be   :  { %v2703_v20 = vpop.f32.mrb[72].mxu1 }
0x11bf   :  { %v2712_v21 = vrot.slane %v2703_v20, 6  ;;  %v2705_v22 = vpop.f32.mrb[73].mxu1 }
0x11c0   :  { %v2713_v43 = vrot.slane %v2705_v22, 6  ;;  %v2707_v12 = vpop.f32.mrb[74].mxu1 }
0x11c1   :  { %v2716_v35 = vadd.f32 %v6131_v37, %v2712_v21  ;;  %v2708_v32 = vpop.f32.mrb[75].mxu1 }
0x11c2   :  { %v2717_v39 = vadd.f32 %v6135_v41, %v2713_v43 }
0x11c3   :  { %v4233_v46 = vmul.f32 -1.442695, %v2716_v35 }
0x11c4   :  { %v4234_v15 = vmul.f32 -1.442695, %v2717_v39 }
0x11c5   :  { %4835 = vpow2.f32 %v4233_v46 }
0x11c6   :  { %4837 = vpow2.f32 %v4234_v15 }
0x11cf   :  { %v4836_v48 = vpop.eup %4835 }
0x11d0   :  { %v4838_v44 = vpop.eup %4837  ;;  %v2724_v9 = vadd.f32 1.0, %v4836_v48 }
0x11d1   :  { %v2725_v24 = vadd.f32 1.0, %v4838_v44 }
0x11d2   :  { %4839 = vrcp.f32 %v2724_v9 }
0x11d3   :  { %4841 = vrcp.f32 %v2725_v24 }
0x11dc   :  { %v4840_v54 = vpop.eup %4839 }
0x11dd   :  { %v4842_v28 = vpop.eup %4841  ;;  %v2730_v60 = vmul.f32 %v4840_v54, %v5919_v23 }
0x11de   :  { %v2731_v61 = vmul.f32 %v4842_v28, %v5900_v25 }
0x11df   :  { %v2732_v0 = vsub.f32 %v2730_v60, %v5921_v30 }
0x11e0   :  { %v2733_v1 = vsub.f32 %v2731_v61, %v5903_v33 }
0x11e1   :  { %2739 = vrot.lane.b32.xlu0 %v2732_v0, %s5022_s9  ;;  %v2737_v63 = vmul.f32 %v2735_v3, %v2732_v0 }
0x11e2   :  { %2759 = vrot.lane.b32.xlu1 %v2733_v1, %s5022_s9  ;;  %v2757_v36 = vmul.f32 %v2755_v6, %v2733_v1 }
0x1253   :  { %v2740_v2 = vpop.permute.xlu0 %2739 }
0x1254   :  { %v2742_v42 = vmul.f32 %v2740_v2, %v2732_v0  ;;  %v2760_v7 = vpop.permute.xlu1 %2759 }
0x1255   :  { %v2762_v34 = vmul.f32 %v2760_v7, %v2733_v1 }
0x1256   :  { %2744 = vrot.lane.b32.xlu0 %v2742_v42, %s5013_s1 }
0x1257   :  { %2764 = vrot.lane.b32.xlu1 %v2762_v34, %s5013_s1 }
0x12c8   :  { %v2745_v11 = vpop.permute.xlu0 %2744 }
0x12c9   :  { %v6182_v13 = vadd.f32 %v2745_v11, %v2737_v63  ;;  %v2765_v45 = vpop.permute.xlu1 %2764 }
0x12ca   :  { %v6184_v47 = vadd.f32 %v2765_v45, %v2757_v36 }
0x12cb   :  { %4843 = vtanh.f32 %v6182_v13  ;;  %v2855_v3 = vrot.slane %v6182_v13, 6 }
0x12cc   :  { %4845 = vtanh.f32 %v6184_v47  ;;  %v2875_v6 = vrot.slane %v6184_v47, 6 }
0x12d5   :  { %v4844_v53 = vpop.eup %4843 }
0x12d6   :  { %v4846_v14 = vpop.eup %4845  ;;  %2750 = vrot.lane.b32.xlu0 %v4844_v53, %s5022_s9 }
0x12d7   :  { %2770 = vrot.lane.b32.xlu1 %v4846_v14, %s5022_s9 }
0x1348   :  { %v2751_v16 = vpop.permute.xlu0 %2750 }
0x1349   :  { %v2753_v29 = vmul.f32 %v2751_v16, %v2732_v0  ;;  %v2771_v19 = vpop.permute.xlu1 %2770 }
0x134a   :  { %v2773_v18 = vmul.f32 %v2771_v19, %v2733_v1 }
0x134b   :  { %2775 = vrot.lane.b32.xlu0 %v2753_v29, %s5013_s1 }
0x134c   :  { %2779 = vrot.lane.b32.xlu1 %v2773_v18, %s5022_s9 }
0x13bd   :  { %v2776_v57 = vpop.permute.xlu0 %2775 }
0x13be   :  { %v2780_v59 = vpop.permute.xlu1 %2779 }
0x13bf   :  { %v2782_v58 = vsel %vm1682_vm11, %v2776_v57, %v2780_v59 }
0x13c0   :  { %v2783_v51 = vpack.c.bf16 %v2782_v58, %v2782_v58 }
0x13c2   :  { %v2785_v10 = vrot.slane %v2783_v51, 1 }
0x13c4   :  { %4235 = vmatmul.mubr.msk.bf16.vlgmr.msra.gmra.mrb[80].mxu0 %vm1980_vm3, %v2785_v10 }
0x13c5   :  { %3030 = vmatpush1.bf16.msra.mxu0 %v5935_v52  ;;  %3061 = vmatprep.mubr.bf16.mxu0 %v5019_v17 }
0x13c6   :  { %3031 = vmatprep.subr.bf16.mxu0 %v5947_v55 }
0x13c9   :  { %3032 = vmatpush1.bf16.msra.mxu0 %v5952_v27 }
0x13ca   :  { %3033 = vmatprep.subr.bf16.mxu0 %v5957_v62 }
0x13cd   :  { %3034 = vmatpush1.bf16.msra.mxu0 %v5965_v50 }
0x13ce   :  { %3035 = vmatprep.subr.bf16.mxu0 %v5972_v56 }
0x13d1   :  { %3036 = vmatpush1.bf16.msra.mxu0 %v5979_v8 }
0x13d2   :  { %3261 = vmatprep.subr.bf16.mxu0 %v5930_v49 }
0x1497   :  { %v2823_v20 = vpop.f32.mrb[80].mxu0 }
0x1498   :  { %v2832_v21 = vrot.slane %v2823_v20, 4  ;;  %v2825_v22 = vpop.f32.mrb[81].mxu0 }
0x1499   :  { %v2833_v43 = vrot.slane %v2825_v22, 4  ;;  %v2827_v12 = vpop.f32.mrb[82].mxu0 }
0x149a   :  { %v2836_v35 = vadd.f32 %v6131_v37, %v2832_v21  ;;  %v2828_v32 = vpop.f32.mrb[83].mxu0 }
0x149b   :  { %v2837_v39 = vadd.f32 %v6135_v41, %v2833_v43 }
0x149c   :  { %v4236_v46 = vmul.f32 -1.442695, %v2836_v35 }
0x149d   :  { %v4237_v15 = vmul.f32 -1.442695, %v2837_v39 }
0x149e   :  { %4847 = vpow2.f32 %v4236_v46 }
0x149f   :  { %4849 = vpow2.f32 %v4237_v15 }
0x14a8   :  { %v4848_v48 = vpop.eup %4847 }
0x14a9   :  { %v4850_v44 = vpop.eup %4849  ;;  %v2844_v9 = vadd.f32 1.0, %v4848_v48 }
0x14aa   :  { %v2845_v24 = vadd.f32 1.0, %v4850_v44 }
0x14ab   :  { %4851 = vrcp.f32 %v2844_v9 }
0x14ac   :  { %4853 = vrcp.f32 %v2845_v24 }
0x14b5   :  { %v4852_v54 = vpop.eup %4851 }
0x14b6   :  { %v4854_v28 = vpop.eup %4853  ;;  %v2850_v60 = vmul.f32 %v4852_v54, %v5919_v23 }
0x14b7   :  { %v2851_v61 = vmul.f32 %v4854_v28, %v5900_v25 }
0x14b8   :  { %v2852_v0 = vsub.f32 %v2850_v60, %v5921_v30 }
0x14b9   :  { %v2853_v1 = vsub.f32 %v2851_v61, %v5903_v33 }
0x14ba   :  { %2859 = vrot.lane.b32.xlu0 %v2852_v0, %s5022_s9  ;;  %v2857_v63 = vmul.f32 %v2855_v3, %v2852_v0 }
0x14bb   :  { %2879 = vrot.lane.b32.xlu1 %v2853_v1, %s5022_s9  ;;  %v2877_v36 = vmul.f32 %v2875_v6, %v2853_v1 }
0x152c   :  { %v2860_v2 = vpop.permute.xlu0 %2859 }
0x152d   :  { %v2862_v42 = vmul.f32 %v2860_v2, %v2852_v0  ;;  %v2880_v7 = vpop.permute.xlu1 %2879 }
0x152e   :  { %v2882_v34 = vmul.f32 %v2880_v7, %v2853_v1 }
0x152f   :  { %2864 = vrot.lane.b32.xlu0 %v2862_v42, %s5013_s1 }
0x1530   :  { %2884 = vrot.lane.b32.xlu1 %v2882_v34, %s5013_s1 }
0x15a1   :  { %v2865_v11 = vpop.permute.xlu0 %2864 }
0x15a2   :  { %v6215_v45 = vadd.f32 %v2865_v11, %v2857_v63  ;;  %v2885_v53 = vpop.permute.xlu1 %2884 }
0x15a3   :  { %v6217_v14 = vadd.f32 %v2885_v53, %v2877_v36 }
0x15a4   :  { %4855 = vtanh.f32 %v6215_v45  ;;  %v2975_v54 = vrot.slane %v6215_v45, 6 }
0x15a5   :  { %4857 = vtanh.f32 %v6217_v14  ;;  %v2995_v28 = vrot.slane %v6217_v14, 6 }
0x15ae   :  { %v4856_v16 = vpop.eup %4855 }
0x15af   :  { %v4858_v29 = vpop.eup %4857  ;;  %2870 = vrot.lane.b32.xlu0 %v4856_v16, %s5022_s9 }
0x15b0   :  { %2890 = vrot.lane.b32.xlu1 %v4858_v29, %s5022_s9  ;;  %v6263_v29 = vld [vmem:[%s6582_s8] ss:$8 sps:$4 sm:$0xff]  }
0x1621   :  { %v2871_v13 = vpop.permute.xlu0 %2870 }
0x1622   :  { %v2873_v47 = vmul.f32 %v2871_v13, %v2852_v0  ;;  %v2891_v19 = vpop.permute.xlu1 %2890  ;;  %v6270_v13 = vld [vmem:[%s6582_s8 + $0x14] ss:$8 sps:$4 sm:$0xff]  }
0x1623   :  { %v2893_v18 = vmul.f32 %v2891_v19, %v2853_v1  ;;  %v6282_v19 = vld [vmem:[%s6582_s8 + $0x24] ss:$8 sps:$4 sm:$0xff]  }
0x1624   :  { %2895 = vrot.lane.b32.xlu0 %v2873_v47, %s5013_s1  ;;  %v6276_v47 = vld [vmem:[%s6582_s8 + $0x10] ss:$8 sps:$4 sm:$0xff]  }
0x1625   :  { %2899 = vrot.lane.b32.xlu1 %v2893_v18, %s5022_s9  ;;  %v6288_v18 = vld [vmem:[%s6582_s8 + $0x20] ss:$8 sps:$4 sm:$0xff]  }
0x1696   :  { %v2896_v57 = vpop.permute.xlu0 %2895 }
0x1697   :  { %v2900_v59 = vpop.permute.xlu1 %2899 }
0x1698   :  { %v2902_v58 = vsel %vm1682_vm11, %v2896_v57, %v2900_v59  ;;  %v6294_v57 = vld [vmem:[%s6582_s8 + $0x34] ss:$8 sps:$4 sm:$0xff]   ;;  %v6300_v59 = vld [vmem:[%s6582_s8 + $0x30] ss:$8 sps:$4 sm:$0xff]  }
0x1699   :  { %v2903_v51 = vpack.c.bf16 %v2902_v58, %v2902_v58  ;;  %v6306_v58 = vld [vmem:[%s6582_s8 + $0x4] ss:$8 sps:$4 sm:$0xff]   ;;  %s5023_s8 = smov [#allocation2]  }
0x169a   :  { %s4054_s4 = sshll.u32 %s5023_s8, 4  ;;  %s4055_s4 = int_to_ptr.vmem [resolvable:$true] %s4054_s4 }
0x169b   :  { %v2905_v10 = vrot.slane %v2903_v51, 2  ;;  %v6311_v51 = vadd.f32 %v6055_v5, %v5907_v40  ;;  %s4981_s7 = scalar_lea.vmem %s4055_s4, 32  ;;  %p4986_p1 = scmp.lt.s32.totalorder %s4055_s4, %s4055_s4 }
0x169c   :  { %p4982_p0 = scmp.ne.s32.totalorder %s4055_s4, %s4981_s7  ;;  %p4987_p2 = scmp.lt.s32.totalorder %s4981_s7, %s4981_s7 }
0x169d   :  { %4238 = vmatmul.mubr.msk.bf16.vlgmr.msra.gmra.mrb[76].mxu1 %vm1980_vm3, %v2905_v10  ;;  %v6315_v10 = vadd.f32 %v6057_v4, %v5742_v38 }
0x169e   :  { %3142 = vmatpush1.bf16.msra.mxu1 %v5935_v52  ;;  %3173 = vmatprep.mubr.bf16.mxu1 %v5019_v17  ;;  %p4988_p3 = por %p4987_p2, %p4986_p1 }
0x169f   :  { %3143 = vmatprep.subr.bf16.mxu1 %v5947_v55 }
0x16a0   :  { %p4989_p4 = pnand %p4988_p3, %p4982_p0 }
0x16a2   :  { %3144 = vmatpush1.bf16.msra.mxu1 %v5952_v27 }
0x16a3   :  { %3145 = vmatprep.subr.bf16.mxu1 %v5957_v62 }
0x16a6   :  { %3146 = vmatpush1.bf16.msra.mxu1 %v5965_v50 }
0x16a7   :  { %3147 = vmatprep.subr.bf16.mxu1 %v5972_v56 }
0x16aa   :  { %3148 = vmatpush1.bf16.msra.mxu1 %v5979_v8 }
0x16ab   :  { %3381 = vmatprep.subr.bf16.mxu1 %v5930_v49 }
0x1770   :  { %v2943_v20 = vpop.f32.mrb[76].mxu1 }
0x1771   :  { %v2952_v21 = vrot.slane %v2943_v20, 2  ;;  %v2945_v22 = vpop.f32.mrb[77].mxu1 }
0x1772   :  { %v2953_v52 = vrot.slane %v2945_v22, 2  ;;  %v2947_v43 = vpop.f32.mrb[78].mxu1 }
0x1773   :  { %v2956_v12 = vadd.f32 %v6131_v37, %v2952_v21  ;;  %v2948_v55 = vpop.f32.mrb[79].mxu1 }
0x1774   :  { %v2957_v27 = vadd.f32 %v6135_v41, %v2953_v52 }
0x1775   :  { %v4239_v35 = vmul.f32 -1.442695, %v2956_v12 }
0x1776   :  { %v4240_v62 = vmul.f32 -1.442695, %v2957_v27 }
0x1777   :  { %4859 = vpow2.f32 %v4239_v35 }
0x1778   :  { %4861 = vpow2.f32 %v4240_v62 }
0x1781   :  { %v4860_v50 = vpop.eup %4859 }
0x1782   :  { %v4862_v56 = vpop.eup %4861  ;;  %v2964_v32 = vadd.f32 1.0, %v4860_v50 }
0x1783   :  { %v2965_v8 = vadd.f32 1.0, %v4862_v56 }
0x1784   :  { %4863 = vrcp.f32 %v2964_v32 }
0x1785   :  { %4865 = vrcp.f32 %v2965_v8 }
0x178e   :  { %v4864_v49 = vpop.eup %4863 }
0x178f   :  { %v4866_v39 = vpop.eup %4865  ;;  %v2970_v46 = vmul.f32 %v4864_v49, %v5919_v23 }
0x1790   :  { %v2971_v15 = vmul.f32 %v4866_v39, %v5900_v25 }
0x1791   :  { %v2972_v37 = vsub.f32 %v2970_v46, %v5921_v30 }
0x1792   :  { %v2973_v41 = vsub.f32 %v2971_v15, %v5903_v33 }
0x1793   :  { %2979 = vrot.lane.b32.xlu0 %v2972_v37, %s5022_s9  ;;  %v2977_v60 = vmul.f32 %v2975_v54, %v2972_v37 }
0x1794   :  { %2999 = vrot.lane.b32.xlu1 %v2973_v41, %s5022_s9  ;;  %v2997_v0 = vmul.f32 %v2995_v28, %v2973_v41 }
0x1805   :  { %v2980_v48 = vpop.permute.xlu0 %2979 }
0x1806   :  { %v2982_v44 = vmul.f32 %v2980_v48, %v2972_v37  ;;  %v3000_v9 = vpop.permute.xlu1 %2999 }
0x1807   :  { %v3002_v24 = vmul.f32 %v3000_v9, %v2973_v41 }
0x1808   :  { %2984 = vrot.lane.b32.xlu0 %v2982_v44, %s5013_s1 }
0x1809   :  { %3004 = vrot.lane.b32.xlu1 %v3002_v24, %s5013_s1 }
0x187a   :  { %v2985_v61 = vpop.permute.xlu0 %2984 }
0x187b   :  { %v6248_v1 = vadd.f32 %v2985_v61, %v2977_v60  ;;  %v3005_v2 = vpop.permute.xlu1 %3004 }
0x187c   :  { %v6250_v42 = vadd.f32 %v3005_v2, %v2997_v0 }
0x187d   :  { %4867 = vtanh.f32 %v6248_v1  ;;  %v3089_v48 = vrot.slane %v6248_v1, 6 }
0x187e   :  { %4869 = vtanh.f32 %v6250_v42  ;;  %v3109_v44 = vrot.slane %v6250_v42, 6 }
0x1887   :  { %v4868_v7 = vpop.eup %4867 }
0x1888   :  { %v4870_v34 = vpop.eup %4869  ;;  %2990 = vrot.lane.b32.xlu0 %v4868_v7, %s5022_s9 }
0x1889   :  { %3010 = vrot.lane.b32.xlu1 %v4870_v34, %s5022_s9 }
0x18fa   :  { %v2991_v3 = vpop.permute.xlu0 %2990 }
0x18fb   :  { %v2993_v6 = vmul.f32 %v2991_v3, %v2972_v37  ;;  %v3011_v63 = vpop.permute.xlu1 %3010 }
0x18fc   :  { %v3013_v11 = vmul.f32 %v3011_v63, %v2973_v41 }
0x18fd   :  { %3015 = vrot.lane.b32.xlu0 %v2993_v6, %s5013_s1 }
0x18fe   :  { %3019 = vrot.lane.b32.xlu1 %v3013_v11, %s5022_s9 }
0x196f   :  { %v3016_v36 = vpop.permute.xlu0 %3015 }
0x1970   :  { %v3020_v45 = vpop.permute.xlu1 %3019 }
0x1971   :  { %v3022_v53 = vsel %vm1682_vm11, %v3016_v36, %v3020_v45 }
0x1972   :  { %v3023_v14 = vpack.c.bf16 %v3022_v53, %v3022_v53 }
0x1974   :  { %v3025_v16 = vrot.slane %v3023_v14, 3 }
0x1976   :  { %4241 = vmatmul.mubr.msk.bf16.vlgmr.msra.gmra.mrb[84].mxu0 %vm1980_vm3, %v3025_v16 }
0x1977   :  { %3262 = vmatpush1.bf16.msra.mxu0 %v6263_v29  ;;  %3293 = vmatprep.mubr.bf16.mxu0 %v5019_v17 }
0x1978   :  { %3263 = vmatprep.subr.bf16.mxu0 %v6270_v13 }
0x197b   :  { %3264 = vmatpush1.bf16.msra.mxu0 %v6276_v47 }
0x197c   :  { %3265 = vmatprep.subr.bf16.mxu0 %v6282_v19 }
0x197f   :  { %3266 = vmatpush1.bf16.msra.mxu0 %v6288_v18 }
0x1980   :  { %3267 = vmatprep.subr.bf16.mxu0 %v6294_v57 }
0x1983   :  { %3268 = vmatpush1.bf16.msra.mxu0 %v6300_v59 }
0x1984   :  { %3501 = vmatprep.subr.bf16.mxu0 %v6306_v58 }
0x1a49   :  { %v3063_v20 = vpop.f32.mrb[84].mxu0 }
0x1a4a   :  { %v3070_v21 = vadd.f32 %v6311_v51, %v3063_v20  ;;  %v3065_v22 = vpop.f32.mrb[85].mxu0 }
0x1a4b   :  { %v3071_v52 = vadd.f32 %v6315_v10, %v3065_v22  ;;  %v3067_v43 = vpop.f32.mrb[86].mxu0 }
0x1a4c   :  { %v4242_v12 = vmul.f32 -1.442695, %v3070_v21  ;;  %v3068_v55 = vpop.f32.mrb[87].mxu0 }
0x1a4d   :  { %v4243_v27 = vmul.f32 -1.442695, %v3071_v52 }
0x1a4e   :  { %4871 = vpow2.f32 %v4242_v12 }
0x1a4f   :  { %4873 = vpow2.f32 %v4243_v27 }
0x1a58   :  { %v4872_v35 = vpop.eup %4871 }
0x1a59   :  { %v4874_v62 = vpop.eup %4873  ;;  %v3078_v5 = vadd.f32 1.0, %v4872_v35 }
0x1a5a   :  { %v3079_v50 = vadd.f32 1.0, %v4874_v62 }
0x1a5b   :  { %4875 = vrcp.f32 %v3078_v5 }
0x1a5c   :  { %4877 = vrcp.f32 %v3079_v50 }
0x1a65   :  { %v4876_v4 = vpop.eup %4875 }
0x1a66   :  { %v4878_v56 = vpop.eup %4877  ;;  %v3084_v32 = vmul.f32 %v4876_v4, %v5919_v23 }
0x1a67   :  { %v3085_v8 = vmul.f32 %v4878_v56, %v5900_v25 }
0x1a68   :  { %v3086_v49 = vsub.f32 %v3084_v32, %v5921_v30 }
0x1a69   :  { %v3087_v39 = vsub.f32 %v3085_v8, %v5903_v33 }
0x1a6a   :  { %3093 = vrot.lane.b32.xlu0 %v3086_v49, %s5022_s9  ;;  %v3091_v9 = vmul.f32 %v3089_v48, %v3086_v49 }
0x1a6b   :  { %3113 = vrot.lane.b32.xlu1 %v3087_v39, %s5022_s9  ;;  %v3111_v54 = vmul.f32 %v3109_v44, %v3087_v39 }
0x1adc   :  { %v3094_v46 = vpop.permute.xlu0 %3093 }
0x1add   :  { %v3096_v15 = vmul.f32 %v3094_v46, %v3086_v49  ;;  %v3114_v37 = vpop.permute.xlu1 %3113 }
0x1ade   :  { %v3116_v41 = vmul.f32 %v3114_v37, %v3087_v39 }
0x1adf   :  { %3098 = vrot.lane.b32.xlu0 %v3096_v15, %s5013_s1 }
0x1ae0   :  { %3118 = vrot.lane.b32.xlu1 %v3116_v41, %s5013_s1 }
0x1b51   :  { %v3099_v24 = vpop.permute.xlu0 %3098 }
0x1b52   :  { %v6329_v28 = vadd.f32 %v3099_v24, %v3091_v9  ;;  %v3119_v60 = vpop.permute.xlu1 %3118 }
0x1b53   :  { %v6331_v61 = vadd.f32 %v3119_v60, %v3111_v54 }
0x1b54   :  { %4879 = vtanh.f32 %v6329_v28  ;;  %v3207_v15 = vrot.slane %v6329_v28, 6 }
0x1b55   :  { %4881 = vtanh.f32 %v6331_v61  ;;  %v3227_v37 = vrot.slane %v6331_v61, 6 }
0x1b5e   :  { %v4880_v0 = vpop.eup %4879 }
0x1b5f   :  { %v4882_v2 = vpop.eup %4881  ;;  %3104 = vrot.lane.b32.xlu0 %v4880_v0, %s5022_s9 }
0x1b60   :  { %3124 = vrot.lane.b32.xlu1 %v4882_v2, %s5022_s9 }
0x1bd1   :  { %v3105_v1 = vpop.permute.xlu0 %3104 }
0x1bd2   :  { %v3107_v42 = vmul.f32 %v3105_v1, %v3086_v49  ;;  %v3125_v7 = vpop.permute.xlu1 %3124 }
0x1bd3   :  { %v3127_v34 = vmul.f32 %v3125_v7, %v3087_v39 }
0x1bd4   :  { %3129 = vrot.lane.b32.xlu0 %v3107_v42, %s5013_s1 }
0x1bd5   :  { %3133 = vrot.lane.b32.xlu1 %v3127_v34, %s5022_s9 }
0x1c46   :  { %v3130_v3 = vpop.permute.xlu0 %3129 }
0x1c47   :  { %v3134_v6 = vpop.permute.xlu1 %3133 }
0x1c48   :  { %v3136_v63 = vsel %vm1682_vm11, %v3130_v3, %v3134_v6 }
0x1c49   :  { %v3137_v11 = vpack.c.bf16 %v3136_v63, %v3136_v63 }
0x1c4b   :  { %4244 = vmatmul.mubr.msk.bf16.vlgmr.msra.gmra.mrb[80].mxu1 %vm1980_vm3, %v3137_v11 }
0x1c4c   :  { %3382 = vmatpush1.bf16.msra.mxu1 %v6263_v29  ;;  %3413 = vmatprep.mubr.bf16.mxu1 %v5019_v17 }
0x1c4d   :  { %3383 = vmatprep.subr.bf16.mxu1 %v6270_v13 }
0x1c50   :  { %3384 = vmatpush1.bf16.msra.mxu1 %v6276_v47 }
0x1c51   :  { %3385 = vmatprep.subr.bf16.mxu1 %v6282_v19 }
0x1c54   :  { %3386 = vmatpush1.bf16.msra.mxu1 %v6288_v18 }
0x1c55   :  { %3387 = vmatprep.subr.bf16.mxu1 %v6294_v57 }
0x1c58   :  { %3388 = vmatpush1.bf16.msra.mxu1 %v6300_v59 }
0x1c59   :  { %3613 = vmatprep.subr.bf16.mxu1 %v6306_v58 }
0x1d1e   :  { %v3175_v36 = vpop.f32.mrb[80].mxu1 }
0x1d1f   :  { %v3184_v45 = vrot.slane %v3175_v36, 6  ;;  %v3177_v53 = vpop.f32.mrb[81].mxu1 }
0x1d20   :  { %v3185_v14 = vrot.slane %v3177_v53, 6  ;;  %v3179_v16 = vpop.f32.mrb[82].mxu1 }
0x1d21   :  { %v3188_v20 = vadd.f32 %v6311_v51, %v3184_v45  ;;  %v3180_v21 = vpop.f32.mrb[83].mxu1 }
0x1d22   :  { %v3189_v22 = vadd.f32 %v6315_v10, %v3185_v14 }
0x1d23   :  { %v4245_v52 = vmul.f32 -1.442695, %v3188_v20 }
0x1d24   :  { %v4246_v43 = vmul.f32 -1.442695, %v3189_v22 }
0x1d25   :  { %4883 = vpow2.f32 %v4245_v52 }
0x1d26   :  { %4885 = vpow2.f32 %v4246_v43 }
0x1d2f   :  { %v4884_v12 = vpop.eup %4883 }
0x1d30   :  { %v4886_v55 = vpop.eup %4885  ;;  %v3196_v27 = vadd.f32 1.0, %v4884_v12 }
0x1d31   :  { %v3197_v35 = vadd.f32 1.0, %v4886_v55 }
0x1d32   :  { %4887 = vrcp.f32 %v3196_v27 }
0x1d33   :  { %4889 = vrcp.f32 %v3197_v35 }
0x1d3c   :  { %v4888_v62 = vpop.eup %4887 }
0x1d3d   :  { %v4890_v5 = vpop.eup %4889  ;;  %v3202_v50 = vmul.f32 %v4888_v62, %v5919_v23 }
0x1d3e   :  { %v3203_v4 = vmul.f32 %v4890_v5, %v5900_v25 }
0x1d3f   :  { %v3204_v56 = vsub.f32 %v3202_v50, %v5921_v30 }
0x1d40   :  { %v3205_v32 = vsub.f32 %v3203_v4, %v5903_v33 }
0x1d41   :  { %3211 = vrot.lane.b32.xlu0 %v3204_v56, %s5022_s9  ;;  %v3209_v41 = vmul.f32 %v3207_v15, %v3204_v56 }
0x1d42   :  { %3231 = vrot.lane.b32.xlu1 %v3205_v32, %s5022_s9  ;;  %v3229_v44 = vmul.f32 %v3227_v37, %v3205_v32 }
0x1db3   :  { %v3212_v8 = vpop.permute.xlu0 %3211 }
0x1db4   :  { %v3214_v49 = vmul.f32 %v3212_v8, %v3204_v56  ;;  %v3232_v39 = vpop.permute.xlu1 %3231 }
0x1db5   :  { %v3234_v46 = vmul.f32 %v3232_v39, %v3205_v32 }
0x1db6   :  { %3216 = vrot.lane.b32.xlu0 %v3214_v49, %s5013_s1 }
0x1db7   :  { %3236 = vrot.lane.b32.xlu1 %v3234_v46, %s5013_s1 }
0x1e28   :  { %v3217_v48 = vpop.permute.xlu0 %3216 }
0x1e29   :  { %v6362_v9 = vadd.f32 %v3217_v48, %v3209_v41  ;;  %v3237_v24 = vpop.permute.xlu1 %3236 }
0x1e2a   :  { %v6364_v54 = vadd.f32 %v3237_v24, %v3229_v44 }
0x1e2b   :  { %4891 = vtanh.f32 %v6362_v9  ;;  %v3327_v39 = vrot.slane %v6362_v9, 6 }
0x1e2c   :  { %4893 = vtanh.f32 %v6364_v54  ;;  %v3347_v46 = vrot.slane %v6364_v54, 6 }
0x1e35   :  { %v4892_v60 = vpop.eup %4891 }
0x1e36   :  { %v4894_v0 = vpop.eup %4893  ;;  %3222 = vrot.lane.b32.xlu0 %v4892_v60, %s5022_s9 }
0x1e37   :  { %3242 = vrot.lane.b32.xlu1 %v4894_v0, %s5022_s9 }
0x1ea8   :  { %v3223_v28 = vpop.permute.xlu0 %3222 }
0x1ea9   :  { %v3225_v61 = vmul.f32 %v3223_v28, %v3204_v56  ;;  %v3243_v2 = vpop.permute.xlu1 %3242 }
0x1eaa   :  { %v3245_v1 = vmul.f32 %v3243_v2, %v3205_v32 }
0x1eab   :  { %3247 = vrot.lane.b32.xlu0 %v3225_v61, %s5013_s1 }
0x1eac   :  { %3251 = vrot.lane.b32.xlu1 %v3245_v1, %s5022_s9 }
0x1f1d   :  { %v3248_v42 = vpop.permute.xlu0 %3247 }
0x1f1e   :  { %v3252_v7 = vpop.permute.xlu1 %3251 }
0x1f1f   :  { %v3254_v34 = vsel %vm1682_vm11, %v3248_v42, %v3252_v7 }
0x1f20   :  { %v3255_v3 = vpack.c.bf16 %v3254_v34, %v3254_v34 }
0x1f22   :  { %v3257_v6 = vrot.slane %v3255_v3, 1 }
0x1f24   :  { %4247 = vmatmul.mubr.msk.bf16.vlgmr.msra.gmra.mrb[88].mxu0 %vm1980_vm3, %v3257_v6 }
0x1f25   :  { %3502 = vmatpush1.bf16.msra.mxu0 %v6263_v29  ;;  %3533 = vmatprep.mubr.bf16.mxu0 %v5019_v17 }
0x1f26   :  { %3503 = vmatprep.subr.bf16.mxu0 %v6270_v13 }
0x1f29   :  { %3504 = vmatpush1.bf16.msra.mxu0 %v6276_v47 }
0x1f2a   :  { %3505 = vmatprep.subr.bf16.mxu0 %v6282_v19 }
0x1f2d   :  { %3506 = vmatpush1.bf16.msra.mxu0 %v6288_v18 }
0x1f2e   :  { %3507 = vmatprep.subr.bf16.mxu0 %v6294_v57 }
0x1f31   :  { %3508 = vmatpush1.bf16.msra.mxu0 %v6300_v59 }
0x1f32   :  { %3733 = vmatprep.subr.bf16.mxu0 %v6306_v58 }
0x1ff7   :  { %v3295_v63 = vpop.f32.mrb[88].mxu0 }
0x1ff8   :  { %v3304_v11 = vrot.slane %v3295_v63, 4  ;;  %v3297_v36 = vpop.f32.mrb[89].mxu0 }
0x1ff9   :  { %v3305_v45 = vrot.slane %v3297_v36, 4  ;;  %v3299_v53 = vpop.f32.mrb[90].mxu0 }
0x1ffa   :  { %v3308_v14 = vadd.f32 %v6311_v51, %v3304_v11  ;;  %v3300_v16 = vpop.f32.mrb[91].mxu0 }
0x1ffb   :  { %v3309_v20 = vadd.f32 %v6315_v10, %v3305_v45 }
0x1ffc   :  { %v4248_v21 = vmul.f32 -1.442695, %v3308_v14 }
0x1ffd   :  { %v4249_v22 = vmul.f32 -1.442695, %v3309_v20 }
0x1ffe   :  { %4895 = vpow2.f32 %v4248_v21 }
0x1fff   :  { %4897 = vpow2.f32 %v4249_v22 }
0x2008   :  { %v4896_v52 = vpop.eup %4895 }
0x2009   :  { %v4898_v43 = vpop.eup %4897  ;;  %v3316_v12 = vadd.f32 1.0, %v4896_v52 }
0x200a   :  { %v3317_v55 = vadd.f32 1.0, %v4898_v43 }
0x200b   :  { %4899 = vrcp.f32 %v3316_v12 }
0x200c   :  { %4901 = vrcp.f32 %v3317_v55 }
0x2015   :  { %v4900_v27 = vpop.eup %4899 }
0x2016   :  { %v4902_v35 = vpop.eup %4901  ;;  %v3322_v62 = vmul.f32 %v4900_v27, %v5919_v23 }
0x2017   :  { %v3323_v5 = vmul.f32 %v4902_v35, %v5900_v25 }
0x2018   :  { %v3324_v50 = vsub.f32 %v3322_v62, %v5921_v30 }
0x2019   :  { %v3325_v4 = vsub.f32 %v3323_v5, %v5903_v33 }
0x201a   :  { %3331 = vrot.lane.b32.xlu0 %v3324_v50, %s5022_s9  ;;  %v3329_v15 = vmul.f32 %v3327_v39, %v3324_v50 }
0x201b   :  { %3351 = vrot.lane.b32.xlu1 %v3325_v4, %s5022_s9  ;;  %v3349_v41 = vmul.f32 %v3347_v46, %v3325_v4 }
0x208c   :  { %v3332_v56 = vpop.permute.xlu0 %3331 }
0x208d   :  { %v3334_v32 = vmul.f32 %v3332_v56, %v3324_v50  ;;  %v3352_v8 = vpop.permute.xlu1 %3351 }
0x208e   :  { %v3354_v49 = vmul.f32 %v3352_v8, %v3325_v4 }
0x208f   :  { %3336 = vrot.lane.b32.xlu0 %v3334_v32, %s5013_s1 }
0x2090   :  { %3356 = vrot.lane.b32.xlu1 %v3354_v49, %s5013_s1 }
0x2101   :  { %v3337_v37 = vpop.permute.xlu0 %3336 }
0x2102   :  { %v6395_v48 = vadd.f32 %v3337_v37, %v3329_v15  ;;  %v3357_v44 = vpop.permute.xlu1 %3356 }
0x2103   :  { %v6397_v24 = vadd.f32 %v3357_v44, %v3349_v41 }
0x2104   :  { %4903 = vtanh.f32 %v6395_v48  ;;  %v3447_v56 = vrot.slane %v6395_v48, 6 }
0x2105   :  { %4905 = vtanh.f32 %v6397_v24  ;;  %v3467_v32 = vrot.slane %v6397_v24, 6 }
0x210e   :  { %v4904_v60 = vpop.eup %4903 }
0x210f   :  { %v4906_v0 = vpop.eup %4905  ;;  %3342 = vrot.lane.b32.xlu0 %v4904_v60, %s5022_s9 }
0x2110   :  { %3362 = vrot.lane.b32.xlu1 %v4906_v0, %s5022_s9 }
0x2181   :  { %v3343_v9 = vpop.permute.xlu0 %3342 }
0x2182   :  { %v3345_v54 = vmul.f32 %v3343_v9, %v3324_v50  ;;  %v3363_v28 = vpop.permute.xlu1 %3362 }
0x2183   :  { %v3365_v61 = vmul.f32 %v3363_v28, %v3325_v4 }
0x2184   :  { %3367 = vrot.lane.b32.xlu0 %v3345_v54, %s5013_s1 }
0x2185   :  { %3371 = vrot.lane.b32.xlu1 %v3365_v61, %s5022_s9 }
0x21f6   :  { %v3368_v2 = vpop.permute.xlu0 %3367 }
0x21f7   :  { %v3372_v1 = vpop.permute.xlu1 %3371 }
0x21f8   :  { %v3374_v42 = vsel %vm1682_vm11, %v3368_v2, %v3372_v1  ;;  %v6451_v1 = vadd.f32 %v6059_v26, %v5907_v40 }
0x21f9   :  { %v3375_v7 = vpack.c.bf16 %v3374_v42, %v3374_v42  ;;  %v6455_v42 = vadd.f32 %v6061_v31, %v5742_v38 }
0x21fb   :  { %v3377_v34 = vrot.slane %v3375_v7, 2 }
0x21fd   :  { %4250 = vmatmul.mubr.msk.bf16.vlgmr.msra.gmra.mrb[84].mxu1 %vm1980_vm3, %v3377_v34 }
0x21fe   :  { %3614 = vmatpush1.bf16.msra.mxu1 %v6263_v29  ;;  %3645 = vmatprep.mubr.bf16.mxu1 %v5019_v17 }
0x21ff   :  { %3615 = vmatprep.subr.bf16.mxu1 %v6270_v13 }
0x2202   :  { %3616 = vmatpush1.bf16.msra.mxu1 %v6276_v47 }
0x2203   :  { %3617 = vmatprep.subr.bf16.mxu1 %v6282_v19 }
0x2206   :  { %3618 = vmatpush1.bf16.msra.mxu1 %v6288_v18 }
0x2207   :  { %3619 = vmatprep.subr.bf16.mxu1 %v6294_v57 }
0x220a   :  { %3620 = vmatpush1.bf16.msra.mxu1 %v6300_v59 }
0x220b   :  { %3853 = vmatprep.subr.bf16.mxu1 %v6306_v58 }
0x22d0   :  { %v3415_v3 = vpop.f32.mrb[84].mxu1 }
0x22d1   :  { %v3424_v6 = vrot.slane %v3415_v3, 2  ;;  %v3417_v63 = vpop.f32.mrb[85].mxu1 }
0x22d2   :  { %v3425_v11 = vrot.slane %v3417_v63, 2  ;;  %v3419_v36 = vpop.f32.mrb[86].mxu1 }
0x22d3   :  { %v3428_v45 = vadd.f32 %v6311_v51, %v3424_v6  ;;  %v3420_v53 = vpop.f32.mrb[87].mxu1 }
0x22d4   :  { %v3429_v14 = vadd.f32 %v6315_v10, %v3425_v11 }
0x22d5   :  { %v4251_v16 = vmul.f32 -1.442695, %v3428_v45 }
0x22d6   :  { %v4252_v20 = vmul.f32 -1.442695, %v3429_v14 }
0x22d7   :  { %4907 = vpow2.f32 %v4251_v16 }
0x22d8   :  { %4909 = vpow2.f32 %v4252_v20 }
0x22e1   :  { %v4908_v21 = vpop.eup %4907 }
0x22e2   :  { %v4910_v22 = vpop.eup %4909  ;;  %v3436_v52 = vadd.f32 1.0, %v4908_v21 }
0x22e3   :  { %v3437_v43 = vadd.f32 1.0, %v4910_v22 }
0x22e4   :  { %4911 = vrcp.f32 %v3436_v52 }
0x22e5   :  { %4913 = vrcp.f32 %v3437_v43 }
0x22ee   :  { %v4912_v12 = vpop.eup %4911 }
0x22ef   :  { %v4914_v55 = vpop.eup %4913  ;;  %v3442_v27 = vmul.f32 %v4912_v12, %v5919_v23 }
0x22f0   :  { %v3443_v35 = vmul.f32 %v4914_v55, %v5900_v25 }
0x22f1   :  { %v3444_v51 = vsub.f32 %v3442_v27, %v5921_v30 }
0x22f2   :  { %v3445_v10 = vsub.f32 %v3443_v35, %v5903_v33 }
0x22f3   :  { %3451 = vrot.lane.b32.xlu0 %v3444_v51, %s5022_s9  ;;  %v3449_v8 = vmul.f32 %v3447_v56, %v3444_v51 }
0x22f4   :  { %3471 = vrot.lane.b32.xlu1 %v3445_v10, %s5022_s9  ;;  %v3469_v39 = vmul.f32 %v3467_v32, %v3445_v10 }
0x2365   :  { %v3452_v62 = vpop.permute.xlu0 %3451 }
0x2366   :  { %v3454_v5 = vmul.f32 %v3452_v62, %v3444_v51  ;;  %v3472_v50 = vpop.permute.xlu1 %3471 }
0x2367   :  { %v3474_v4 = vmul.f32 %v3472_v50, %v3445_v10 }
0x2368   :  { %3456 = vrot.lane.b32.xlu0 %v3454_v5, %s5013_s1 }
0x2369   :  { %3476 = vrot.lane.b32.xlu1 %v3474_v4, %s5013_s1 }
0x23da   :  { %v3457_v49 = vpop.permute.xlu0 %3456 }
0x23db   :  { %v6428_v46 = vadd.f32 %v3457_v49, %v3449_v8  ;;  %v3477_v15 = vpop.permute.xlu1 %3476 }
0x23dc   :  { %v6430_v37 = vadd.f32 %v3477_v15, %v3469_v39 }
0x23dd   :  { %4915 = vtanh.f32 %v6428_v46  ;;  %v3561_v27 = vrot.slane %v6428_v46, 6 }
0x23de   :  { %4917 = vtanh.f32 %v6430_v37  ;;  %v3581_v35 = vrot.slane %v6430_v37, 6 }
0x23e7   :  { %v4916_v41 = vpop.eup %4915 }
0x23e8   :  { %v4918_v44 = vpop.eup %4917  ;;  %3462 = vrot.lane.b32.xlu0 %v4916_v41, %s5022_s9 }
0x23e9   :  { %3482 = vrot.lane.b32.xlu1 %v4918_v44, %s5022_s9 }
0x245a   :  { %v3463_v48 = vpop.permute.xlu0 %3462 }
0x245b   :  { %v3465_v24 = vmul.f32 %v3463_v48, %v3444_v51  ;;  %v3483_v60 = vpop.permute.xlu1 %3482 }
0x245c   :  { %v3485_v0 = vmul.f32 %v3483_v60, %v3445_v10 }
0x245d   :  { %3487 = vrot.lane.b32.xlu0 %v3465_v24, %s5013_s1 }
0x245e   :  { %3491 = vrot.lane.b32.xlu1 %v3485_v0, %s5022_s9 }
0x24cf   :  { %v3488_v9 = vpop.permute.xlu0 %3487 }
0x24d0   :  { %v3492_v54 = vpop.permute.xlu1 %3491 }
0x24d1   :  { %v3494_v28 = vsel %vm1682_vm11, %v3488_v9, %v3492_v54 }
0x24d2   :  { %v3495_v61 = vpack.c.bf16 %v3494_v28, %v3494_v28 }
0x24d4   :  { %v3497_v2 = vrot.slane %v3495_v61, 3 }
0x24d6   :  { %4253 = vmatmul.mubr.msk.bf16.vlgmr.msra.gmra.mrb[92].mxu0 %vm1980_vm3, %v3497_v2 }
0x24d7   :  { %3734 = vmatpush1.bf16.msra.mxu0 %v6263_v29  ;;  %3765 = vmatprep.mubr.bf16.mxu0 %v5019_v17 }
0x24d8   :  { %3735 = vmatprep.subr.bf16.mxu0 %v6270_v13 }
0x24db   :  { %3736 = vmatpush1.bf16.msra.mxu0 %v6276_v47 }
0x24dc   :  { %3737 = vmatprep.subr.bf16.mxu0 %v6282_v19 }
0x24df   :  { %3738 = vmatpush1.bf16.msra.mxu0 %v6288_v18 }
0x24e0   :  { %3739 = vmatprep.subr.bf16.mxu0 %v6294_v57 }
0x24e3   :  { %3740 = vmatpush1.bf16.msra.mxu0 %v6300_v59 }
0x24e4   :  { %3973 = vmatprep.subr.bf16.mxu0 %v6306_v58 }
0x25a9   :  { %v3535_v7 = vpop.f32.mrb[92].mxu0 }
0x25aa   :  { %v3542_v34 = vadd.f32 %v6451_v1, %v3535_v7  ;;  %v3537_v3 = vpop.f32.mrb[93].mxu0 }
0x25ab   :  { %v3543_v6 = vadd.f32 %v6455_v42, %v3537_v3  ;;  %v3539_v63 = vpop.f32.mrb[94].mxu0 }
0x25ac   :  { %v4254_v11 = vmul.f32 -1.442695, %v3542_v34  ;;  %v3540_v36 = vpop.f32.mrb[95].mxu0 }
0x25ad   :  { %v4255_v45 = vmul.f32 -1.442695, %v3543_v6 }
0x25ae   :  { %4919 = vpow2.f32 %v4254_v11 }
0x25af   :  { %4921 = vpow2.f32 %v4255_v45 }
0x25b8   :  { %v4920_v58 = vpop.eup %4919 }
0x25b9   :  { %v4922_v53 = vpop.eup %4921  ;;  %v3550_v40 = vadd.f32 1.0, %v4920_v58 }
0x25ba   :  { %v3551_v26 = vadd.f32 1.0, %v4922_v53 }
0x25bb   :  { %4923 = vrcp.f32 %v3550_v40 }
0x25bc   :  { %4925 = vrcp.f32 %v3551_v26 }
0x25c5   :  { %v4924_v31 = vpop.eup %4923 }
0x25c6   :  { %v4926_v14 = vpop.eup %4925  ;;  %v3556_v16 = vmul.f32 %v4924_v31, %v5919_v23 }
0x25c7   :  { %v3557_v20 = vmul.f32 %v4926_v14, %v5900_v25 }
0x25c8   :  { %v3558_v21 = vsub.f32 %v3556_v16, %v5921_v30 }
0x25c9   :  { %v3559_v22 = vsub.f32 %v3557_v20, %v5903_v33 }
0x25ca   :  { %3565 = vrot.lane.b32.xlu0 %v3558_v21, %s5022_s9  ;;  %v3563_v51 = vmul.f32 %v3561_v27, %v3558_v21 }
0x25cb   :  { %3585 = vrot.lane.b32.xlu1 %v3559_v22, %s5022_s9  ;;  %v3583_v62 = vmul.f32 %v3581_v35, %v3559_v22 }
0x263c   :  { %v3566_v52 = vpop.permute.xlu0 %3565 }
0x263d   :  { %v3568_v43 = vmul.f32 %v3566_v52, %v3558_v21  ;;  %v3586_v12 = vpop.permute.xlu1 %3585 }
0x263e   :  { %v3588_v55 = vmul.f32 %v3586_v12, %v3559_v22 }
0x263f   :  { %3570 = vrot.lane.b32.xlu0 %v3568_v43, %s5013_s1 }
0x2640   :  { %3590 = vrot.lane.b32.xlu1 %v3588_v55, %s5013_s1 }
0x26b1   :  { %v3571_v10 = vpop.permute.xlu0 %3570 }
0x26b2   :  { %v6469_v5 = vadd.f32 %v3571_v10, %v3563_v51  ;;  %v3591_v50 = vpop.permute.xlu1 %3590 }
0x26b3   :  { %v6471_v4 = vadd.f32 %v3591_v50, %v3583_v62 }
0x26b4   :  { %4927 = vtanh.f32 %v6469_v5  ;;  %v3679_v20 = vrot.slane %v6469_v5, 6 }
0x26b5   :  { %4929 = vtanh.f32 %v6471_v4 }
0x26be   :  { %v4928_v56 = vpop.eup %4927 }
0x26bf   :  { %v4930_v32 = vpop.eup %4929  ;;  %3576 = vrot.lane.b32.xlu0 %v4928_v56, %s5022_s9 }
0x26c0   :  { %3596 = vrot.lane.b32.xlu1 %v4930_v32, %s5022_s9 }
0x2731   :  { %v3577_v8 = vpop.permute.xlu0 %3576 }
0x2732   :  { %v3579_v49 = vmul.f32 %v3577_v8, %v3558_v21  ;;  %v3597_v39 = vpop.permute.xlu1 %3596  ;;  %v3699_v21 = vrot.slane %v6471_v4, 6 }
0x2733   :  { %v3599_v46 = vmul.f32 %v3597_v39, %v3559_v22 }
0x2734   :  { %3601 = vrot.lane.b32.xlu0 %v3579_v49, %s5013_s1 }
0x2735   :  { %3605 = vrot.lane.b32.xlu1 %v3599_v46, %s5022_s9 }
0x27a6   :  { %v3602_v15 = vpop.permute.xlu0 %3601 }
0x27a7   :  { %v3606_v37 = vpop.permute.xlu1 %3605 }
0x27a8   :  { %v3608_v41 = vsel %vm1682_vm11, %v3602_v15, %v3606_v37 }
0x27a9   :  { %v3609_v44 = vpack.c.bf16 %v3608_v41, %v3608_v41 }
0x27ab   :  { %4256 = vmatmul.mubr.msk.bf16.vlgmr.msra.gmra.mrb[88].mxu1 %vm1980_vm3, %v3609_v44 }
0x27ac   :  { %3854 = vmatpush1.bf16.msra.mxu1 %v6263_v29  ;;  %3885 = vmatprep.mubr.bf16.mxu1 %v5019_v17 }
0x27ad   :  { %3855 = vmatprep.subr.bf16.mxu1 %v6270_v13 }
0x27b0   :  { %3856 = vmatpush1.bf16.msra.mxu1 %v6276_v47 }
0x27b1   :  { %3857 = vmatprep.subr.bf16.mxu1 %v6282_v19 }
0x27b4   :  { %3858 = vmatpush1.bf16.msra.mxu1 %v6288_v18 }
0x27b5   :  { %3859 = vmatprep.subr.bf16.mxu1 %v6294_v57 }
0x27b8   :  { %3860 = vmatpush1.bf16.msra.mxu1 %v6300_v59 }
0x287e   :  { %v3647_v48 = vpop.f32.mrb[88].mxu1 }
0x287f   :  { %v3656_v24 = vrot.slane %v3647_v48, 6  ;;  %v3649_v60 = vpop.f32.mrb[89].mxu1 }
0x2880   :  { %v3657_v0 = vrot.slane %v3649_v60, 6  ;;  %v3651_v9 = vpop.f32.mrb[90].mxu1 }
0x2881   :  { %v3660_v54 = vadd.f32 %v6451_v1, %v3656_v24  ;;  %v3652_v28 = vpop.f32.mrb[91].mxu1 }
0x2882   :  { %v3661_v61 = vadd.f32 %v6455_v42, %v3657_v0 }
0x2883   :  { %v4257_v2 = vmul.f32 -1.442695, %v3660_v54 }
0x2884   :  { %v4258_v7 = vmul.f32 -1.442695, %v3661_v61 }
0x2885   :  { %4931 = vpow2.f32 %v4257_v2 }
0x2886   :  { %4933 = vpow2.f32 %v4258_v7 }
0x288f   :  { %v4932_v34 = vpop.eup %4931 }
0x2890   :  { %v4934_v3 = vpop.eup %4933  ;;  %v3668_v6 = vadd.f32 1.0, %v4932_v34 }
0x2891   :  { %v3669_v63 = vadd.f32 1.0, %v4934_v3 }
0x2892   :  { %4935 = vrcp.f32 %v3668_v6 }
0x2893   :  { %4937 = vrcp.f32 %v3669_v63 }
0x289c   :  { %v4936_v11 = vpop.eup %4935 }
0x289d   :  { %v4938_v36 = vpop.eup %4937  ;;  %v3674_v45 = vmul.f32 %v4936_v11, %v5919_v23 }
0x289e   :  { %v3675_v58 = vmul.f32 %v4938_v36, %v5900_v25 }
0x289f   :  { %v3676_v53 = vsub.f32 %v3674_v45, %v5921_v30 }
0x28a0   :  { %v3677_v40 = vsub.f32 %v3675_v58, %v5903_v33 }
0x28a1   :  { %3683 = vrot.lane.b32.xlu0 %v3676_v53, %s5022_s9  ;;  %v3681_v22 = vmul.f32 %v3679_v20, %v3676_v53 }
0x28a2   :  { %3703 = vrot.lane.b32.xlu1 %v3677_v40, %s5022_s9  ;;  %v3701_v43 = vmul.f32 %v3699_v21, %v3677_v40 }
0x2913   :  { %v3684_v26 = vpop.permute.xlu0 %3683 }
0x2914   :  { %v3686_v31 = vmul.f32 %v3684_v26, %v3676_v53  ;;  %v3704_v14 = vpop.permute.xlu1 %3703 }
0x2915   :  { %v3706_v16 = vmul.f32 %v3704_v14, %v3677_v40 }
0x2916   :  { %3688 = vrot.lane.b32.xlu0 %v3686_v31, %s5013_s1 }
0x2917   :  { %3708 = vrot.lane.b32.xlu1 %v3706_v16, %s5013_s1 }
0x2988   :  { %v3689_v52 = vpop.permute.xlu0 %3688 }
0x2989   :  { %v6501_v12 = vadd.f32 %v3689_v52, %v3681_v22  ;;  %v3709_v55 = vpop.permute.xlu1 %3708 }
0x298a   :  { %v6503_v27 = vadd.f32 %v3709_v55, %v3701_v43 }
0x298b   :  { %4939 = vtanh.f32 %v6501_v12  ;;  %v3799_v34 = vrot.slane %v6501_v12, 6 }
0x298c   :  { %4941 = vtanh.f32 %v6503_v27  ;;  %v3819_v3 = vrot.slane %v6503_v27, 6 }
0x2995   :  { %v4940_v35 = vpop.eup %4939 }
0x2996   :  { %v4942_v51 = vpop.eup %4941  ;;  %3694 = vrot.lane.b32.xlu0 %v4940_v35, %s5022_s9 }
0x2997   :  { %3714 = vrot.lane.b32.xlu1 %v4942_v51, %s5022_s9 }
0x2a08   :  { %v3695_v10 = vpop.permute.xlu0 %3694 }
0x2a09   :  { %v3697_v62 = vmul.f32 %v3695_v10, %v3676_v53  ;;  %v3715_v5 = vpop.permute.xlu1 %3714 }
0x2a0a   :  { %v3717_v50 = vmul.f32 %v3715_v5, %v3677_v40 }
0x2a0b   :  { %3719 = vrot.lane.b32.xlu0 %v3697_v62, %s5013_s1 }
0x2a0c   :  { %3723 = vrot.lane.b32.xlu1 %v3717_v50, %s5022_s9 }
0x2a7d   :  { %v3720_v4 = vpop.permute.xlu0 %3719 }
0x2a7e   :  { %v3724_v56 = vpop.permute.xlu1 %3723 }
0x2a7f   :  { %v3726_v32 = vsel %vm1682_vm11, %v3720_v4, %v3724_v56 }
0x2a80   :  { %v3727_v8 = vpack.c.bf16 %v3726_v32, %v3726_v32 }
0x2a82   :  { %v3729_v49 = vrot.slane %v3727_v8, 1 }
0x2a84   :  { %4259 = vmatmul.mubr.msk.bf16.vlgmr.msra.gmra.mrb[96].mxu0 %vm1980_vm3, %v3729_v49 }
0x2a85   :  { %3974 = vmatpush1.bf16.msra.mxu0 %v6263_v29  ;;  %4005 = vmatprep.mubr.bf16.mxu0 %v5019_v17 }
0x2a86   :  { %3975 = vmatprep.subr.bf16.mxu0 %v6270_v13 }
0x2a89   :  { %3976 = vmatpush1.bf16.msra.mxu0 %v6276_v47 }
0x2a8a   :  { %3977 = vmatprep.subr.bf16.mxu0 %v6282_v19 }
0x2a8d   :  { %3978 = vmatpush1.bf16.msra.mxu0 %v6288_v18 }
0x2a8e   :  { %3979 = vmatprep.subr.bf16.mxu0 %v6294_v57 }
0x2a91   :  { %3980 = vmatpush1.bf16.msra.mxu0 %v6300_v59 }
0x2b57   :  { %v3767_v39 = vpop.f32.mrb[96].mxu0 }
0x2b58   :  { %v3776_v46 = vrot.slane %v3767_v39, 4  ;;  %v3769_v15 = vpop.f32.mrb[97].mxu0 }
0x2b59   :  { %v3777_v37 = vrot.slane %v3769_v15, 4  ;;  %v3771_v41 = vpop.f32.mrb[98].mxu0 }
0x2b5a   :  { %v3780_v29 = vadd.f32 %v6451_v1, %v3776_v46  ;;  %v3772_v17 = vpop.f32.mrb[99].mxu0 }
0x2b5b   :  { %v3781_v13 = vadd.f32 %v6455_v42, %v3777_v37 }
0x2b5c   :  { %v4260_v44 = vmul.f32 -1.442695, %v3780_v29 }
0x2b5d   :  { %v4261_v47 = vmul.f32 -1.442695, %v3781_v13 }
0x2b5e   :  { %4943 = vpow2.f32 %v4260_v44 }
0x2b5f   :  { %4945 = vpow2.f32 %v4261_v47 }
0x2b68   :  { %v4944_v19 = vpop.eup %4943 }
0x2b69   :  { %v4946_v18 = vpop.eup %4945  ;;  %v3788_v48 = vadd.f32 1.0, %v4944_v19 }
0x2b6a   :  { %v3789_v57 = vadd.f32 1.0, %v4946_v18 }
0x2b6b   :  { %4947 = vrcp.f32 %v3788_v48 }
0x2b6c   :  { %4949 = vrcp.f32 %v3789_v57 }
0x2b75   :  { %v4948_v59 = vpop.eup %4947 }
0x2b76   :  { %v4950_v24 = vpop.eup %4949  ;;  %v3794_v60 = vmul.f32 %v4948_v59, %v5919_v23 }
0x2b77   :  { %v3795_v0 = vmul.f32 %v4950_v24, %v5900_v25 }
0x2b78   :  { %v3796_v9 = vsub.f32 %v3794_v60, %v5921_v30 }
0x2b79   :  { %v3797_v54 = vsub.f32 %v3795_v0, %v5903_v33 }
0x2b7a   :  { %3803 = vrot.lane.b32.xlu0 %v3796_v9, %s5022_s9  ;;  %v3801_v6 = vmul.f32 %v3799_v34, %v3796_v9 }
0x2b7b   :  { %3823 = vrot.lane.b32.xlu1 %v3797_v54, %s5022_s9  ;;  %v3821_v11 = vmul.f32 %v3819_v3, %v3797_v54 }
0x2bec   :  { %v3804_v28 = vpop.permute.xlu0 %3803 }
0x2bed   :  { %v3806_v61 = vmul.f32 %v3804_v28, %v3796_v9  ;;  %v3824_v2 = vpop.permute.xlu1 %3823 }
0x2bee   :  { %v3826_v7 = vmul.f32 %v3824_v2, %v3797_v54 }
0x2bef   :  { %3808 = vrot.lane.b32.xlu0 %v3806_v61, %s5013_s1 }
0x2bf0   :  { %3828 = vrot.lane.b32.xlu1 %v3826_v7, %s5013_s1 }
0x2c61   :  { %v3809_v63 = vpop.permute.xlu0 %3808 }
0x2c62   :  { %v3811_v36 = vadd.f32 %v3809_v63, %v3801_v6  ;;  %v3829_v45 = vpop.permute.xlu1 %3828 }
0x2c63   :  { %v3831_v58 = vadd.f32 %v3829_v45, %v3821_v11 }
0x2c64   :  { %4951 = vtanh.f32 %v3811_v36  ;;  %v3919_v44 = vrot.slane %v3811_v36, 6 }
0x2c65   :  { %4953 = vtanh.f32 %v3831_v58 }
0x2c6e   :  { %v4952_v53 = vpop.eup %4951 }
0x2c6f   :  { %v4954_v40 = vpop.eup %4953  ;;  %3814 = vrot.lane.b32.xlu0 %v4952_v53, %s5022_s9 }
0x2c70   :  { %3834 = vrot.lane.b32.xlu1 %v4954_v40, %s5022_s9 }
0x2ce1   :  { %v3815_v26 = vpop.permute.xlu0 %3814 }
0x2ce2   :  { %v3817_v31 = vmul.f32 %v3815_v26, %v3796_v9  ;;  %v3835_v14 = vpop.permute.xlu1 %3834 }
0x2ce3   :  { %v3837_v16 = vmul.f32 %v3835_v14, %v3797_v54 }
0x2ce4   :  { %3839 = vrot.lane.b32.xlu0 %v3817_v31, %s5013_s1 }
0x2ce5   :  { %3843 = vrot.lane.b32.xlu1 %v3837_v16, %s5022_s9 }
0x2d56   :  { %v3840_v20 = vpop.permute.xlu0 %3839 }
0x2d57   :  { %v3844_v21 = vpop.permute.xlu1 %3843 }
0x2d58   :  { %v3846_v22 = vsel %vm1682_vm11, %v3840_v20, %v3844_v21 }
0x2d59   :  { %v3847_v52 = vpack.c.bf16 %v3846_v22, %v3846_v22 }
0x2d5b   :  { %v3849_v43 = vrot.slane %v3847_v52, 2 }
0x2d5d   :  { %4262 = vmatmul.mubr.msk.bf16.vlgmr.msra.gmra.mrb[92].mxu1 %vm1980_vm3, %v3849_v43 }
0x2e30   :  { %v3887_v12 = vpop.f32.mrb[92].mxu1 }
0x2e31   :  { %v3896_v55 = vrot.slane %v3887_v12, 2  ;;  %v3889_v27 = vpop.f32.mrb[93].mxu1 }
0x2e32   :  { %v3897_v35 = vrot.slane %v3889_v27, 2  ;;  %v3891_v51 = vpop.f32.mrb[94].mxu1 }
0x2e33   :  { %v3900_v10 = vadd.f32 %v6451_v1, %v3896_v55  ;;  %v3892_v62 = vpop.f32.mrb[95].mxu1 }
0x2e34   :  { %v3901_v5 = vadd.f32 %v6455_v42, %v3897_v35 }
0x2e35   :  { %v4263_v50 = vmul.f32 -1.442695, %v3900_v10 }
0x2e36   :  { %v4264_v4 = vmul.f32 -1.442695, %v3901_v5 }
0x2e37   :  { %4955 = vpow2.f32 %v4263_v50 }
0x2e38   :  { %4957 = vpow2.f32 %v4264_v4 }
0x2e41   :  { %v4956_v56 = vpop.eup %4955 }
0x2e42   :  { %v4958_v32 = vpop.eup %4957  ;;  %v3908_v8 = vadd.f32 1.0, %v4956_v56 }
0x2e43   :  { %v3909_v49 = vadd.f32 1.0, %v4958_v32 }
0x2e44   :  { %4959 = vrcp.f32 %v3908_v8 }
0x2e45   :  { %4961 = vrcp.f32 %v3909_v49 }
0x2e4e   :  { %v4960_v39 = vpop.eup %4959 }
0x2e4f   :  { %v4962_v46 = vpop.eup %4961  ;;  %v3914_v15 = vmul.f32 %v4960_v39, %v5919_v23  ;;  %v3939_v23 = vrot.slane %v3831_v58, 6 }
0x2e50   :  { %v3915_v37 = vmul.f32 %v4962_v46, %v5900_v25 }
0x2e51   :  { %v3916_v1 = vsub.f32 %v3914_v15, %v5921_v30 }
0x2e52   :  { %v3917_v42 = vsub.f32 %v3915_v37, %v5903_v33 }
0x2e53   :  { %3923 = vrot.lane.b32.xlu0 %v3916_v1, %s5022_s9  ;;  %v3921_v47 = vmul.f32 %v3919_v44, %v3916_v1 }
0x2e54   :  { %3943 = vrot.lane.b32.xlu1 %v3917_v42, %s5022_s9  ;;  %v3941_v18 = vmul.f32 %v3939_v23, %v3917_v42 }
0x2ec5   :  { %v3924_v41 = vpop.permute.xlu0 %3923 }
0x2ec6   :  { %v3926_v29 = vmul.f32 %v3924_v41, %v3916_v1  ;;  %v3944_v17 = vpop.permute.xlu1 %3943 }
0x2ec7   :  { %v3946_v13 = vmul.f32 %v3944_v17, %v3917_v42 }
0x2ec8   :  { %3928 = vrot.lane.b32.xlu0 %v3926_v29, %s5013_s1 }
0x2ec9   :  { %3948 = vrot.lane.b32.xlu1 %v3946_v13, %s5013_s1 }
0x2f3a   :  { %v3929_v19 = vpop.permute.xlu0 %3928 }
0x2f3b   :  { %v3931_v30 = vadd.f32 %v3929_v19, %v3921_v47  ;;  %v3949_v48 = vpop.permute.xlu1 %3948 }
0x2f3c   :  { %v3951_v57 = vadd.f32 %v3949_v48, %v3941_v18 }
0x2f3d   :  { %4963 = vtanh.f32 %v3931_v30 }
0x2f3e   :  { %4965 = vtanh.f32 %v3951_v57  ;;  %v4023_v20 = vrot.slane %v3951_v57, 6 }
0x2f47   :  { %v4964_v59 = vpop.eup %4963 }
0x2f48   :  { %v4966_v24 = vpop.eup %4965  ;;  %3934 = vrot.lane.b32.xlu0 %v4964_v59, %s5022_s9 }
0x2f49   :  { %3954 = vrot.lane.b32.xlu1 %v4966_v24, %s5022_s9 }
0x2fba   :  { %v3935_v60 = vpop.permute.xlu0 %3934 }
0x2fbb   :  { %v3937_v0 = vmul.f32 %v3935_v60, %v3916_v1  ;;  %v3955_v9 = vpop.permute.xlu1 %3954 }
0x2fbc   :  { %v3957_v54 = vmul.f32 %v3955_v9, %v3917_v42 }
0x2fbd   :  { %3959 = vrot.lane.b32.xlu0 %v3937_v0, %s5013_s1 }
0x2fbe   :  { %3963 = vrot.lane.b32.xlu1 %v3957_v54, %s5022_s9 }
0x302f   :  { %v3960_v28 = vpop.permute.xlu0 %3959 }
0x3030   :  { %v3964_v61 = vpop.permute.xlu1 %3963 }
0x3031   :  { %v3966_v2 = vsel %vm1682_vm11, %v3960_v28, %v3964_v61 }
0x3032   :  { %v3967_v7 = vpack.c.bf16 %v3966_v2, %v3966_v2 }
0x3034   :  { %v3969_v34 = vrot.slane %v3967_v7, 3 }
0x3036   :  { %4265 = vmatmul.mubr.msk.bf16.vlgmr.msra.gmra.mrb[100].mxu0 %vm1980_vm3, %v3969_v34 }
0x3109   :  { %v4007_v3 = vpop.f32.mrb[100].mxu0 }
0x310a   :  { %v4008_v6 = vpop.f32.mrb[101].mxu0 }
0x310b   :  { %v4013_v63 = vadd.f32 %v4008_v6, %v5742_v38  ;;  %v4010_v11 = vpop.f32.mrb[102].mxu0 }
0x310c   :  { %v4011_v36 = vpop.f32.mrb[103].mxu0 }
0x310d   :  { %v4266_v45 = vmul.f32 -1.442695, %v4013_v63 }
0x310f   :  { %4967 = vpow2.f32 %v4266_v45 }
0x3119   :  { %v4968_v58 = vpop.eup %4967 }
0x311a   :  { %v4017_v53 = vadd.f32 1.0, %v4968_v58 }
0x311c   :  { %4969 = vrcp.f32 %v4017_v53 }
0x3126   :  { %v4970_v40 = vpop.eup %4969 }
0x3127   :  { %v4020_v26 = vmul.f32 %v4970_v40, %v5900_v25 }
0x3129   :  { %v4021_v31 = vsub.f32 %v4020_v26, %v5903_v33 }
0x312b   :  { %4027 = vrot.lane.b32.xlu0 %v4021_v31, %s5022_s9  ;;  %v4025_v38 = vmul.f32 %v4023_v20, %v4021_v31 }
0x319d   :  { %v4028_v14 = vpop.permute.xlu0 %4027 }
0x319e   :  { %v4030_v16 = vmul.f32 %v4028_v14, %v4021_v31 }
0x31a0   :  { %4032 = vrot.lane.b32.xlu1 %v4030_v16, %s5013_s1 }
0x3212   :  { %v4033_v21 = vpop.permute.xlu1 %4032 }
0x3213   :  { %v4035_v22 = vadd.f32 %v4033_v21, %v4025_v38 }
0x3215   :  { %4971 = vtanh.f32 %v4035_v22 }
0x321f   :  { %v4972_v52 = vpop.eup %4971 }
0x3220   :  { %4038 = vrot.lane.b32.xlu0 %v4972_v52, %s5022_s9 }
0x3292   :  { %v4039_v43 = vpop.permute.xlu0 %4038 }
0x3293   :  { %v4041_v12 = vmul.f32 %v4039_v43, %v4021_v31 }
0x3295   :  { %4043 = vrot.lane.b32.xlu1 %v4041_v12, %s5013_s1 }
0x3307   :  { %v4044_v25 = vpop.permute.xlu1 %4043 }
0x3308   :  { %4047 = vst.msk [vmem:[#allocation2] sm:$0x3] %vm4046_vm4, %v4044_v25 }
0x3309   :  { %4992 = shalt.err (!%p4989_p4)
}
0x330a   :  { %s4993_s9 = scalar_lea.hbm %s6584_s10, 32 }
0x330b   :  { %p4994_p5 = scmp.ne.s32.totalorder %s6584_s10, %s4993_s9  ;;  %p4997_p6 = scmp.lt.u32.totalorder %s4993_s9, %s6584_s10 }
0x330d   :  { %p4999_p7 = pnand %p4997_p6, %p4994_p5 }
0x330f   :  { %5002 = shalt.err (!%p4999_p7)
}
0x3310   :  { %4057 = dma.vmem_to_hbm [thread:$0]  %s4055_s4, 32, %s6584_s10, [#allocation3]  }
0x3311   :  { %5003 = dma.done.wait [#allocation3], 32  }
0x3312   :  { %5004 = vsyncadd [#allocation3], 4294967264 }
0x3313   :  { %4061 = vsyncpa [#allocation3], 1 }

</bundles_post_ra>
